<compile_context>
chip_gen: v6e
topology: v6e:2x2x1
jax: 0.10.0
libtpu: 0.0.40
codegen_flags: <defaults>
</compile_context>

<pallas_src>
import jax
import jax.numpy as jnp
from jax.experimental import pallas as pl
from jax.experimental.pallas import tpu as pltpu

# ---------------- small ViT config (scaled-down vit_base_patch16_224) ----------------
B = 2                      # batch
C = 3                      # input channels
IMG = 16                   # image H = W
PATCH = 8                  # patch size
N_PATCH = (IMG // PATCH) ** 2          # 4 patches
SEQ = N_PATCH + 1                      # +1 cls token -> 5
T = B * SEQ                            # total tokens in the fused kernel (10)
D = 32                     # embed dim (768 in real ViT-B)
HEADS = 4
HD = D // HEADS
MLP = 4 * D
DEPTH = 2                  # transformer blocks
LN_EPS = 1e-6
H1, H2, NUM_CLASSES = 2048, 512, 1     # head sizes exactly as in the PyTorch module
CPP = C * PATCH * PATCH    # flattened patch length (192)
CHUNK = 512                # head hidden-dim tile streamed along the grid axis
OUT_PAD = 128              # lane-dense output width (sliced back to NUM_CLASSES)


# ---------------------------------- helpers ----------------------------------
def _layernorm(v, g, b):
    mu = jnp.mean(v, axis=-1, keepdims=True)
    var = jnp.mean(jnp.square(v - mu), axis=-1, keepdims=True)
    return (v - mu) * jax.lax.rsqrt(var + LN_EPS) * g + b


def _bf(x):
    return x.astype(jnp.bfloat16)


def _erf(x):
    # Abramowitz & Stegun 7.1.26 polynomial erf (|err| < 1.5e-7); keeps the exact-erf
    # GELU semantics of nn.GELU without relying on a lax.erf Mosaic lowering rule.
    a1, a2, a3, a4, a5 = 0.254829592, -0.284496736, 1.421413741, -1.453152027, 1.061405429
    p = 0.3275911
    s = jnp.where(x >= 0.0, 1.0, -1.0)
    ax = jnp.abs(x)
    t = 1.0 / (1.0 + p * ax)
    poly = ((((a5 * t + a4) * t + a3) * t + a2) * t + a1) * t
    return s * (1.0 - poly * jnp.exp(-ax * ax))


def _gelu(x):
    # erf-GELU (PyTorch nn.GELU default)
    return 0.5 * x * (1.0 + _erf(x * 0.7071067811865476))


# ---------------------------------- kernel ----------------------------------
def fused_vit_kernel(
        patches_ref, wpe_ref, tmpl_ref, mask_ref,
        ln1g_ref, ln1b_ref, wqkv_ref, bqkv_ref, wproj_ref, bproj_ref,
        ln2g_ref, ln2b_ref, w1_ref, b1_ref, w2_ref, b2_ref,
        ng_ref, nb_ref,
        hw1_ref, hb1_ref, hw2_ref, hb2_ref, hw3_ref, hb3_ref,
        o_ref, feats_ref, acc_ref):
    k = pl.program_id(0)

    # ---- step 0: full transformer backbone -> pooled / normalized cls features ----
    @pl.when(k == 0)
    def _():
        # patch embed + cls/pos assembly (zero rows in patches_full select the template)
        x = jnp.dot(patches_ref[...], wpe_ref[...],
                    preferred_element_type=jnp.float32) + tmpl_ref[...]     # (T, D)
        mask = mask_ref[...]                                                # (T, T)
        scale = 1.0 / (HD ** 0.5)

        for d in range(DEPTH):
            # attention branch (pre-norm)
            xn = _layernorm(x, ln1g_ref[d], ln1b_ref[d])
            qkv = jnp.dot(_bf(xn), wqkv_ref[d],
                          preferred_element_type=jnp.float32) + bqkv_ref[d]  # (T, 3D)
            heads = []
            for h in range(HEADS):
                qh = qkv[:, h * HD:(h + 1) * HD]
                kh = qkv[:, D + h * HD:D + (h + 1) * HD]
                vh = qkv[:, 2 * D + h * HD:2 * D + (h + 1) * HD]
                # batch folded into one contraction; cross-batch pairs masked to -inf
                s = jax.lax.dot_general(_bf(qh), _bf(kh), (((1,), (1,)), ((), ())),
                                        preferred_element_type=jnp.float32)
                s = s * scale + mask
                s = s - jnp.max(s, axis=-1, keepdims=True)
                e = jnp.exp(s)
                p = e / jnp.sum(e, axis=-1, keepdims=True)
                heads.append(jnp.dot(_bf(p), _bf(vh),
                                     preferred_element_type=jnp.float32))   # (T, HD)
            ctx = jnp.concatenate(heads, axis=-1)                           # (T, D)
            x = x + jnp.dot(_bf(ctx), wproj_ref[d],
                            preferred_element_type=jnp.float32) + bproj_ref[d]

            # MLP branch (pre-norm)
            xn2 = _layernorm(x, ln2g_ref[d], ln2b_ref[d])
            hmid = _gelu(jnp.dot(_bf(xn2), w1_ref[d],
                                 preferred_element_type=jnp.float32) + b1_ref[d])
            x = x + jnp.dot(_bf(hmid), w2_ref[d],
                            preferred_element_type=jnp.float32) + b2_ref[d]

        # cls pooling (register-level) + final LN (per-token, so pool-then-norm == norm-then-pool)
        cls = jnp.concatenate([x[b * SEQ:b * SEQ + 1, :] for b in range(B)], axis=0)
        feats_ref[...] = _layernorm(cls, ng_ref[...], nb_ref[...])          # (B, D)
        acc_ref[...] = jnp.zeros_like(acc_ref)

    # ---- every step: one 512-wide slab of head layer-1 + layer-2 accumulation ----
    h1c = jnp.dot(_bf(feats_ref[...]), hw1_ref[...],
                  preferred_element_type=jnp.float32) + hb1_ref[...]         # (B, CHUNK)
    h1c = jnp.maximum(h1c, 0.0)
    acc_ref[...] += jnp.dot(_bf(h1c), hw2_ref[...],
                            preferred_element_type=jnp.float32)              # (B, H2)

    # ---- last step: bias + ReLU + final linear, lane-dense store ----
    @pl.when(k == pl.num_programs(0) - 1)
    def _():
        h2 = jnp.maximum(acc_ref[...] + hb2_ref[...], 0.0)
        o_ref[...] = jnp.dot(_bf(h2), hw3_ref[...],
                             preferred_element_type=jnp.float32) + hb3_ref[...]


# ------------------------------- pallas wrapper -------------------------------
def _whole(a):
    n = a.ndim
    return pl.BlockSpec(a.shape, lambda k, n=n: (0,) * n)   # whole-array block


def extract_patches(x):
    # x: (B, C, H, W) NCHW -> (B*N_PATCH, C*P*P), flatten order (C, ph, pw)
    xp = x.reshape(B, C, IMG // PATCH, PATCH, IMG // PATCH, PATCH)
    xp = xp.transpose(0, 2, 4, 1, 3, 5)            # (B, gh, gw, C, P, P)
    return xp.reshape(B * N_PATCH, CPP)


@jax.jit
def forward(x, params):
    patches = extract_patches(x)                                  # (B*N_PATCH, CPP)
    # zero-padded (T, CPP): zero rows at cls positions, patch rows elsewhere
    patch_rows = jnp.asarray(
        [b * SEQ + 1 + p for b in range(B) for p in range(N_PATCH)], jnp.int32)
    patches_full = jnp.zeros((T, CPP), jnp.float32).at[patch_rows].set(patches)
    # Conv2d weight (D, C, P, P) flattened to (C*P*P, D) matches patch flatten order.
    w_pe = params['patch_w'].reshape(D, CPP).T
    # (T, D) additive template: cls+pos[0] on cls rows, pos[1:]+conv-bias on patch rows
    per_seq = jnp.concatenate(
        [params['cls'] + params['pos'][0:1, :],
         params['pos'][1:, :] + params['patch_b']], axis=0)       # (SEQ, D)
    tmpl = jnp.tile(per_seq, (B, 1))                              # (T, D)
    # block-diagonal additive attention mask so all B sequences share one contraction
    tok_b = jnp.arange(T) // SEQ
    mask = jnp.where(tok_b[:, None] == tok_b[None, :], 0.0, -1e30).astype(jnp.float32)
    # lane-dense final-layer weights (pad NUM_CLASSES -> OUT_PAD columns with zeros)
    hw3p = jnp.zeros((H2, OUT_PAD), jnp.bfloat16).at[:, :NUM_CLASSES].set(params['hw3'])
    hb3p = jnp.zeros((1, OUT_PAD), jnp.float32).at[:, :NUM_CLASSES].set(params['hb3'])

    args = (patches_full, w_pe, tmpl, mask,
            params['ln1_g'], params['ln1_b'], params['wqkv'], params['bqkv'],
            params['wproj'], params['bproj'], params['ln2_g'], params['ln2_b'],
            params['w1'], params['b1'], params['w2'], params['b2'],
            params['norm_g'], params['norm_b'],
            params['hw1'], params['hb1'], params['hw2'], params['hb2'],
            hw3p, hb3p)

    in_specs = [_whole(a) for a in args]
    # stream the head hidden dim: hw1 columns / hb1 / hw2 rows in CHUNK-wide slabs so
    # their DMA double-buffers behind the transformer (step 0) and earlier chunks.
    in_specs[18] = pl.BlockSpec((D, CHUNK), lambda k: (0, k))      # hw1
    in_specs[19] = pl.BlockSpec((1, CHUNK), lambda k: (0, k))      # hb1
    in_specs[20] = pl.BlockSpec((CHUNK, H2), lambda k: (k, 0))     # hw2

    out = pl.pallas_call(
        fused_vit_kernel,
        out_shape=jax.ShapeDtypeStruct((B, OUT_PAD), jnp.float32),
        grid=(H1 // CHUNK,),
        in_specs=in_specs,
        out_specs=pl.BlockSpec((B, OUT_PAD), lambda k: (0, 0)),
        scratch_shapes=[pltpu.VMEM((B, D), jnp.float32),           # pooled cls features
                        pltpu.VMEM((B, H2), jnp.float32)],         # head layer-2 accum
        compiler_params=pltpu.CompilerParams(
            dimension_semantics=("arbitrary",)),
    )(*args)
    return out[:, :NUM_CLASSES]


# ----------------------------------- params -----------------------------------
def init_params(key):
    keys = iter(jax.random.split(key, 32))

    def nrm(shape, s=0.02):
        return jax.random.normal(next(keys), shape, jnp.float32) * s

    bf = jnp.bfloat16
    return {
        'patch_w': nrm((D, C, PATCH, PATCH), 0.05),
        'patch_b': nrm((1, D)),
        'cls': nrm((1, D)),
        'pos': nrm((SEQ, D)),
        # transformer block weights stacked along a DEPTH axis (static in-kernel loop)
        'ln1_g': jnp.ones((DEPTH, 1, D), jnp.float32),
        'ln1_b': jnp.zeros((DEPTH, 1, D), jnp.float32),
        'wqkv': nrm((DEPTH, D, 3 * D)).astype(bf),
        'bqkv': jnp.zeros((DEPTH, 1, 3 * D), jnp.float32),
        'wproj': nrm((DEPTH, D, D)).astype(bf),
        'bproj': jnp.zeros((DEPTH, 1, D), jnp.float32),
        'ln2_g': jnp.ones((DEPTH, 1, D), jnp.float32),
        'ln2_b': jnp.zeros((DEPTH, 1, D), jnp.float32),
        'w1': nrm((DEPTH, D, MLP)).astype(bf),
        'b1': jnp.zeros((DEPTH, 1, MLP), jnp.float32),
        'w2': nrm((DEPTH, MLP, D)).astype(bf),
        'b2': jnp.zeros((DEPTH, 1, D), jnp.float32),
        'norm_g': jnp.ones((1, D), jnp.float32),
        'norm_b': jnp.zeros((1, D), jnp.float32),
        # head weights in bf16: hw2 (2048x512) is the dominant HBM transfer; MXU is
        # natively bf16 and accumulation stays in f32.
        'hw1': nrm((D, H1)).astype(bf),
        'hb1': jnp.zeros((1, H1), jnp.float32),
        'hw2': nrm((H1, H2)).astype(bf),
        'hb2': jnp.zeros((1, H2), jnp.float32),
        'hw3': nrm((H2, NUM_CLASSES)).astype(bf),
        'hb3': jnp.zeros((1, NUM_CLASSES), jnp.float32),
    }


if __name__ == "__main__":
    key = jax.random.PRNGKey(0)
    pkey, xkey = jax.random.split(key)
    params = init_params(pkey)
    x = jax.random.normal(xkey, (B, C, IMG, IMG), jnp.float32)  # NCHW, like PyTorch

    out = jax.block_until_ready(forward(x, params))
    assert out.shape == (B, NUM_CLASSES) and out.dtype == jnp.float32
    print("KERNEL_OK")
</pallas_src>

<mosaic_0001>
module attributes {stable_mosaic.version = 11 : i64} {
  func.func @fused_vit_kernel(%arg0: i32, %arg1: memref<10x192xf32, #tpu.memory_space<vmem>>, %arg2: memref<192x32xf32, #tpu.memory_space<vmem>>, %arg3: memref<10x32xf32, #tpu.memory_space<vmem>>, %arg4: memref<10x10xf32, #tpu.memory_space<vmem>>, %arg5: memref<2x1x32xf32, #tpu.memory_space<vmem>>, %arg6: memref<2x1x32xf32, #tpu.memory_space<vmem>>, %arg7: memref<2x32x96xbf16, #tpu.memory_space<vmem>>, %arg8: memref<2x1x96xf32, #tpu.memory_space<vmem>>, %arg9: memref<2x32x32xbf16, #tpu.memory_space<vmem>>, %arg10: memref<2x1x32xf32, #tpu.memory_space<vmem>>, %arg11: memref<2x1x32xf32, #tpu.memory_space<vmem>>, %arg12: memref<2x1x32xf32, #tpu.memory_space<vmem>>, %arg13: memref<2x32x128xbf16, #tpu.memory_space<vmem>>, %arg14: memref<2x1x128xf32, #tpu.memory_space<vmem>>, %arg15: memref<2x128x32xbf16, #tpu.memory_space<vmem>>, %arg16: memref<2x1x32xf32, #tpu.memory_space<vmem>>, %arg17: memref<1x32xf32, #tpu.memory_space<vmem>>, %arg18: memref<1x32xf32, #tpu.memory_space<vmem>>, %arg19: memref<32x512xbf16, #tpu.memory_space<vmem>>, %arg20: memref<1x512xf32, #tpu.memory_space<vmem>>, %arg21: memref<512x512xbf16, #tpu.memory_space<vmem>>, %arg22: memref<1x512xf32, #tpu.memory_space<vmem>>, %arg23: memref<512x128xbf16, #tpu.memory_space<vmem>>, %arg24: memref<1x128xf32, #tpu.memory_space<vmem>>, %arg25: memref<2x128xf32, #tpu.memory_space<vmem>>, %arg26: memref<2x32xf32, #tpu.memory_space<vmem>>, %arg27: memref<2x512xf32, #tpu.memory_space<vmem>>) attributes {dimension_semantics = [#tpu.dimension_semantics<arbitrary>], iteration_bounds = array<i64: 4>, scalar_prefetch = 0 : i64, scratch_operands = 2 : i64, tpu.core_type = #tpu.core_type<tc>, window_params = [{pipeline_mode = #tpu.pipeline_mode<synchronous>, transform_indices = @transform_0, window_bounds = array<i64: 10, 192>}, {pipeline_mode = #tpu.pipeline_mode<synchronous>, transform_indices = @transform_1, window_bounds = array<i64: 192, 32>}, {pipeline_mode = #tpu.pipeline_mode<synchronous>, transform_indices = @transform_2, window_bounds = array<i64: 10, 32>}, {pipeline_mode = #tpu.pipeline_mode<synchronous>, transform_indices = @transform_3, window_bounds = array<i64: 10, 10>}, {pipeline_mode = #tpu.pipeline_mode<synchronous>, transform_indices = @transform_4, window_bounds = array<i64: 2, 1, 32>}, {pipeline_mode = #tpu.pipeline_mode<synchronous>, transform_indices = @transform_5, window_bounds = array<i64: 2, 1, 32>}, {pipeline_mode = #tpu.pipeline_mode<synchronous>, transform_indices = @transform_6, window_bounds = array<i64: 2, 32, 96>}, {pipeline_mode = #tpu.pipeline_mode<synchronous>, transform_indices = @transform_7, window_bounds = array<i64: 2, 1, 96>}, {pipeline_mode = #tpu.pipeline_mode<synchronous>, transform_indices = @transform_8, window_bounds = array<i64: 2, 32, 32>}, {pipeline_mode = #tpu.pipeline_mode<synchronous>, transform_indices = @transform_9, window_bounds = array<i64: 2, 1, 32>}, {pipeline_mode = #tpu.pipeline_mode<synchronous>, transform_indices = @transform_10, window_bounds = array<i64: 2, 1, 32>}, {pipeline_mode = #tpu.pipeline_mode<synchronous>, transform_indices = @transform_11, window_bounds = array<i64: 2, 1, 32>}, {pipeline_mode = #tpu.pipeline_mode<synchronous>, transform_indices = @transform_12, window_bounds = array<i64: 2, 32, 128>}, {pipeline_mode = #tpu.pipeline_mode<synchronous>, transform_indices = @transform_13, window_bounds = array<i64: 2, 1, 128>}, {pipeline_mode = #tpu.pipeline_mode<synchronous>, transform_indices = @transform_14, window_bounds = array<i64: 2, 128, 32>}, {pipeline_mode = #tpu.pipeline_mode<synchronous>, transform_indices = @transform_15, window_bounds = array<i64: 2, 1, 32>}, {pipeline_mode = #tpu.pipeline_mode<synchronous>, transform_indices = @transform_16, window_bounds = array<i64: 1, 32>}, {pipeline_mode = #tpu.pipeline_mode<synchronous>, transform_indices = @transform_17, window_bounds = array<i64: 1, 32>}, {transform_indices = @transform_18, window_bounds = array<i64: 32, 512>}, {transform_indices = @transform_19, window_bounds = array<i64: 1, 512>}, {transform_indices = @transform_20, window_bounds = array<i64: 512, 512>}, {pipeline_mode = #tpu.pipeline_mode<synchronous>, transform_indices = @transform_21, window_bounds = array<i64: 1, 512>}, {pipeline_mode = #tpu.pipeline_mode<synchronous>, transform_indices = @transform_22, window_bounds = array<i64: 512, 128>}, {pipeline_mode = #tpu.pipeline_mode<synchronous>, transform_indices = @transform_23, window_bounds = array<i64: 1, 128>}, {pipeline_mode = #tpu.pipeline_mode<synchronous>, transform_indices = @transform_24, window_bounds = array<i64: 2, 128>}]} {
    %c0_i32 = arith.constant 0 : i32
    %0 = arith.cmpi eq, %arg0, %c0_i32 : i32
    %1 = arith.extui %0 : i1 to i32
    %c0_i32_0 = arith.constant 0 : i32
    %2 = arith.cmpi ne, %1, %c0_i32_0 : i32
    scf.if %2 {
      %c0_15 = arith.constant 0 : index
      %c0_16 = arith.constant 0 : index
      %21 = vector.load %arg1[%c0_15, %c0_16] : memref<10x192xf32, #tpu.memory_space<vmem>>, vector<10x192xf32>
      %c0_17 = arith.constant 0 : index
      %c0_18 = arith.constant 0 : index
      %22 = vector.load %arg2[%c0_17, %c0_18] : memref<192x32xf32, #tpu.memory_space<vmem>>, vector<192x32xf32>
      %cst_19 = arith.constant dense<0.000000e+00> : vector<10x32xf32>
      %23 = tpu.matmul %21, %22, %cst_19 {dimension_numbers = #tpu.dot_dimension_numbers<[1], [0], [0], [1], [0, 0, 1, 1], [], []>} : vector<10x192xf32>, vector<192x32xf32>, vector<10x32xf32> -> vector<10x32xf32>
      %c0_20 = arith.constant 0 : index
      %c0_21 = arith.constant 0 : index
      %24 = vector.load %arg3[%c0_20, %c0_21] : memref<10x32xf32, #tpu.memory_space<vmem>>, vector<10x32xf32>
      %25 = arith.addf %23, %24 : vector<10x32xf32>
      %c0_22 = arith.constant 0 : index
      %c0_23 = arith.constant 0 : index
      %26 = vector.load %arg4[%c0_22, %c0_23] : memref<10x10xf32, #tpu.memory_space<vmem>>, vector<10x10xf32>
      %c0_24 = arith.constant 0 : index
      %c0_25 = arith.constant 0 : index
      %c0_26 = arith.constant 0 : index
      %27 = vector.load %arg5[%c0_24, %c0_25, %c0_26] : memref<2x1x32xf32, #tpu.memory_space<vmem>>, vector<1x1x32xf32>
      %28 = vector.shape_cast %27 : vector<1x1x32xf32> to vector<1x32xf32>
      %c0_27 = arith.constant 0 : index
      %c0_28 = arith.constant 0 : index
      %c0_29 = arith.constant 0 : index
      %29 = vector.load %arg6[%c0_27, %c0_28, %c0_29] : memref<2x1x32xf32, #tpu.memory_space<vmem>>, vector<1x1x32xf32>
      %30 = vector.shape_cast %29 : vector<1x1x32xf32> to vector<1x32xf32>
      %cst_30 = arith.constant dense<0.000000e+00> : vector<10xf32>
      %31 = vector.multi_reduction <add>, %25, %cst_30 [1] : vector<10x32xf32> to vector<10xf32>
      %32 = vector.shape_cast %31 : vector<10xf32> to vector<10x1xf32>
      %cst_31 = arith.constant 3.200000e+01 : f32
      %33 = vector.broadcast %cst_31 : f32 to vector<10x1xf32>
      %34 = arith.divf %32, %33 : vector<10x1xf32>
      %35 = vector.broadcast %34 : vector<10x1xf32> to vector<10x32xf32>
      %36 = arith.subf %25, %35 : vector<10x32xf32>
      %37 = arith.mulf %36, %36 : vector<10x32xf32>
      %cst_32 = arith.constant dense<0.000000e+00> : vector<10xf32>
      %38 = vector.multi_reduction <add>, %37, %cst_32 [1] : vector<10x32xf32> to vector<10xf32>
      %39 = vector.shape_cast %38 : vector<10xf32> to vector<10x1xf32>
      %cst_33 = arith.constant 3.200000e+01 : f32
      %40 = vector.broadcast %cst_33 : f32 to vector<10x1xf32>
      %41 = arith.divf %39, %40 : vector<10x1xf32>
      %42 = vector.broadcast %34 : vector<10x1xf32> to vector<10x32xf32>
      %43 = arith.subf %25, %42 : vector<10x32xf32>
      %cst_34 = arith.constant 9.99999997E-7 : f32
      %44 = vector.broadcast %cst_34 : f32 to vector<10x1xf32>
      %45 = arith.addf %41, %44 : vector<10x1xf32>
      %46 = math.rsqrt %45 : vector<10x1xf32>
      %47 = vector.broadcast %46 : vector<10x1xf32> to vector<10x32xf32>
      %48 = arith.mulf %43, %47 : vector<10x32xf32>
      %49 = vector.broadcast %28 : vector<1x32xf32> to vector<10x32xf32>
      %50 = arith.mulf %48, %49 : vector<10x32xf32>
      %51 = vector.broadcast %30 : vector<1x32xf32> to vector<10x32xf32>
      %52 = arith.addf %50, %51 : vector<10x32xf32>
      %53 = arith.truncf %52 : vector<10x32xf32> to vector<10x32xbf16>
      %c0_35 = arith.constant 0 : index
      %c0_36 = arith.constant 0 : index
      %c0_37 = arith.constant 0 : index
      %54 = vector.load %arg7[%c0_35, %c0_36, %c0_37] : memref<2x32x96xbf16, #tpu.memory_space<vmem>>, vector<1x32x96xbf16>
      %55 = vector.shape_cast %54 : vector<1x32x96xbf16> to vector<32x96xbf16>
      %cst_38 = arith.constant dense<0.000000e+00> : vector<10x96xf32>
      %56 = tpu.matmul %53, %55, %cst_38 {dimension_numbers = #tpu.dot_dimension_numbers<[1], [0], [0], [1], [0, 0, 1, 1], [], []>} : vector<10x32xbf16>, vector<32x96xbf16>, vector<10x96xf32> -> vector<10x96xf32>
      %c0_39 = arith.constant 0 : index
      %c0_40 = arith.constant 0 : index
      %c0_41 = arith.constant 0 : index
      %57 = vector.load %arg8[%c0_39, %c0_40, %c0_41] : memref<2x1x96xf32, #tpu.memory_space<vmem>>, vector<1x1x96xf32>
      %58 = vector.shape_cast %57 : vector<1x1x96xf32> to vector<1x96xf32>
      %59 = vector.broadcast %58 : vector<1x96xf32> to vector<10x96xf32>
      %60 = arith.addf %56, %59 : vector<10x96xf32>
      %61 = vector.extract_strided_slice %60 {offsets = [0, 0], sizes = [10, 8], strides = [1, 1]} : vector<10x96xf32> to vector<10x8xf32>
      %62 = vector.extract_strided_slice %60 {offsets = [0, 32], sizes = [10, 8], strides = [1, 1]} : vector<10x96xf32> to vector<10x8xf32>
      %63 = vector.extract_strided_slice %60 {offsets = [0, 64], sizes = [10, 8], strides = [1, 1]} : vector<10x96xf32> to vector<10x8xf32>
      %64 = arith.truncf %61 : vector<10x8xf32> to vector<10x8xbf16>
      %65 = arith.truncf %62 : vector<10x8xf32> to vector<10x8xbf16>
      %cst_42 = arith.constant dense<0.000000e+00> : vector<10x10xf32>
      %66 = tpu.matmul %64, %65, %cst_42 {dimension_numbers = #tpu.dot_dimension_numbers<[1], [1], [0], [0], [0, 0, 1, 0], [], []>} : vector<10x8xbf16>, vector<10x8xbf16>, vector<10x10xf32> -> vector<10x10xf32>
      %cst_43 = arith.constant 0.353553385 : f32
      %67 = vector.broadcast %cst_43 : f32 to vector<10x10xf32>
      %68 = arith.mulf %66, %67 : vector<10x10xf32>
      %69 = arith.addf %68, %26 : vector<10x10xf32>
      %cst_44 = arith.constant dense<0xFF800000> : vector<10xf32>
      %70 = vector.multi_reduction <maximumf>, %69, %cst_44 [1] : vector<10x10xf32> to vector<10xf32>
      %71 = vector.shape_cast %70 : vector<10xf32> to vector<10x1xf32>
      %72 = vector.broadcast %71 : vector<10x1xf32> to vector<10x10xf32>
      %73 = arith.subf %69, %72 : vector<10x10xf32>
      %74 = math.exp %73 : vector<10x10xf32>
      %cst_45 = arith.constant dense<0.000000e+00> : vector<10xf32>
      %75 = vector.multi_reduction <add>, %74, %cst_45 [1] : vector<10x10xf32> to vector<10xf32>
      %76 = vector.shape_cast %75 : vector<10xf32> to vector<10x1xf32>
      %77 = vector.broadcast %76 : vector<10x1xf32> to vector<10x10xf32>
      %78 = arith.divf %74, %77 : vector<10x10xf32>
      %79 = arith.truncf %78 : vector<10x10xf32> to vector<10x10xbf16>
      %80 = arith.truncf %63 : vector<10x8xf32> to vector<10x8xbf16>
      %cst_46 = arith.constant dense<0.000000e+00> : vector<10x8xf32>
      %81 = tpu.matmul %79, %80, %cst_46 {dimension_numbers = #tpu.dot_dimension_numbers<[1], [0], [0], [1], [0, 0, 1, 1], [], []>} : vector<10x10xbf16>, vector<10x8xbf16>, vector<10x8xf32> -> vector<10x8xf32>
      %82 = vector.extract_strided_slice %60 {offsets = [0, 8], sizes = [10, 8], strides = [1, 1]} : vector<10x96xf32> to vector<10x8xf32>
      %83 = vector.extract_strided_slice %60 {offsets = [0, 40], sizes = [10, 8], strides = [1, 1]} : vector<10x96xf32> to vector<10x8xf32>
      %84 = vector.extract_strided_slice %60 {offsets = [0, 72], sizes = [10, 8], strides = [1, 1]} : vector<10x96xf32> to vector<10x8xf32>
      %85 = arith.truncf %82 : vector<10x8xf32> to vector<10x8xbf16>
      %86 = arith.truncf %83 : vector<10x8xf32> to vector<10x8xbf16>
      %cst_47 = arith.constant dense<0.000000e+00> : vector<10x10xf32>
      %87 = tpu.matmul %85, %86, %cst_47 {dimension_numbers = #tpu.dot_dimension_numbers<[1], [1], [0], [0], [0, 0, 1, 0], [], []>} : vector<10x8xbf16>, vector<10x8xbf16>, vector<10x10xf32> -> vector<10x10xf32>
      %cst_48 = arith.constant 0.353553385 : f32
      %88 = vector.broadcast %cst_48 : f32 to vector<10x10xf32>
      %89 = arith.mulf %87, %88 : vector<10x10xf32>
      %90 = arith.addf %89, %26 : vector<10x10xf32>
      %cst_49 = arith.constant dense<0xFF800000> : vector<10xf32>
      %91 = vector.multi_reduction <maximumf>, %90, %cst_49 [1] : vector<10x10xf32> to vector<10xf32>
      %92 = vector.shape_cast %91 : vector<10xf32> to vector<10x1xf32>
      %93 = vector.broadcast %92 : vector<10x1xf32> to vector<10x10xf32>
      %94 = arith.subf %90, %93 : vector<10x10xf32>
      %95 = math.exp %94 : vector<10x10xf32>
      %cst_50 = arith.constant dense<0.000000e+00> : vector<10xf32>
      %96 = vector.multi_reduction <add>, %95, %cst_50 [1] : vector<10x10xf32> to vector<10xf32>
      %97 = vector.shape_cast %96 : vector<10xf32> to vector<10x1xf32>
      %98 = vector.broadcast %97 : vector<10x1xf32> to vector<10x10xf32>
      %99 = arith.divf %95, %98 : vector<10x10xf32>
      %100 = arith.truncf %99 : vector<10x10xf32> to vector<10x10xbf16>
      %101 = arith.truncf %84 : vector<10x8xf32> to vector<10x8xbf16>
      %cst_51 = arith.constant dense<0.000000e+00> : vector<10x8xf32>
      %102 = tpu.matmul %100, %101, %cst_51 {dimension_numbers = #tpu.dot_dimension_numbers<[1], [0], [0], [1], [0, 0, 1, 1], [], []>} : vector<10x10xbf16>, vector<10x8xbf16>, vector<10x8xf32> -> vector<10x8xf32>
      %103 = vector.extract_strided_slice %60 {offsets = [0, 16], sizes = [10, 8], strides = [1, 1]} : vector<10x96xf32> to vector<10x8xf32>
      %104 = vector.extract_strided_slice %60 {offsets = [0, 48], sizes = [10, 8], strides = [1, 1]} : vector<10x96xf32> to vector<10x8xf32>
      %105 = vector.extract_strided_slice %60 {offsets = [0, 80], sizes = [10, 8], strides = [1, 1]} : vector<10x96xf32> to vector<10x8xf32>
      %106 = arith.truncf %103 : vector<10x8xf32> to vector<10x8xbf16>
      %107 = arith.truncf %104 : vector<10x8xf32> to vector<10x8xbf16>
      %cst_52 = arith.constant dense<0.000000e+00> : vector<10x10xf32>
      %108 = tpu.matmul %106, %107, %cst_52 {dimension_numbers = #tpu.dot_dimension_numbers<[1], [1], [0], [0], [0, 0, 1, 0], [], []>} : vector<10x8xbf16>, vector<10x8xbf16>, vector<10x10xf32> -> vector<10x10xf32>
      %cst_53 = arith.constant 0.353553385 : f32
      %109 = vector.broadcast %cst_53 : f32 to vector<10x10xf32>
      %110 = arith.mulf %108, %109 : vector<10x10xf32>
      %111 = arith.addf %110, %26 : vector<10x10xf32>
      %cst_54 = arith.constant dense<0xFF800000> : vector<10xf32>
      %112 = vector.multi_reduction <maximumf>, %111, %cst_54 [1] : vector<10x10xf32> to vector<10xf32>
      %113 = vector.shape_cast %112 : vector<10xf32> to vector<10x1xf32>
      %114 = vector.broadcast %113 : vector<10x1xf32> to vector<10x10xf32>
      %115 = arith.subf %111, %114 : vector<10x10xf32>
      %116 = math.exp %115 : vector<10x10xf32>
      %cst_55 = arith.constant dense<0.000000e+00> : vector<10xf32>
      %117 = vector.multi_reduction <add>, %116, %cst_55 [1] : vector<10x10xf32> to vector<10xf32>
      %118 = vector.shape_cast %117 : vector<10xf32> to vector<10x1xf32>
      %119 = vector.broadcast %118 : vector<10x1xf32> to vector<10x10xf32>
      %120 = arith.divf %116, %119 : vector<10x10xf32>
      %121 = arith.truncf %120 : vector<10x10xf32> to vector<10x10xbf16>
      %122 = arith.truncf %105 : vector<10x8xf32> to vector<10x8xbf16>
      %cst_56 = arith.constant dense<0.000000e+00> : vector<10x8xf32>
      %123 = tpu.matmul %121, %122, %cst_56 {dimension_numbers = #tpu.dot_dimension_numbers<[1], [0], [0], [1], [0, 0, 1, 1], [], []>} : vector<10x10xbf16>, vector<10x8xbf16>, vector<10x8xf32> -> vector<10x8xf32>
      %124 = vector.extract_strided_slice %60 {offsets = [0, 24], sizes = [10, 8], strides = [1, 1]} : vector<10x96xf32> to vector<10x8xf32>
      %125 = vector.extract_strided_slice %60 {offsets = [0, 56], sizes = [10, 8], strides = [1, 1]} : vector<10x96xf32> to vector<10x8xf32>
      %126 = vector.extract_strided_slice %60 {offsets = [0, 88], sizes = [10, 8], strides = [1, 1]} : vector<10x96xf32> to vector<10x8xf32>
      %127 = arith.truncf %124 : vector<10x8xf32> to vector<10x8xbf16>
      %128 = arith.truncf %125 : vector<10x8xf32> to vector<10x8xbf16>
      %cst_57 = arith.constant dense<0.000000e+00> : vector<10x10xf32>
      %129 = tpu.matmul %127, %128, %cst_57 {dimension_numbers = #tpu.dot_dimension_numbers<[1], [1], [0], [0], [0, 0, 1, 0], [], []>} : vector<10x8xbf16>, vector<10x8xbf16>, vector<10x10xf32> -> vector<10x10xf32>
      %cst_58 = arith.constant 0.353553385 : f32
      %130 = vector.broadcast %cst_58 : f32 to vector<10x10xf32>
      %131 = arith.mulf %129, %130 : vector<10x10xf32>
      %132 = arith.addf %131, %26 : vector<10x10xf32>
      %cst_59 = arith.constant dense<0xFF800000> : vector<10xf32>
      %133 = vector.multi_reduction <maximumf>, %132, %cst_59 [1] : vector<10x10xf32> to vector<10xf32>
      %134 = vector.shape_cast %133 : vector<10xf32> to vector<10x1xf32>
      %135 = vector.broadcast %134 : vector<10x1xf32> to vector<10x10xf32>
      %136 = arith.subf %132, %135 : vector<10x10xf32>
      %137 = math.exp %136 : vector<10x10xf32>
      %cst_60 = arith.constant dense<0.000000e+00> : vector<10xf32>
      %138 = vector.multi_reduction <add>, %137, %cst_60 [1] : vector<10x10xf32> to vector<10xf32>
      %139 = vector.shape_cast %138 : vector<10xf32> to vector<10x1xf32>
      %140 = vector.broadcast %139 : vector<10x1xf32> to vector<10x10xf32>
      %141 = arith.divf %137, %140 : vector<10x10xf32>
      %142 = arith.truncf %141 : vector<10x10xf32> to vector<10x10xbf16>
      %143 = arith.truncf %126 : vector<10x8xf32> to vector<10x8xbf16>
      %cst_61 = arith.constant dense<0.000000e+00> : vector<10x8xf32>
      %144 = tpu.matmul %142, %143, %cst_61 {dimension_numbers = #tpu.dot_dimension_numbers<[1], [0], [0], [1], [0, 0, 1, 1], [], []>} : vector<10x10xbf16>, vector<10x8xbf16>, vector<10x8xf32> -> vector<10x8xf32>
      %145 = tpu.concatenate %81, %102, %123, %144 in 1 : vector<10x8xf32>, vector<10x8xf32>, vector<10x8xf32>, vector<10x8xf32> -> vector<10x32xf32>
      %146 = arith.truncf %145 : vector<10x32xf32> to vector<10x32xbf16>
      %c0_62 = arith.constant 0 : index
      %c0_63 = arith.constant 0 : index
      %c0_64 = arith.constant 0 : index
      %147 = vector.load %arg9[%c0_62, %c0_63, %c0_64] : memref<2x32x32xbf16, #tpu.memory_space<vmem>>, vector<1x32x32xbf16>
      %148 = vector.shape_cast %147 : vector<1x32x32xbf16> to vector<32x32xbf16>
      %cst_65 = arith.constant dense<0.000000e+00> : vector<10x32xf32>
      %149 = tpu.matmul %146, %148, %cst_65 {dimension_numbers = #tpu.dot_dimension_numbers<[1], [0], [0], [1], [0, 0, 1, 1], [], []>} : vector<10x32xbf16>, vector<32x32xbf16>, vector<10x32xf32> -> vector<10x32xf32>
      %150 = arith.addf %25, %149 : vector<10x32xf32>
      %c0_66 = arith.constant 0 : index
      %c0_67 = arith.constant 0 : index
      %c0_68 = arith.constant 0 : index
      %151 = vector.load %arg10[%c0_66, %c0_67, %c0_68] : memref<2x1x32xf32, #tpu.memory_space<vmem>>, vector<1x1x32xf32>
      %152 = vector.shape_cast %151 : vector<1x1x32xf32> to vector<1x32xf32>
      %153 = vector.broadcast %152 : vector<1x32xf32> to vector<10x32xf32>
      %154 = arith.addf %150, %153 : vector<10x32xf32>
      %c0_69 = arith.constant 0 : index
      %c0_70 = arith.constant 0 : index
      %c0_71 = arith.constant 0 : index
      %155 = vector.load %arg11[%c0_69, %c0_70, %c0_71] : memref<2x1x32xf32, #tpu.memory_space<vmem>>, vector<1x1x32xf32>
      %156 = vector.shape_cast %155 : vector<1x1x32xf32> to vector<1x32xf32>
      %c0_72 = arith.constant 0 : index
      %c0_73 = arith.constant 0 : index
      %c0_74 = arith.constant 0 : index
      %157 = vector.load %arg12[%c0_72, %c0_73, %c0_74] : memref<2x1x32xf32, #tpu.memory_space<vmem>>, vector<1x1x32xf32>
      %158 = vector.shape_cast %157 : vector<1x1x32xf32> to vector<1x32xf32>
      %cst_75 = arith.constant dense<0.000000e+00> : vector<10xf32>
      %159 = vector.multi_reduction <add>, %154, %cst_75 [1] : vector<10x32xf32> to vector<10xf32>
      %160 = vector.shape_cast %159 : vector<10xf32> to vector<10x1xf32>
      %cst_76 = arith.constant 3.200000e+01 : f32
      %161 = vector.broadcast %cst_76 : f32 to vector<10x1xf32>
      %162 = arith.divf %160, %161 : vector<10x1xf32>
      %163 = vector.broadcast %162 : vector<10x1xf32> to vector<10x32xf32>
      %164 = arith.subf %154, %163 : vector<10x32xf32>
      %165 = arith.mulf %164, %164 : vector<10x32xf32>
      %cst_77 = arith.constant dense<0.000000e+00> : vector<10xf32>
      %166 = vector.multi_reduction <add>, %165, %cst_77 [1] : vector<10x32xf32> to vector<10xf32>
      %167 = vector.shape_cast %166 : vector<10xf32> to vector<10x1xf32>
      %cst_78 = arith.constant 3.200000e+01 : f32
      %168 = vector.broadcast %cst_78 : f32 to vector<10x1xf32>
      %169 = arith.divf %167, %168 : vector<10x1xf32>
      %170 = vector.broadcast %162 : vector<10x1xf32> to vector<10x32xf32>
      %171 = arith.subf %154, %170 : vector<10x32xf32>
      %cst_79 = arith.constant 9.99999997E-7 : f32
      %172 = vector.broadcast %cst_79 : f32 to vector<10x1xf32>
      %173 = arith.addf %169, %172 : vector<10x1xf32>
      %174 = math.rsqrt %173 : vector<10x1xf32>
      %175 = vector.broadcast %174 : vector<10x1xf32> to vector<10x32xf32>
      %176 = arith.mulf %171, %175 : vector<10x32xf32>
      %177 = vector.broadcast %156 : vector<1x32xf32> to vector<10x32xf32>
      %178 = arith.mulf %176, %177 : vector<10x32xf32>
      %179 = vector.broadcast %158 : vector<1x32xf32> to vector<10x32xf32>
      %180 = arith.addf %178, %179 : vector<10x32xf32>
      %181 = arith.truncf %180 : vector<10x32xf32> to vector<10x32xbf16>
      %c0_80 = arith.constant 0 : index
      %c0_81 = arith.constant 0 : index
      %c0_82 = arith.constant 0 : index
      %182 = vector.load %arg13[%c0_80, %c0_81, %c0_82] : memref<2x32x128xbf16, #tpu.memory_space<vmem>>, vector<1x32x128xbf16>
      %183 = vector.shape_cast %182 : vector<1x32x128xbf16> to vector<32x128xbf16>
      %cst_83 = arith.constant dense<0.000000e+00> : vector<10x128xf32>
      %184 = tpu.matmul %181, %183, %cst_83 {dimension_numbers = #tpu.dot_dimension_numbers<[1], [0], [0], [1], [0, 0, 1, 1], [], []>} : vector<10x32xbf16>, vector<32x128xbf16>, vector<10x128xf32> -> vector<10x128xf32>
      %c0_84 = arith.constant 0 : index
      %c0_85 = arith.constant 0 : index
      %c0_86 = arith.constant 0 : index
      %185 = vector.load %arg14[%c0_84, %c0_85, %c0_86] : memref<2x1x128xf32, #tpu.memory_space<vmem>>, vector<1x1x128xf32>
      %186 = vector.shape_cast %185 : vector<1x1x128xf32> to vector<1x128xf32>
      %187 = vector.broadcast %186 : vector<1x128xf32> to vector<10x128xf32>
      %188 = arith.addf %184, %187 : vector<10x128xf32>
      %cst_87 = arith.constant 5.000000e-01 : f32
      %189 = vector.broadcast %cst_87 : f32 to vector<10x128xf32>
      %190 = arith.mulf %189, %188 : vector<10x128xf32>
      %cst_88 = arith.constant 0.707106769 : f32
      %191 = vector.broadcast %cst_88 : f32 to vector<10x128xf32>
      %192 = arith.mulf %188, %191 : vector<10x128xf32>
      %cst_89 = arith.constant 0.000000e+00 : f32
      %193 = vector.broadcast %cst_89 : f32 to vector<10x128xf32>
      %194 = arith.cmpf oge, %192, %193 : vector<10x128xf32>
      %cst_90 = arith.constant 1.000000e+00 : f32
      %cst_91 = arith.constant -1.000000e+00 : f32
      %195 = vector.broadcast %cst_90 : f32 to vector<10x128xf32>
      %196 = vector.broadcast %cst_91 : f32 to vector<10x128xf32>
      %197 = arith.select %194, %195, %196 : vector<10x128xi1>, vector<10x128xf32>
      %198 = math.absf %192 : vector<10x128xf32>
      %cst_92 = arith.constant 0.327591091 : f32
      %199 = vector.broadcast %cst_92 : f32 to vector<10x128xf32>
      %200 = arith.mulf %199, %198 : vector<10x128xf32>
      %cst_93 = arith.constant 1.000000e+00 : f32
      %201 = vector.broadcast %cst_93 : f32 to vector<10x128xf32>
      %202 = arith.addf %201, %200 : vector<10x128xf32>
      %cst_94 = arith.constant 1.000000e+00 : f32
      %203 = vector.broadcast %cst_94 : f32 to vector<10x128xf32>
      %204 = arith.divf %203, %202 : vector<10x128xf32>
      %cst_95 = arith.constant 1.06140542 : f32
      %205 = vector.broadcast %cst_95 : f32 to vector<10x128xf32>
      %206 = arith.mulf %205, %204 : vector<10x128xf32>
      %cst_96 = arith.constant -1.45315206 : f32
      %207 = vector.broadcast %cst_96 : f32 to vector<10x128xf32>
      %208 = arith.addf %206, %207 : vector<10x128xf32>
      %209 = arith.mulf %208, %204 : vector<10x128xf32>
      %cst_97 = arith.constant 1.42141378 : f32
      %210 = vector.broadcast %cst_97 : f32 to vector<10x128xf32>
      %211 = arith.addf %209, %210 : vector<10x128xf32>
      %212 = arith.mulf %211, %204 : vector<10x128xf32>
      %cst_98 = arith.constant -0.284496725 : f32
      %213 = vector.broadcast %cst_98 : f32 to vector<10x128xf32>
      %214 = arith.addf %212, %213 : vector<10x128xf32>
      %215 = arith.mulf %214, %204 : vector<10x128xf32>
      %cst_99 = arith.constant 0.254829586 : f32
      %216 = vector.broadcast %cst_99 : f32 to vector<10x128xf32>
      %217 = arith.addf %215, %216 : vector<10x128xf32>
      %218 = arith.mulf %217, %204 : vector<10x128xf32>
      %cst_100 = arith.constant 0.000000e+00 : f32
      %219 = vector.broadcast %cst_100 : f32 to vector<10x128xf32>
      %220 = arith.subf %219, %198 : vector<10x128xf32>
      %221 = arith.mulf %220, %198 : vector<10x128xf32>
      %222 = math.exp %221 : vector<10x128xf32>
      %223 = arith.mulf %218, %222 : vector<10x128xf32>
      %cst_101 = arith.constant 1.000000e+00 : f32
      %224 = vector.broadcast %cst_101 : f32 to vector<10x128xf32>
      %225 = arith.subf %224, %223 : vector<10x128xf32>
      %226 = arith.mulf %197, %225 : vector<10x128xf32>
      %cst_102 = arith.constant 1.000000e+00 : f32
      %227 = vector.broadcast %cst_102 : f32 to vector<10x128xf32>
      %228 = arith.addf %227, %226 : vector<10x128xf32>
      %229 = arith.mulf %190, %228 : vector<10x128xf32>
      %230 = arith.truncf %229 : vector<10x128xf32> to vector<10x128xbf16>
      %c0_103 = arith.constant 0 : index
      %c0_104 = arith.constant 0 : index
      %c0_105 = arith.constant 0 : index
      %231 = vector.load %arg15[%c0_103, %c0_104, %c0_105] : memref<2x128x32xbf16, #tpu.memory_space<vmem>>, vector<1x128x32xbf16>
      %232 = vector.shape_cast %231 : vector<1x128x32xbf16> to vector<128x32xbf16>
      %cst_106 = arith.constant dense<0.000000e+00> : vector<10x32xf32>
      %233 = tpu.matmul %230, %232, %cst_106 {dimension_numbers = #tpu.dot_dimension_numbers<[1], [0], [0], [1], [0, 0, 1, 1], [], []>} : vector<10x128xbf16>, vector<128x32xbf16>, vector<10x32xf32> -> vector<10x32xf32>
      %234 = arith.addf %154, %233 : vector<10x32xf32>
      %c0_107 = arith.constant 0 : index
      %c0_108 = arith.constant 0 : index
      %c0_109 = arith.constant 0 : index
      %235 = vector.load %arg16[%c0_107, %c0_108, %c0_109] : memref<2x1x32xf32, #tpu.memory_space<vmem>>, vector<1x1x32xf32>
      %236 = vector.shape_cast %235 : vector<1x1x32xf32> to vector<1x32xf32>
      %237 = vector.broadcast %236 : vector<1x32xf32> to vector<10x32xf32>
      %238 = arith.addf %234, %237 : vector<10x32xf32>
      %c1 = arith.constant 1 : index
      %c0_110 = arith.constant 0 : index
      %c0_111 = arith.constant 0 : index
      %239 = vector.load %arg5[%c1, %c0_110, %c0_111] : memref<2x1x32xf32, #tpu.memory_space<vmem>>, vector<1x1x32xf32>
      %240 = vector.shape_cast %239 : vector<1x1x32xf32> to vector<1x32xf32>
      %c1_112 = arith.constant 1 : index
      %c0_113 = arith.constant 0 : index
      %c0_114 = arith.constant 0 : index
      %241 = vector.load %arg6[%c1_112, %c0_113, %c0_114] : memref<2x1x32xf32, #tpu.memory_space<vmem>>, vector<1x1x32xf32>
      %242 = vector.shape_cast %241 : vector<1x1x32xf32> to vector<1x32xf32>
      %cst_115 = arith.constant dense<0.000000e+00> : vector<10xf32>
      %243 = vector.multi_reduction <add>, %238, %cst_115 [1] : vector<10x32xf32> to vector<10xf32>
      %244 = vector.shape_cast %243 : vector<10xf32> to vector<10x1xf32>
      %cst_116 = arith.constant 3.200000e+01 : f32
      %245 = vector.broadcast %cst_116 : f32 to vector<10x1xf32>
      %246 = arith.divf %244, %245 : vector<10x1xf32>
      %247 = vector.broadcast %246 : vector<10x1xf32> to vector<10x32xf32>
      %248 = arith.subf %238, %247 : vector<10x32xf32>
      %249 = arith.mulf %248, %248 : vector<10x32xf32>
      %cst_117 = arith.constant dense<0.000000e+00> : vector<10xf32>
      %250 = vector.multi_reduction <add>, %249, %cst_117 [1] : vector<10x32xf32> to vector<10xf32>
      %251 = vector.shape_cast %250 : vector<10xf32> to vector<10x1xf32>
      %cst_118 = arith.constant 3.200000e+01 : f32
      %252 = vector.broadcast %cst_118 : f32 to vector<10x1xf32>
      %253 = arith.divf %251, %252 : vector<10x1xf32>
      %254 = vector.broadcast %246 : vector<10x1xf32> to vector<10x32xf32>
      %255 = arith.subf %238, %254 : vector<10x32xf32>
      %cst_119 = arith.constant 9.99999997E-7 : f32
      %256 = vector.broadcast %cst_119 : f32 to vector<10x1xf32>
      %257 = arith.addf %253, %256 : vector<10x1xf32>
      %258 = math.rsqrt %257 : vector<10x1xf32>
      %259 = vector.broadcast %258 : vector<10x1xf32> to vector<10x32xf32>
      %260 = arith.mulf %255, %259 : vector<10x32xf32>
      %261 = vector.broadcast %240 : vector<1x32xf32> to vector<10x32xf32>
      %262 = arith.mulf %260, %261 : vector<10x32xf32>
      %263 = vector.broadcast %242 : vector<1x32xf32> to vector<10x32xf32>
      %264 = arith.addf %262, %263 : vector<10x32xf32>
      %265 = arith.truncf %264 : vector<10x32xf32> to vector<10x32xbf16>
      %c1_120 = arith.constant 1 : index
      %c0_121 = arith.constant 0 : index
      %c0_122 = arith.constant 0 : index
      %266 = vector.load %arg7[%c1_120, %c0_121, %c0_122] : memref<2x32x96xbf16, #tpu.memory_space<vmem>>, vector<1x32x96xbf16>
      %267 = vector.shape_cast %266 : vector<1x32x96xbf16> to vector<32x96xbf16>
      %cst_123 = arith.constant dense<0.000000e+00> : vector<10x96xf32>
      %268 = tpu.matmul %265, %267, %cst_123 {dimension_numbers = #tpu.dot_dimension_numbers<[1], [0], [0], [1], [0, 0, 1, 1], [], []>} : vector<10x32xbf16>, vector<32x96xbf16>, vector<10x96xf32> -> vector<10x96xf32>
      %c1_124 = arith.constant 1 : index
      %c0_125 = arith.constant 0 : index
      %c0_126 = arith.constant 0 : index
      %269 = vector.load %arg8[%c1_124, %c0_125, %c0_126] : memref<2x1x96xf32, #tpu.memory_space<vmem>>, vector<1x1x96xf32>
      %270 = vector.shape_cast %269 : vector<1x1x96xf32> to vector<1x96xf32>
      %271 = vector.broadcast %270 : vector<1x96xf32> to vector<10x96xf32>
      %272 = arith.addf %268, %271 : vector<10x96xf32>
      %273 = vector.extract_strided_slice %272 {offsets = [0, 0], sizes = [10, 8], strides = [1, 1]} : vector<10x96xf32> to vector<10x8xf32>
      %274 = vector.extract_strided_slice %272 {offsets = [0, 32], sizes = [10, 8], strides = [1, 1]} : vector<10x96xf32> to vector<10x8xf32>
      %275 = vector.extract_strided_slice %272 {offsets = [0, 64], sizes = [10, 8], strides = [1, 1]} : vector<10x96xf32> to vector<10x8xf32>
      %276 = arith.truncf %273 : vector<10x8xf32> to vector<10x8xbf16>
      %277 = arith.truncf %274 : vector<10x8xf32> to vector<10x8xbf16>
      %cst_127 = arith.constant dense<0.000000e+00> : vector<10x10xf32>
      %278 = tpu.matmul %276, %277, %cst_127 {dimension_numbers = #tpu.dot_dimension_numbers<[1], [1], [0], [0], [0, 0, 1, 0], [], []>} : vector<10x8xbf16>, vector<10x8xbf16>, vector<10x10xf32> -> vector<10x10xf32>
      %cst_128 = arith.constant 0.353553385 : f32
      %279 = vector.broadcast %cst_128 : f32 to vector<10x10xf32>
      %280 = arith.mulf %278, %279 : vector<10x10xf32>
      %281 = arith.addf %280, %26 : vector<10x10xf32>
      %cst_129 = arith.constant dense<0xFF800000> : vector<10xf32>
      %282 = vector.multi_reduction <maximumf>, %281, %cst_129 [1] : vector<10x10xf32> to vector<10xf32>
      %283 = vector.shape_cast %282 : vector<10xf32> to vector<10x1xf32>
      %284 = vector.broadcast %283 : vector<10x1xf32> to vector<10x10xf32>
      %285 = arith.subf %281, %284 : vector<10x10xf32>
      %286 = math.exp %285 : vector<10x10xf32>
      %cst_130 = arith.constant dense<0.000000e+00> : vector<10xf32>
      %287 = vector.multi_reduction <add>, %286, %cst_130 [1] : vector<10x10xf32> to vector<10xf32>
      %288 = vector.shape_cast %287 : vector<10xf32> to vector<10x1xf32>
      %289 = vector.broadcast %288 : vector<10x1xf32> to vector<10x10xf32>
      %290 = arith.divf %286, %289 : vector<10x10xf32>
      %291 = arith.truncf %290 : vector<10x10xf32> to vector<10x10xbf16>
      %292 = arith.truncf %275 : vector<10x8xf32> to vector<10x8xbf16>
      %cst_131 = arith.constant dense<0.000000e+00> : vector<10x8xf32>
      %293 = tpu.matmul %291, %292, %cst_131 {dimension_numbers = #tpu.dot_dimension_numbers<[1], [0], [0], [1], [0, 0, 1, 1], [], []>} : vector<10x10xbf16>, vector<10x8xbf16>, vector<10x8xf32> -> vector<10x8xf32>
      %294 = vector.extract_strided_slice %272 {offsets = [0, 8], sizes = [10, 8], strides = [1, 1]} : vector<10x96xf32> to vector<10x8xf32>
      %295 = vector.extract_strided_slice %272 {offsets = [0, 40], sizes = [10, 8], strides = [1, 1]} : vector<10x96xf32> to vector<10x8xf32>
      %296 = vector.extract_strided_slice %272 {offsets = [0, 72], sizes = [10, 8], strides = [1, 1]} : vector<10x96xf32> to vector<10x8xf32>
      %297 = arith.truncf %294 : vector<10x8xf32> to vector<10x8xbf16>
      %298 = arith.truncf %295 : vector<10x8xf32> to vector<10x8xbf16>
      %cst_132 = arith.constant dense<0.000000e+00> : vector<10x10xf32>
      %299 = tpu.matmul %297, %298, %cst_132 {dimension_numbers = #tpu.dot_dimension_numbers<[1], [1], [0], [0], [0, 0, 1, 0], [], []>} : vector<10x8xbf16>, vector<10x8xbf16>, vector<10x10xf32> -> vector<10x10xf32>
      %cst_133 = arith.constant 0.353553385 : f32
      %300 = vector.broadcast %cst_133 : f32 to vector<10x10xf32>
      %301 = arith.mulf %299, %300 : vector<10x10xf32>
      %302 = arith.addf %301, %26 : vector<10x10xf32>
      %cst_134 = arith.constant dense<0xFF800000> : vector<10xf32>
      %303 = vector.multi_reduction <maximumf>, %302, %cst_134 [1] : vector<10x10xf32> to vector<10xf32>
      %304 = vector.shape_cast %303 : vector<10xf32> to vector<10x1xf32>
      %305 = vector.broadcast %304 : vector<10x1xf32> to vector<10x10xf32>
      %306 = arith.subf %302, %305 : vector<10x10xf32>
      %307 = math.exp %306 : vector<10x10xf32>
      %cst_135 = arith.constant dense<0.000000e+00> : vector<10xf32>
      %308 = vector.multi_reduction <add>, %307, %cst_135 [1] : vector<10x10xf32> to vector<10xf32>
      %309 = vector.shape_cast %308 : vector<10xf32> to vector<10x1xf32>
      %310 = vector.broadcast %309 : vector<10x1xf32> to vector<10x10xf32>
      %311 = arith.divf %307, %310 : vector<10x10xf32>
      %312 = arith.truncf %311 : vector<10x10xf32> to vector<10x10xbf16>
      %313 = arith.truncf %296 : vector<10x8xf32> to vector<10x8xbf16>
      %cst_136 = arith.constant dense<0.000000e+00> : vector<10x8xf32>
      %314 = tpu.matmul %312, %313, %cst_136 {dimension_numbers = #tpu.dot_dimension_numbers<[1], [0], [0], [1], [0, 0, 1, 1], [], []>} : vector<10x10xbf16>, vector<10x8xbf16>, vector<10x8xf32> -> vector<10x8xf32>
      %315 = vector.extract_strided_slice %272 {offsets = [0, 16], sizes = [10, 8], strides = [1, 1]} : vector<10x96xf32> to vector<10x8xf32>
      %316 = vector.extract_strided_slice %272 {offsets = [0, 48], sizes = [10, 8], strides = [1, 1]} : vector<10x96xf32> to vector<10x8xf32>
      %317 = vector.extract_strided_slice %272 {offsets = [0, 80], sizes = [10, 8], strides = [1, 1]} : vector<10x96xf32> to vector<10x8xf32>
      %318 = arith.truncf %315 : vector<10x8xf32> to vector<10x8xbf16>
      %319 = arith.truncf %316 : vector<10x8xf32> to vector<10x8xbf16>
      %cst_137 = arith.constant dense<0.000000e+00> : vector<10x10xf32>
      %320 = tpu.matmul %318, %319, %cst_137 {dimension_numbers = #tpu.dot_dimension_numbers<[1], [1], [0], [0], [0, 0, 1, 0], [], []>} : vector<10x8xbf16>, vector<10x8xbf16>, vector<10x10xf32> -> vector<10x10xf32>
      %cst_138 = arith.constant 0.353553385 : f32
      %321 = vector.broadcast %cst_138 : f32 to vector<10x10xf32>
      %322 = arith.mulf %320, %321 : vector<10x10xf32>
      %323 = arith.addf %322, %26 : vector<10x10xf32>
      %cst_139 = arith.constant dense<0xFF800000> : vector<10xf32>
      %324 = vector.multi_reduction <maximumf>, %323, %cst_139 [1] : vector<10x10xf32> to vector<10xf32>
      %325 = vector.shape_cast %324 : vector<10xf32> to vector<10x1xf32>
      %326 = vector.broadcast %325 : vector<10x1xf32> to vector<10x10xf32>
      %327 = arith.subf %323, %326 : vector<10x10xf32>
      %328 = math.exp %327 : vector<10x10xf32>
      %cst_140 = arith.constant dense<0.000000e+00> : vector<10xf32>
      %329 = vector.multi_reduction <add>, %328, %cst_140 [1] : vector<10x10xf32> to vector<10xf32>
      %330 = vector.shape_cast %329 : vector<10xf32> to vector<10x1xf32>
      %331 = vector.broadcast %330 : vector<10x1xf32> to vector<10x10xf32>
      %332 = arith.divf %328, %331 : vector<10x10xf32>
      %333 = arith.truncf %332 : vector<10x10xf32> to vector<10x10xbf16>
      %334 = arith.truncf %317 : vector<10x8xf32> to vector<10x8xbf16>
      %cst_141 = arith.constant dense<0.000000e+00> : vector<10x8xf32>
      %335 = tpu.matmul %333, %334, %cst_141 {dimension_numbers = #tpu.dot_dimension_numbers<[1], [0], [0], [1], [0, 0, 1, 1], [], []>} : vector<10x10xbf16>, vector<10x8xbf16>, vector<10x8xf32> -> vector<10x8xf32>
      %336 = vector.extract_strided_slice %272 {offsets = [0, 24], sizes = [10, 8], strides = [1, 1]} : vector<10x96xf32> to vector<10x8xf32>
      %337 = vector.extract_strided_slice %272 {offsets = [0, 56], sizes = [10, 8], strides = [1, 1]} : vector<10x96xf32> to vector<10x8xf32>
      %338 = vector.extract_strided_slice %272 {offsets = [0, 88], sizes = [10, 8], strides = [1, 1]} : vector<10x96xf32> to vector<10x8xf32>
      %339 = arith.truncf %336 : vector<10x8xf32> to vector<10x8xbf16>
      %340 = arith.truncf %337 : vector<10x8xf32> to vector<10x8xbf16>
      %cst_142 = arith.constant dense<0.000000e+00> : vector<10x10xf32>
      %341 = tpu.matmul %339, %340, %cst_142 {dimension_numbers = #tpu.dot_dimension_numbers<[1], [1], [0], [0], [0, 0, 1, 0], [], []>} : vector<10x8xbf16>, vector<10x8xbf16>, vector<10x10xf32> -> vector<10x10xf32>
      %cst_143 = arith.constant 0.353553385 : f32
      %342 = vector.broadcast %cst_143 : f32 to vector<10x10xf32>
      %343 = arith.mulf %341, %342 : vector<10x10xf32>
      %344 = arith.addf %343, %26 : vector<10x10xf32>
      %cst_144 = arith.constant dense<0xFF800000> : vector<10xf32>
      %345 = vector.multi_reduction <maximumf>, %344, %cst_144 [1] : vector<10x10xf32> to vector<10xf32>
      %346 = vector.shape_cast %345 : vector<10xf32> to vector<10x1xf32>
      %347 = vector.broadcast %346 : vector<10x1xf32> to vector<10x10xf32>
      %348 = arith.subf %344, %347 : vector<10x10xf32>
      %349 = math.exp %348 : vector<10x10xf32>
      %cst_145 = arith.constant dense<0.000000e+00> : vector<10xf32>
      %350 = vector.multi_reduction <add>, %349, %cst_145 [1] : vector<10x10xf32> to vector<10xf32>
      %351 = vector.shape_cast %350 : vector<10xf32> to vector<10x1xf32>
      %352 = vector.broadcast %351 : vector<10x1xf32> to vector<10x10xf32>
      %353 = arith.divf %349, %352 : vector<10x10xf32>
      %354 = arith.truncf %353 : vector<10x10xf32> to vector<10x10xbf16>
      %355 = arith.truncf %338 : vector<10x8xf32> to vector<10x8xbf16>
      %cst_146 = arith.constant dense<0.000000e+00> : vector<10x8xf32>
      %356 = tpu.matmul %354, %355, %cst_146 {dimension_numbers = #tpu.dot_dimension_numbers<[1], [0], [0], [1], [0, 0, 1, 1], [], []>} : vector<10x10xbf16>, vector<10x8xbf16>, vector<10x8xf32> -> vector<10x8xf32>
      %357 = tpu.concatenate %293, %314, %335, %356 in 1 : vector<10x8xf32>, vector<10x8xf32>, vector<10x8xf32>, vector<10x8xf32> -> vector<10x32xf32>
      %358 = arith.truncf %357 : vector<10x32xf32> to vector<10x32xbf16>
      %c1_147 = arith.constant 1 : index
      %c0_148 = arith.constant 0 : index
      %c0_149 = arith.constant 0 : index
      %359 = vector.load %arg9[%c1_147, %c0_148, %c0_149] : memref<2x32x32xbf16, #tpu.memory_space<vmem>>, vector<1x32x32xbf16>
      %360 = vector.shape_cast %359 : vector<1x32x32xbf16> to vector<32x32xbf16>
      %cst_150 = arith.constant dense<0.000000e+00> : vector<10x32xf32>
      %361 = tpu.matmul %358, %360, %cst_150 {dimension_numbers = #tpu.dot_dimension_numbers<[1], [0], [0], [1], [0, 0, 1, 1], [], []>} : vector<10x32xbf16>, vector<32x32xbf16>, vector<10x32xf32> -> vector<10x32xf32>
      %362 = arith.addf %238, %361 : vector<10x32xf32>
      %c1_151 = arith.constant 1 : index
      %c0_152 = arith.constant 0 : index
      %c0_153 = arith.constant 0 : index
      %363 = vector.load %arg10[%c1_151, %c0_152, %c0_153] : memref<2x1x32xf32, #tpu.memory_space<vmem>>, vector<1x1x32xf32>
      %364 = vector.shape_cast %363 : vector<1x1x32xf32> to vector<1x32xf32>
      %365 = vector.broadcast %364 : vector<1x32xf32> to vector<10x32xf32>
      %366 = arith.addf %362, %365 : vector<10x32xf32>
      %c1_154 = arith.constant 1 : index
      %c0_155 = arith.constant 0 : index
      %c0_156 = arith.constant 0 : index
      %367 = vector.load %arg11[%c1_154, %c0_155, %c0_156] : memref<2x1x32xf32, #tpu.memory_space<vmem>>, vector<1x1x32xf32>
      %368 = vector.shape_cast %367 : vector<1x1x32xf32> to vector<1x32xf32>
      %c1_157 = arith.constant 1 : index
      %c0_158 = arith.constant 0 : index
      %c0_159 = arith.constant 0 : index
      %369 = vector.load %arg12[%c1_157, %c0_158, %c0_159] : memref<2x1x32xf32, #tpu.memory_space<vmem>>, vector<1x1x32xf32>
      %370 = vector.shape_cast %369 : vector<1x1x32xf32> to vector<1x32xf32>
      %cst_160 = arith.constant dense<0.000000e+00> : vector<10xf32>
      %371 = vector.multi_reduction <add>, %366, %cst_160 [1] : vector<10x32xf32> to vector<10xf32>
      %372 = vector.shape_cast %371 : vector<10xf32> to vector<10x1xf32>
      %cst_161 = arith.constant 3.200000e+01 : f32
      %373 = vector.broadcast %cst_161 : f32 to vector<10x1xf32>
      %374 = arith.divf %372, %373 : vector<10x1xf32>
      %375 = vector.broadcast %374 : vector<10x1xf32> to vector<10x32xf32>
      %376 = arith.subf %366, %375 : vector<10x32xf32>
      %377 = arith.mulf %376, %376 : vector<10x32xf32>
      %cst_162 = arith.constant dense<0.000000e+00> : vector<10xf32>
      %378 = vector.multi_reduction <add>, %377, %cst_162 [1] : vector<10x32xf32> to vector<10xf32>
      %379 = vector.shape_cast %378 : vector<10xf32> to vector<10x1xf32>
      %cst_163 = arith.constant 3.200000e+01 : f32
      %380 = vector.broadcast %cst_163 : f32 to vector<10x1xf32>
      %381 = arith.divf %379, %380 : vector<10x1xf32>
      %382 = vector.broadcast %374 : vector<10x1xf32> to vector<10x32xf32>
      %383 = arith.subf %366, %382 : vector<10x32xf32>
      %cst_164 = arith.constant 9.99999997E-7 : f32
      %384 = vector.broadcast %cst_164 : f32 to vector<10x1xf32>
      %385 = arith.addf %381, %384 : vector<10x1xf32>
      %386 = math.rsqrt %385 : vector<10x1xf32>
      %387 = vector.broadcast %386 : vector<10x1xf32> to vector<10x32xf32>
      %388 = arith.mulf %383, %387 : vector<10x32xf32>
      %389 = vector.broadcast %368 : vector<1x32xf32> to vector<10x32xf32>
      %390 = arith.mulf %388, %389 : vector<10x32xf32>
      %391 = vector.broadcast %370 : vector<1x32xf32> to vector<10x32xf32>
      %392 = arith.addf %390, %391 : vector<10x32xf32>
      %393 = arith.truncf %392 : vector<10x32xf32> to vector<10x32xbf16>
      %c1_165 = arith.constant 1 : index
      %c0_166 = arith.constant 0 : index
      %c0_167 = arith.constant 0 : index
      %394 = vector.load %arg13[%c1_165, %c0_166, %c0_167] : memref<2x32x128xbf16, #tpu.memory_space<vmem>>, vector<1x32x128xbf16>
      %395 = vector.shape_cast %394 : vector<1x32x128xbf16> to vector<32x128xbf16>
      %cst_168 = arith.constant dense<0.000000e+00> : vector<10x128xf32>
      %396 = tpu.matmul %393, %395, %cst_168 {dimension_numbers = #tpu.dot_dimension_numbers<[1], [0], [0], [1], [0, 0, 1, 1], [], []>} : vector<10x32xbf16>, vector<32x128xbf16>, vector<10x128xf32> -> vector<10x128xf32>
      %c1_169 = arith.constant 1 : index
      %c0_170 = arith.constant 0 : index
      %c0_171 = arith.constant 0 : index
      %397 = vector.load %arg14[%c1_169, %c0_170, %c0_171] : memref<2x1x128xf32, #tpu.memory_space<vmem>>, vector<1x1x128xf32>
      %398 = vector.shape_cast %397 : vector<1x1x128xf32> to vector<1x128xf32>
      %399 = vector.broadcast %398 : vector<1x128xf32> to vector<10x128xf32>
      %400 = arith.addf %396, %399 : vector<10x128xf32>
      %cst_172 = arith.constant 5.000000e-01 : f32
      %401 = vector.broadcast %cst_172 : f32 to vector<10x128xf32>
      %402 = arith.mulf %401, %400 : vector<10x128xf32>
      %cst_173 = arith.constant 0.707106769 : f32
      %403 = vector.broadcast %cst_173 : f32 to vector<10x128xf32>
      %404 = arith.mulf %400, %403 : vector<10x128xf32>
      %cst_174 = arith.constant 0.000000e+00 : f32
      %405 = vector.broadcast %cst_174 : f32 to vector<10x128xf32>
      %406 = arith.cmpf oge, %404, %405 : vector<10x128xf32>
      %cst_175 = arith.constant 1.000000e+00 : f32
      %cst_176 = arith.constant -1.000000e+00 : f32
      %407 = vector.broadcast %cst_175 : f32 to vector<10x128xf32>
      %408 = vector.broadcast %cst_176 : f32 to vector<10x128xf32>
      %409 = arith.select %406, %407, %408 : vector<10x128xi1>, vector<10x128xf32>
      %410 = math.absf %404 : vector<10x128xf32>
      %cst_177 = arith.constant 0.327591091 : f32
      %411 = vector.broadcast %cst_177 : f32 to vector<10x128xf32>
      %412 = arith.mulf %411, %410 : vector<10x128xf32>
      %cst_178 = arith.constant 1.000000e+00 : f32
      %413 = vector.broadcast %cst_178 : f32 to vector<10x128xf32>
      %414 = arith.addf %413, %412 : vector<10x128xf32>
      %cst_179 = arith.constant 1.000000e+00 : f32
      %415 = vector.broadcast %cst_179 : f32 to vector<10x128xf32>
      %416 = arith.divf %415, %414 : vector<10x128xf32>
      %cst_180 = arith.constant 1.06140542 : f32
      %417 = vector.broadcast %cst_180 : f32 to vector<10x128xf32>
      %418 = arith.mulf %417, %416 : vector<10x128xf32>
      %cst_181 = arith.constant -1.45315206 : f32
      %419 = vector.broadcast %cst_181 : f32 to vector<10x128xf32>
      %420 = arith.addf %418, %419 : vector<10x128xf32>
      %421 = arith.mulf %420, %416 : vector<10x128xf32>
      %cst_182 = arith.constant 1.42141378 : f32
      %422 = vector.broadcast %cst_182 : f32 to vector<10x128xf32>
      %423 = arith.addf %421, %422 : vector<10x128xf32>
      %424 = arith.mulf %423, %416 : vector<10x128xf32>
      %cst_183 = arith.constant -0.284496725 : f32
      %425 = vector.broadcast %cst_183 : f32 to vector<10x128xf32>
      %426 = arith.addf %424, %425 : vector<10x128xf32>
      %427 = arith.mulf %426, %416 : vector<10x128xf32>
      %cst_184 = arith.constant 0.254829586 : f32
      %428 = vector.broadcast %cst_184 : f32 to vector<10x128xf32>
      %429 = arith.addf %427, %428 : vector<10x128xf32>
      %430 = arith.mulf %429, %416 : vector<10x128xf32>
      %cst_185 = arith.constant 0.000000e+00 : f32
      %431 = vector.broadcast %cst_185 : f32 to vector<10x128xf32>
      %432 = arith.subf %431, %410 : vector<10x128xf32>
      %433 = arith.mulf %432, %410 : vector<10x128xf32>
      %434 = math.exp %433 : vector<10x128xf32>
      %435 = arith.mulf %430, %434 : vector<10x128xf32>
      %cst_186 = arith.constant 1.000000e+00 : f32
      %436 = vector.broadcast %cst_186 : f32 to vector<10x128xf32>
      %437 = arith.subf %436, %435 : vector<10x128xf32>
      %438 = arith.mulf %409, %437 : vector<10x128xf32>
      %cst_187 = arith.constant 1.000000e+00 : f32
      %439 = vector.broadcast %cst_187 : f32 to vector<10x128xf32>
      %440 = arith.addf %439, %438 : vector<10x128xf32>
      %441 = arith.mulf %402, %440 : vector<10x128xf32>
      %442 = arith.truncf %441 : vector<10x128xf32> to vector<10x128xbf16>
      %c1_188 = arith.constant 1 : index
      %c0_189 = arith.constant 0 : index
      %c0_190 = arith.constant 0 : index
      %443 = vector.load %arg15[%c1_188, %c0_189, %c0_190] : memref<2x128x32xbf16, #tpu.memory_space<vmem>>, vector<1x128x32xbf16>
      %444 = vector.shape_cast %443 : vector<1x128x32xbf16> to vector<128x32xbf16>
      %cst_191 = arith.constant dense<0.000000e+00> : vector<10x32xf32>
      %445 = tpu.matmul %442, %444, %cst_191 {dimension_numbers = #tpu.dot_dimension_numbers<[1], [0], [0], [1], [0, 0, 1, 1], [], []>} : vector<10x128xbf16>, vector<128x32xbf16>, vector<10x32xf32> -> vector<10x32xf32>
      %446 = arith.addf %366, %445 : vector<10x32xf32>
      %c1_192 = arith.constant 1 : index
      %c0_193 = arith.constant 0 : index
      %c0_194 = arith.constant 0 : index
      %447 = vector.load %arg16[%c1_192, %c0_193, %c0_194] : memref<2x1x32xf32, #tpu.memory_space<vmem>>, vector<1x1x32xf32>
      %448 = vector.shape_cast %447 : vector<1x1x32xf32> to vector<1x32xf32>
      %449 = vector.broadcast %448 : vector<1x32xf32> to vector<10x32xf32>
      %450 = arith.addf %446, %449 : vector<10x32xf32>
      %451 = vector.extract_strided_slice %450 {offsets = [0, 0], sizes = [1, 32], strides = [1, 1]} : vector<10x32xf32> to vector<1x32xf32>
      %452 = vector.extract_strided_slice %450 {offsets = [5, 0], sizes = [1, 32], strides = [1, 1]} : vector<10x32xf32> to vector<1x32xf32>
      %453 = tpu.concatenate %451, %452 in 0 : vector<1x32xf32>, vector<1x32xf32> -> vector<2x32xf32>
      %c0_195 = arith.constant 0 : index
      %c0_196 = arith.constant 0 : index
      %454 = vector.load %arg17[%c0_195, %c0_196] : memref<1x32xf32, #tpu.memory_space<vmem>>, vector<1x32xf32>
      %c0_197 = arith.constant 0 : index
      %c0_198 = arith.constant 0 : index
      %455 = vector.load %arg18[%c0_197, %c0_198] : memref<1x32xf32, #tpu.memory_space<vmem>>, vector<1x32xf32>
      %cst_199 = arith.constant dense<0.000000e+00> : vector<2xf32>
      %456 = vector.multi_reduction <add>, %453, %cst_199 [1] : vector<2x32xf32> to vector<2xf32>
      %457 = vector.shape_cast %456 : vector<2xf32> to vector<2x1xf32>
      %cst_200 = arith.constant 3.200000e+01 : f32
      %458 = vector.broadcast %cst_200 : f32 to vector<2x1xf32>
      %459 = arith.divf %457, %458 : vector<2x1xf32>
      %460 = vector.broadcast %459 : vector<2x1xf32> to vector<2x32xf32>
      %461 = arith.subf %453, %460 : vector<2x32xf32>
      %462 = arith.mulf %461, %461 : vector<2x32xf32>
      %cst_201 = arith.constant dense<0.000000e+00> : vector<2xf32>
      %463 = vector.multi_reduction <add>, %462, %cst_201 [1] : vector<2x32xf32> to vector<2xf32>
      %464 = vector.shape_cast %463 : vector<2xf32> to vector<2x1xf32>
      %cst_202 = arith.constant 3.200000e+01 : f32
      %465 = vector.broadcast %cst_202 : f32 to vector<2x1xf32>
      %466 = arith.divf %464, %465 : vector<2x1xf32>
      %467 = vector.broadcast %459 : vector<2x1xf32> to vector<2x32xf32>
      %468 = arith.subf %453, %467 : vector<2x32xf32>
      %cst_203 = arith.constant 9.99999997E-7 : f32
      %469 = vector.broadcast %cst_203 : f32 to vector<2x1xf32>
      %470 = arith.addf %466, %469 : vector<2x1xf32>
      %471 = math.rsqrt %470 : vector<2x1xf32>
      %472 = vector.broadcast %471 : vector<2x1xf32> to vector<2x32xf32>
      %473 = arith.mulf %468, %472 : vector<2x32xf32>
      %474 = vector.broadcast %454 : vector<1x32xf32> to vector<2x32xf32>
      %475 = arith.mulf %473, %474 : vector<2x32xf32>
      %476 = vector.broadcast %455 : vector<1x32xf32> to vector<2x32xf32>
      %477 = arith.addf %475, %476 : vector<2x32xf32>
      %c0_204 = arith.constant 0 : index
      %c0_205 = arith.constant 0 : index
      %478 = vector.load %arg26[%c0_204, %c0_205] : memref<2x32xf32, #tpu.memory_space<vmem>>, vector<2x32xf32>
      tpu.vector_store %arg26[%c0_204, %c0_205], %477 {strides = array<i32>} : memref<2x32xf32, #tpu.memory_space<vmem>>, vector<2x32xf32>,
      %cst_206 = arith.constant 0.000000e+00 : f32
      %479 = vector.broadcast %cst_206 : f32 to vector<2x512xf32>
      %c0_207 = arith.constant 0 : index
      %c0_208 = arith.constant 0 : index
      %480 = vector.load %arg27[%c0_207, %c0_208] : memref<2x512xf32, #tpu.memory_space<vmem>>, vector<2x512xf32>
      tpu.vector_store %arg27[%c0_207, %c0_208], %479 {strides = array<i32>} : memref<2x512xf32, #tpu.memory_space<vmem>>, vector<2x512xf32>,
    } else {
    }
    %c0 = arith.constant 0 : index
    %c0_1 = arith.constant 0 : index
    %3 = vector.load %arg26[%c0, %c0_1] : memref<2x32xf32, #tpu.memory_space<vmem>>, vector<2x32xf32>
    %4 = arith.truncf %3 : vector<2x32xf32> to vector<2x32xbf16>
    %c0_2 = arith.constant 0 : index
    %c0_3 = arith.constant 0 : index
    %5 = vector.load %arg19[%c0_2, %c0_3] : memref<32x512xbf16, #tpu.memory_space<vmem>>, vector<32x512xbf16>
    %cst = arith.constant dense<0.000000e+00> : vector<2x512xf32>
    %6 = tpu.matmul %4, %5, %cst {dimension_numbers = #tpu.dot_dimension_numbers<[1], [0], [0], [1], [0, 0, 1, 1], [], []>} : vector<2x32xbf16>, vector<32x512xbf16>, vector<2x512xf32> -> vector<2x512xf32>
    %c0_4 = arith.constant 0 : index
    %c0_5 = arith.constant 0 : index
    %7 = vector.load %arg20[%c0_4, %c0_5] : memref<1x512xf32, #tpu.memory_space<vmem>>, vector<1x512xf32>
    %8 = vector.broadcast %7 : vector<1x512xf32> to vector<2x512xf32>
    %9 = arith.addf %6, %8 : vector<2x512xf32>
    %cst_6 = arith.constant 0.000000e+00 : f32
    %10 = vector.broadcast %cst_6 : f32 to vector<2x512xf32>
    %11 = arith.maximumf %9, %10 : vector<2x512xf32>
    %c0_7 = arith.constant 0 : index
    %c0_8 = arith.constant 0 : index
    %12 = vector.load %arg27[%c0_7, %c0_8] : memref<2x512xf32, #tpu.memory_space<vmem>>, vector<2x512xf32>
    %13 = arith.truncf %11 : vector<2x512xf32> to vector<2x512xbf16>
    %c0_9 = arith.constant 0 : index
    %c0_10 = arith.constant 0 : index
    %14 = vector.load %arg21[%c0_9, %c0_10] : memref<512x512xbf16, #tpu.memory_space<vmem>>, vector<512x512xbf16>
    %cst_11 = arith.constant dense<0.000000e+00> : vector<2x512xf32>
    %15 = tpu.matmul %13, %14, %cst_11 {dimension_numbers = #tpu.dot_dimension_numbers<[1], [0], [0], [1], [0, 0, 1, 1], [], []>} : vector<2x512xbf16>, vector<512x512xbf16>, vector<2x512xf32> -> vector<2x512xf32>
    %16 = arith.addf %12, %15 : vector<2x512xf32>
    %c0_12 = arith.constant 0 : index
    %c0_13 = arith.constant 0 : index
    %17 = vector.load %arg27[%c0_12, %c0_13] : memref<2x512xf32, #tpu.memory_space<vmem>>, vector<2x512xf32>
    tpu.vector_store %arg27[%c0_12, %c0_13], %16 {strides = array<i32>} : memref<2x512xf32, #tpu.memory_space<vmem>>, vector<2x512xf32>,
    %c3_i32 = arith.constant 3 : i32
    %18 = arith.cmpi eq, %arg0, %c3_i32 : i32
    %19 = arith.extui %18 : i1 to i32
    %c0_i32_14 = arith.constant 0 : i32
    %20 = arith.cmpi ne, %19, %c0_i32_14 : i32
    scf.if %20 {
      %c0_15 = arith.constant 0 : index
      %c0_16 = arith.constant 0 : index
      %21 = vector.load %arg27[%c0_15, %c0_16] : memref<2x512xf32, #tpu.memory_space<vmem>>, vector<2x512xf32>
      %c0_17 = arith.constant 0 : index
      %c0_18 = arith.constant 0 : index
      %22 = vector.load %arg22[%c0_17, %c0_18] : memref<1x512xf32, #tpu.memory_space<vmem>>, vector<1x512xf32>
      %23 = vector.broadcast %22 : vector<1x512xf32> to vector<2x512xf32>
      %24 = arith.addf %21, %23 : vector<2x512xf32>
      %cst_19 = arith.constant 0.000000e+00 : f32
      %25 = vector.broadcast %cst_19 : f32 to vector<2x512xf32>
      %26 = arith.maximumf %24, %25 : vector<2x512xf32>
      %27 = arith.truncf %26 : vector<2x512xf32> to vector<2x512xbf16>
      %c0_20 = arith.constant 0 : index
      %c0_21 = arith.constant 0 : index
      %28 = vector.load %arg23[%c0_20, %c0_21] : memref<512x128xbf16, #tpu.memory_space<vmem>>, vector<512x128xbf16>
      %cst_22 = arith.constant dense<0.000000e+00> : vector<2x128xf32>
      %29 = tpu.matmul %27, %28, %cst_22 {dimension_numbers = #tpu.dot_dimension_numbers<[1], [0], [0], [1], [0, 0, 1, 1], [], []>} : vector<2x512xbf16>, vector<512x128xbf16>, vector<2x128xf32> -> vector<2x128xf32>
      %c0_23 = arith.constant 0 : index
      %c0_24 = arith.constant 0 : index
      %30 = vector.load %arg24[%c0_23, %c0_24] : memref<1x128xf32, #tpu.memory_space<vmem>>, vector<1x128xf32>
      %31 = vector.broadcast %30 : vector<1x128xf32> to vector<2x128xf32>
      %32 = arith.addf %29, %31 : vector<2x128xf32>
      %c0_25 = arith.constant 0 : index
      %c0_26 = arith.constant 0 : index
      %33 = vector.load %arg25[%c0_25, %c0_26] : memref<2x128xf32, #tpu.memory_space<vmem>>, vector<2x128xf32>
      tpu.vector_store %arg25[%c0_25, %c0_26], %32 {strides = array<i32>} : memref<2x128xf32, #tpu.memory_space<vmem>>, vector<2x128xf32>,
    } else {
    }
    return
  }
  func.func @transform_0(%arg0: i32) -> (i32, i32) {
    %c0_i32 = arith.constant 0 : i32
    %c0_i32_0 = arith.constant 0 : i32
    %c0_i32_1 = arith.constant 0 : i32
    return %c0_i32, %c0_i32_0 : i32, i32
  }
  func.func @transform_1(%arg0: i32) -> (i32, i32) {
    %c0_i32 = arith.constant 0 : i32
    %c0_i32_0 = arith.constant 0 : i32
    %c0_i32_1 = arith.constant 0 : i32
    return %c0_i32, %c0_i32_0 : i32, i32
  }
  func.func @transform_2(%arg0: i32) -> (i32, i32) {
    %c0_i32 = arith.constant 0 : i32
    %c0_i32_0 = arith.constant 0 : i32
    %c0_i32_1 = arith.constant 0 : i32
    return %c0_i32, %c0_i32_0 : i32, i32
  }
  func.func @transform_3(%arg0: i32) -> (i32, i32) {
    %c0_i32 = arith.constant 0 : i32
    %c0_i32_0 = arith.constant 0 : i32
    %c0_i32_1 = arith.constant 0 : i32
    return %c0_i32, %c0_i32_0 : i32, i32
  }
  func.func @transform_4(%arg0: i32) -> (i32, i32, i32) {
    %c0_i32 = arith.constant 0 : i32
    %c0_i32_0 = arith.constant 0 : i32
    %c0_i32_1 = arith.constant 0 : i32
    %c0_i32_2 = arith.constant 0 : i32
    return %c0_i32, %c0_i32_0, %c0_i32_1 : i32, i32, i32
  }
  func.func @transform_5(%arg0: i32) -> (i32, i32, i32) {
    %c0_i32 = arith.constant 0 : i32
    %c0_i32_0 = arith.constant 0 : i32
    %c0_i32_1 = arith.constant 0 : i32
    %c0_i32_2 = arith.constant 0 : i32
    return %c0_i32, %c0_i32_0, %c0_i32_1 : i32, i32, i32
  }
  func.func @transform_6(%arg0: i32) -> (i32, i32, i32) {
    %c0_i32 = arith.constant 0 : i32
    %c0_i32_0 = arith.constant 0 : i32
    %c0_i32_1 = arith.constant 0 : i32
    %c0_i32_2 = arith.constant 0 : i32
    return %c0_i32, %c0_i32_0, %c0_i32_1 : i32, i32, i32
  }
  func.func @transform_7(%arg0: i32) -> (i32, i32, i32) {
    %c0_i32 = arith.constant 0 : i32
    %c0_i32_0 = arith.constant 0 : i32
    %c0_i32_1 = arith.constant 0 : i32
    %c0_i32_2 = arith.constant 0 : i32
    return %c0_i32, %c0_i32_0, %c0_i32_1 : i32, i32, i32
  }
  func.func @transform_8(%arg0: i32) -> (i32, i32, i32) {
    %c0_i32 = arith.constant 0 : i32
    %c0_i32_0 = arith.constant 0 : i32
    %c0_i32_1 = arith.constant 0 : i32
    %c0_i32_2 = arith.constant 0 : i32
    return %c0_i32, %c0_i32_0, %c0_i32_1 : i32, i32, i32
  }
  func.func @transform_9(%arg0: i32) -> (i32, i32, i32) {
    %c0_i32 = arith.constant 0 : i32
    %c0_i32_0 = arith.constant 0 : i32
    %c0_i32_1 = arith.constant 0 : i32
    %c0_i32_2 = arith.constant 0 : i32
    return %c0_i32, %c0_i32_0, %c0_i32_1 : i32, i32, i32
  }
  func.func @transform_10(%arg0: i32) -> (i32, i32, i32) {
    %c0_i32 = arith.constant 0 : i32
    %c0_i32_0 = arith.constant 0 : i32
    %c0_i32_1 = arith.constant 0 : i32
    %c0_i32_2 = arith.constant 0 : i32
    return %c0_i32, %c0_i32_0, %c0_i32_1 : i32, i32, i32
  }
  func.func @transform_11(%arg0: i32) -> (i32, i32, i32) {
    %c0_i32 = arith.constant 0 : i32
    %c0_i32_0 = arith.constant 0 : i32
    %c0_i32_1 = arith.constant 0 : i32
    %c0_i32_2 = arith.constant 0 : i32
    return %c0_i32, %c0_i32_0, %c0_i32_1 : i32, i32, i32
  }
  func.func @transform_12(%arg0: i32) -> (i32, i32, i32) {
    %c0_i32 = arith.constant 0 : i32
    %c0_i32_0 = arith.constant 0 : i32
    %c0_i32_1 = arith.constant 0 : i32
    %c0_i32_2 = arith.constant 0 : i32
    return %c0_i32, %c0_i32_0, %c0_i32_1 : i32, i32, i32
  }
  func.func @transform_13(%arg0: i32) -> (i32, i32, i32) {
    %c0_i32 = arith.constant 0 : i32
    %c0_i32_0 = arith.constant 0 : i32
    %c0_i32_1 = arith.constant 0 : i32
    %c0_i32_2 = arith.constant 0 : i32
    return %c0_i32, %c0_i32_0, %c0_i32_1 : i32, i32, i32
  }
  func.func @transform_14(%arg0: i32) -> (i32, i32, i32) {
    %c0_i32 = arith.constant 0 : i32
    %c0_i32_0 = arith.constant 0 : i32
    %c0_i32_1 = arith.constant 0 : i32
    %c0_i32_2 = arith.constant 0 : i32
    return %c0_i32, %c0_i32_0, %c0_i32_1 : i32, i32, i32
  }
  func.func @transform_15(%arg0: i32) -> (i32, i32, i32) {
    %c0_i32 = arith.constant 0 : i32
    %c0_i32_0 = arith.constant 0 : i32
    %c0_i32_1 = arith.constant 0 : i32
    %c0_i32_2 = arith.constant 0 : i32
    return %c0_i32, %c0_i32_0, %c0_i32_1 : i32, i32, i32
  }
  func.func @transform_16(%arg0: i32) -> (i32, i32) {
    %c0_i32 = arith.constant 0 : i32
    %c0_i32_0 = arith.constant 0 : i32
    %c0_i32_1 = arith.constant 0 : i32
    return %c0_i32, %c0_i32_0 : i32, i32
  }
  func.func @transform_17(%arg0: i32) -> (i32, i32) {
    %c0_i32 = arith.constant 0 : i32
    %c0_i32_0 = arith.constant 0 : i32
    %c0_i32_1 = arith.constant 0 : i32
    return %c0_i32, %c0_i32_0 : i32, i32
  }
  func.func @transform_18(%arg0: i32) -> (i32, i32) {
    %c0_i32 = arith.constant 0 : i32
    %c0_i32_0 = arith.constant 0 : i32
    return %c0_i32, %arg0 : i32, i32
  }
  func.func @transform_19(%arg0: i32) -> (i32, i32) {
    %c0_i32 = arith.constant 0 : i32
    %c0_i32_0 = arith.constant 0 : i32
    return %c0_i32, %arg0 : i32, i32
  }
  func.func @transform_20(%arg0: i32) -> (i32, i32) {
    %c0_i32 = arith.constant 0 : i32
    %c0_i32_0 = arith.constant 0 : i32
    return %arg0, %c0_i32 : i32, i32
  }
  func.func @transform_21(%arg0: i32) -> (i32, i32) {
    %c0_i32 = arith.constant 0 : i32
    %c0_i32_0 = arith.constant 0 : i32
    %c0_i32_1 = arith.constant 0 : i32
    return %c0_i32, %c0_i32_0 : i32, i32
  }
  func.func @transform_22(%arg0: i32) -> (i32, i32) {
    %c0_i32 = arith.constant 0 : i32
    %c0_i32_0 = arith.constant 0 : i32
    %c0_i32_1 = arith.constant 0 : i32
    return %c0_i32, %c0_i32_0 : i32, i32
  }
  func.func @transform_23(%arg0: i32) -> (i32, i32) {
    %c0_i32 = arith.constant 0 : i32
    %c0_i32_0 = arith.constant 0 : i32
    %c0_i32_1 = arith.constant 0 : i32
    return %c0_i32, %c0_i32_0 : i32, i32
  }
  func.func @transform_24(%arg0: i32) -> (i32, i32) {
    %c0_i32 = arith.constant 0 : i32
    %c0_i32_0 = arith.constant 0 : i32
    %c0_i32_1 = arith.constant 0 : i32
    return %c0_i32, %c0_i32_0 : i32, i32
  }
}

</mosaic_0001>

<bundles_post_ra>
// kernel: tile.9
= control target key start
LH: loop header
LB: loop body
LE: loop exit
PB: predicated region body
PF: predicated region fallthrough
CT: control target
= control target key end

     0   :  { %vm3_vm0 = vcmask 261120   ;;  %s34_s0 = inlined_call_operand.vmem [shape: f32[2,5,32], index: 0, kind: input, shape index: {}]   ;;  %s35_s1 = inlined_call_operand.vmem [shape: f32[10,32], index: 1, kind: output, shape index: {}]  }
   0x1   :  { %v2_v0 = vld [vmem:[%s34_s0] sm:$0x1f]   ;;  %v10_v1 = vld [vmem:[%s34_s0 + $0x8] sm:$0x1f]  }
   0x2   :  { %4 = vst.msk [vmem:[%s35_s1] sm:$0x1f] %vm3_vm0, %v2_v0   ;;  %11 = vst.msk [vmem:[%s35_s1 + $0x5] sm:$0x1f] %vm3_vm0, %v10_v1  }

// kernel: forward.1
= control target key start
LH: loop header
LB: loop body
LE: loop exit
PB: predicated region body
PF: predicated region fallthrough
CT: control target
= control target key end

     0   :  { %s7985_s0 = inlined_call_operand.vmem [shape: f32[10,192], index: 0, kind: input, shape index: {}]   ;;  %s7986_s1 = inlined_call_operand.hbm [shape: f32[192,32], index: 1, kind: input, shape index: {}]   ;;  %s7987_s2 = inlined_call_operand.vmem [shape: f32[10,32], index: 2, kind: input, shape index: {}]   ;;  %s7988_s3 = inlined_call_operand.vmem [shape: f32[10,10], index: 3, kind: input, shape index: {}]   ;;  %s7989_s4 = inlined_call_operand.hbm [shape: f32[2,1,32], index: 4, kind: input, shape index: {}]   ;;  %s7990_s5 = inlined_call_operand.hbm [shape: f32[2,1,32], index: 5, kind: input, shape index: {}]   ;;  %s7991_s6 = inlined_call_operand.hbm [shape: bf16[2,32,96], index: 6, kind: input, shape index: {}]   ;;  %s7992_s7 = inlined_call_operand.hbm [shape: f32[2,1,96], index: 7, kind: input, shape index: {}]   ;;  %s7993_s8 = inlined_call_operand.hbm [shape: bf16[2,32,32], index: 8, kind: input, shape index: {}]   ;;  %s7994_s9 = inlined_call_operand.hbm [shape: f32[2,1,32], index: 9, kind: input, shape index: {}]   ;;  %s7995_s10 = inlined_call_operand.hbm [shape: f32[2,1,32], index: 10, kind: input, shape index: {}]   ;;  %s7996_s11 = inlined_call_operand.hbm [shape: f32[2,1,32], index: 11, kind: input, shape index: {}]   ;;  %s7997_s12 = inlined_call_operand.hbm [shape: bf16[2,32,128], index: 12, kind: input, shape index: {}]   ;;  %s7998_s13 = inlined_call_operand.hbm [shape: f32[2,1,128], index: 13, kind: input, shape index: {}]   ;;  %s7999_s14 = inlined_call_operand.vmem [shape: bf16[2,128,32], index: 14, kind: input, shape index: {}]   ;;  %s8000_s15 = inlined_call_operand.hbm [shape: f32[2,1,32], index: 15, kind: input, shape index: {}]   ;;  %s8001_s16 = inlined_call_operand.hbm [shape: f32[1,32], index: 16, kind: input, shape index: {}]   ;;  %s8002_s17 = inlined_call_operand.hbm [shape: f32[1,32], index: 17, kind: input, shape index: {}]   ;;  %s8003_s18 = inlined_call_operand.hbm [shape: bf16[32,2048], index: 18, kind: input, shape index: {}]   ;;  %s8004_s19 = inlined_call_operand.hbm [shape: f32[1,2048], index: 19, kind: input, shape index: {}]   ;;  %s8005_s20 = inlined_call_operand.hbm [shape: bf16[2048,512], index: 20, kind: input, shape index: {}]   ;;  %s8006_s21 = inlined_call_operand.hbm [shape: f32[1,512], index: 21, kind: input, shape index: {}]   ;;  %s8007_s22 = inlined_call_operand.vmem [shape: bf16[512,128], index: 22, kind: input, shape index: {}]   ;;  %s8008_s23 = inlined_call_operand.vmem [shape: f32[1,128], index: 23, kind: input, shape index: {}]   ;;  %s8009_s24 = inlined_call_operand.vmem [shape: f32[2,128], index: 24, kind: output, shape index: {}]  }
   0x1   :  { %8046 = sst [smem:[#allocation47_spill]] %s7985_s0 }
   0x2   :  { %8047 = sst [smem:[#allocation48_spill]] %s7986_s1 }
   0x3   :  { %8048 = sst [smem:[#allocation49_spill]] %s7987_s2 }
   0x4   :  { %8049 = sst [smem:[#allocation50_spill]] %s7988_s3 }
   0x5   :  { %8050 = sst [smem:[#allocation51_spill]] %s7989_s4 }
   0x6   :  { %8051 = sst [smem:[#allocation52_spill]] %s7990_s5 }
   0x7   :  { %8052 = sst [smem:[#allocation53_spill]] %s7991_s6 }
   0x8   :  { %8053 = sst [smem:[#allocation54_spill]] %s7992_s7 }
   0x9   :  { %8054 = sst [smem:[#allocation55_spill]] %s7993_s8 }
   0xa   :  { %8055 = sst [smem:[#allocation56_spill]] %s7995_s10 }
   0xb   :  { %8056 = sst [smem:[#allocation57_spill]] %s7997_s12 }
   0xc   :  { %8057 = sst [smem:[#allocation58_spill]] %s7999_s14 }
   0xd   :  { %8058 = sst [smem:[#allocation59_spill]] %s8003_s18 }
   0xe   :  { %8059 = sst [smem:[#allocation60_spill]] %s8005_s20 }
   0xf   :  { %8060 = sst [smem:[#allocation61_spill]] %s8007_s22 }
  0x10   :  { %8061 = sst [smem:[#allocation62_spill]] %s8008_s23 }
  0x11   :  { %8062 = sst [smem:[#allocation63_spill]] %s8009_s24 }
  0x12   :  { %29 = vsyncpa [#allocation5], 0 }
  0x13   :  { %30 = vsyncpa [#allocation7], 0 }
  0x14   :  { %31 = vsyncpa [#allocation10], 0 }
  0x15   :  { %32 = vsyncpa [#allocation13], 0 }
  0x16   :  { %33 = vsyncpa [#allocation16], 0 }
  0x17   :  { %34 = vsyncpa [#allocation19], 0 }
  0x18   :  { %35 = vsyncpa [#allocation22], 0 }
  0x19   :  { %36 = vsyncpa [#allocation25], 0  ;;  %s6914_s5 = smov 0   ;;  %s6916_s26 = smov 0  }
  0x1a   :  { %s6918_s27 = smov 0   ;;  %s6920_s28 = smov 0  }
  0x1b LB: > { %8063 = sst [smem:[#allocation40_spill]] %s6734_s26  ;;  %s6744_s6 = smov [#allocation4]   ;;  %s6742_s28 = sphi %s6920_s28, %s8134_s28   ;;  %s6738_s27 = sphi %s6918_s27, %s8137_s27   ;;  %s6734_s26 = sphi %s6916_s26, %s8136_s26   ;;  %s6730_s5 = sphi %s6914_s5, %s8135_s5  }
  0x1c   : > { %8064 = sst [smem:[#allocation41_spill]] %s6738_s27  ;;  %s602_s2 = sshll.u32 %s6744_s6, 4  ;;  %s603_s2 = int_to_ptr.vmem [resolvable:$true] %s602_s2 }
  0x1d   : > { %s6935_s29 = sadd.s32 4294967295, %s6742_s28   ;;  %p4969_p0 = scmp.ge.s32.totalorder %s6742_s28, 1 }
  0x1e   : > { %8065 = sst [smem:[#allocation42_spill]] %s6935_s29  ;;  %p8013_p1 = scmp.eq.s32.totalorder %s6935_s29, 0 }
  0x1f   : > { %p587_p2 = scmp.lt.s32.totalorder %s6742_s28, 5  ;;  %s6745_s7 = smov [#allocation6]  }
  0x20   : > { %s621_s30 = sshll.u32 %s6745_s7, 4  ;;  %s6209_s8 = scalar_lea.vmem %s603_s2, 3072  ;;  %s622_s30 = int_to_ptr.vmem [resolvable:$true] %s621_s30 }
  0x21   : > { %p6941_p4 = pnand %p4969_p0, %p587_p2  ;;  %p6210_p8 = scmp.ne.s32.totalorder %s603_s2, %s6209_s8 }
  0x22   : > { %p6217_p11 = scmp.lt.s32.totalorder %s603_s2, %s603_s2  ;;  %p6218_p12 = scmp.lt.s32.totalorder %s6209_s8, %s6209_s8 }
  0x23   : > { %s8066_s0 = scalar_select %p6941_p4, 1, 0 }
  0x24   : > { %p5642_p5 = pneg %p6941_p4  ;;  %p6219_p13 = por %p6218_p12, %p6217_p11 }
  0x25   : > { %8067 = sst [smem:[#allocation43_spill]] %s8066_s0 }
  0x26   : > { %p6949_p6 = pnand %p5642_p5, %p8013_p1 }
  0x28   : > { %s8068_s3 = scalar_select %p6949_p6, 1, 0 }
  0x29   : > { %p6955_p7 = pneg %p6949_p6 }
  0x2b   : > { %s8069_s25 = scalar_select %p6955_p7, 1, 0 }
  0x2c   : > { %p6212_p9 = pnand %p6210_p8, %p6955_p7 }
  0x2e   : > { %p6213_p10 = pneg %p6212_p9 }
  0x30   : > { %p6220_p0 = pnand %p6219_p13, %p6213_p10 }
  0x32   : > { %6223 = shalt.err (!%p6220_p0)
}
  0x33   : > { %s6746_s4 = smov 128   ;;  %s6747_s1 = smov 8  }
  0x34   : > { %s8070_s24 = sld [smem:[#allocation48_spill]]  ;;  %s6235_s23 = scalar_lea.vmem %s622_s30, 32 }
  0x35   : > { %p6236_p2 = scmp.ne.s32.totalorder %s622_s30, %s6235_s23  ;;  %p6243_p9 = scmp.lt.s32.totalorder %s622_s30, %s622_s30 }
  0x36   : > { %p6244_p3 = scmp.lt.s32.totalorder %s6235_s23, %s6235_s23 }
  0x37   : > { %p6238_p5 = pnand %p6236_p2, %p6955_p7 }
  0x38   : > { %p6245_p1 = por %p6244_p3, %p6243_p9 }
  0x39   : > { %p6239_p8 = pneg %p6238_p5 }
  0x3a   : > { %5645 = dma.hbm_to_vmem [thread:$0]  (!%p6949_p6), %s8070_s24, 3072, %s603_s2, [#allocation5], %s6746_s4, %s6746_s4, %s6747_s1  }
  0x3b   : > { %p6246_p11 = pnand %p6245_p1, %p6239_p8 }
  0x3d   : > { %6249 = shalt.err (!%p6246_p11)
}
  0x3e   : > { %s8018_s8 = smov 16   ;;  %s8016_s24 = smov 1  }
  0x3f   : > { %s8071_s4 = sld [smem:[#allocation51_spill]]  ;;  %s6977_s1 = sadd.s32 1, %s6742_s28  }
  0x40   : > { %8072 = sst [smem:[#allocation44_spill]] %s6977_s1  ;;  %s427_s6 = sadd.s32 1, %s6738_s27 }
  0x41   : > { %s424_s7 = ssub.s32 %s6742_s28, %s6977_s1  ;;  %p434_p1 = scmp.ne.s32.totalorder %s6738_s27, %s6734_s26 }
  0x42   : > { %p425_p3 = scmp.eq.s32.totalorder %s424_s7, 0  ;;  %p435_p10 = scmp.eq.s32.totalorder %s6742_s28, 0 }
  0x43   : > { %p440_p12 = scmp.ne.s32.totalorder %s6734_s26, %s6730_s5  ;;  %p5713_p13 = scmp.lt.s32.totalorder %s6742_s28, 4 }
  0x44   : > { %s6989_s22 = scalar_select %p425_p3, %s6738_s27, %s427_s6  }
  0x45   : > { %5648 = dma.hbm_to_vmem [thread:$0]  (!%p6949_p6), %s8071_s4, 32, %s622_s30, [#allocation7], %s8018_s8, %s8018_s8, %s8016_s24  }
  0x46   : > { %8073 = sst [smem:[#allocation45_spill]] %s6989_s22  ;;  %p436_p0 = por %p435_p10, %p434_p1 }
  0x47   : > { %p8074_p2 = scmp.eq.s32.totalorder %s6935_s29, 0  ;;  %s807_s23 = sand.u32 1, %s6742_s28  }
  0x48   : > { %s6999_s30 = sand.u32 1, %s6738_s27   ;;  %s5276_s4 = sshll.u32 %s6742_s28, 8 }
  0x49   : > { %p6993_p5 = por %p8074_p2, %p440_p12  ;;  %s4986_s2 = sshll.u32 %s6999_s30, 6 }
  0x4a   : > { %s8077_s18 = sld [smem:[#allocation59_spill]]  ;;  %s811_s5 = scalar_lea.vmem [#allocation26], %s4986_s2 }
  0x4b   : > { %s8075_s14 = scalar_select %p6993_p5, 1, 0 }
  0x4c   : > { %s818_s6 = sshll.u32 %s811_s5, 4  ;;  %p7010_p8 = pnand %p5713_p13, %p436_p0  ;;  %s7008_s6 = int_to_ptr.vmem [resolvable:$true] %s818_s6 }
  0x4d   : > { %8076 = sst [smem:[#allocation46_spill]] %s8075_s14  ;;  %s7014_s27 = scalar_lea.sflag [#allocation5], %s807_s23 }
  0x4e   : > { %s8078_s22 = scalar_select %p7010_p8, 1, 0 }
  0x4f   : > { %p7020_p11 = pneg %p7010_p8 }
  0x50   : > { %s7006_s7 = scalar_lea.hbm %s8077_s18, %s5276_s4  ;;  %s6255_s4 = scalar_lea.hbm %s8077_s18, 4096 }
  0x51   : > { %s6250_s1 = scalar_lea.hbm %s7006_s7, 1024  ;;  %p6256_p10 = scmp.lt.s32.totalorder %s7006_s7, %s8077_s18 }
  0x52   : > { %p6251_p9 = scmp.ne.s32.totalorder %s7006_s7, %s6250_s1  ;;  %p6257_p12 = scmp.lt.s32.totalorder %s6255_s4, %s6250_s1 }
  0x54   : > { %p6253_p1 = pnand %p7020_p11, %p6251_p9  ;;  %p6258_p13 = por %p6257_p12, %p6256_p10 }
  0x56   : > { %p6254_p3 = pneg %p6253_p1 }
  0x58   : > { %p6259_p0 = pnand %p6258_p13, %p6254_p3 }
  0x5a   : > { %6262 = shalt.err (!%p6259_p0)
}
  0x5b   : > { %s6263_s23 = scalar_lea.vmem %s7008_s6, 1024  ;;  %s6750_s26 = smov [#allocation26]  }
  0x5c   : > { %p6264_p2 = scmp.ne.s32.totalorder %s7008_s6, %s6263_s23  ;;  %s6268_s24 = sshll.u32 %s6750_s26, 4  ;;  %s6269_s24 = int_to_ptr.vmem [resolvable:$false] %s6268_s24 }
  0x5d   : > { %s6270_s2 = scalar_lea.vmem %s6269_s24, 2048  ;;  %p6271_p5 = scmp.lt.s32.totalorder %s7008_s6, %s6269_s24 }
  0x5e   : > { %p6266_p9 = pnand %p6264_p2, %p7020_p11  ;;  %p6272_p4 = scmp.lt.s32.totalorder %s6270_s2, %s6263_s23 }
  0x60   : > { %p6267_p1 = pneg %p6266_p9  ;;  %p6273_p6 = por %p6272_p4, %p6271_p5 }
  0x62   : > { %p6274_p7 = pnand %p6273_p6, %p6267_p1 }
  0x64   : > { %6277 = shalt.err (!%p6274_p7)
}
  0x65   : > { %s6751_s14 = smov 1024   ;;  %s8032_s1 = smov 256  }
  0x66   : > { %s8080_s4 = smov 16   ;;  %s6753_s5 = smov [#allocation8]  }
  0x67   : > { %5691 = dma.hbm_to_vmem [thread:$0]  (!%p7010_p8), %s7006_s7, 1024, %s7008_s6, %s7014_s27, %s6751_s14, %s8032_s1, %s8080_s4  }
  0x68   : > { %s634_s26 = sshll.u32 %s6753_s5, 4  ;;  %s6754_s18 = smov [#allocation9]   ;;  %s635_s26 = int_to_ptr.vmem [resolvable:$true] %s634_s26 }
  0x69   : > { %s647_s24 = sshll.u32 %s6754_s18, 4  ;;  %s6289_s23 = scalar_lea.vmem %s635_s26, 32  ;;  %s648_s24 = int_to_ptr.vmem [resolvable:$true] %s647_s24 }
  0x6a   : > { %p6290_p4 = scmp.ne.s32.totalorder %s635_s26, %s6289_s23  ;;  %p8081_p6 = scmp.ne.s32.totalorder %s8069_s25, 0 }
  0x6b   : > { %p6297_p3 = scmp.lt.s32.totalorder %s635_s26, %s635_s26  ;;  %p6298_p10 = scmp.lt.s32.totalorder %s6289_s23, %s6289_s23 }
  0x6c   : > { %p6292_p7 = pnand %p6290_p4, %p8081_p6 }
  0x6d   : > { %p6299_p12 = por %p6298_p10, %p6297_p3 }
  0x6e   : > { %p6293_p5 = pneg %p6292_p7 }
  0x70   : > { %p6300_p13 = pnand %p6299_p12, %p6293_p5 }
  0x72   : > { %6303 = shalt.err (!%p6300_p13)
}
  0x73   : > { %p8082_p0 = scmp.ne.s32.totalorder %s8068_s3, 0  ;;  %s8083_s2 = smov 1  }
  0x74   : > { %s8084_s14 = sld [smem:[#allocation52_spill]]  ;;  %s6315_s18 = scalar_lea.vmem %s648_s24, 512 }
  0x75   : > { %p6316_p2 = scmp.ne.s32.totalorder %s648_s24, %s6315_s18  ;;  %p6323_p4 = scmp.lt.s32.totalorder %s648_s24, %s648_s24 }
  0x76   : > { %p6324_p7 = scmp.lt.s32.totalorder %s6315_s18, %s6315_s18 }
  0x77   : > { %p6318_p9 = pnand %p6316_p2, %p8081_p6 }
  0x78   : > { %p6325_p5 = por %p6324_p7, %p6323_p4 }
  0x79   : > { %p6319_p1 = pneg %p6318_p9 }
  0x7a   : > { %5651 = dma.hbm_to_vmem [thread:$0]  (!%p8082_p0), %s8084_s14, 32, %s635_s26, [#allocation7], %s8080_s4, %s8080_s4, %s8083_s2  }
  0x7b   : > { %p6326_p3 = pnand %p6325_p5, %p6319_p1 }
  0x7d   : > { %6329 = shalt.err (!%p6326_p3)
}
  0x7e   : > { %s6755_s5 = smov 64   ;;  %s6756_s23 = smov 4  }
  0x7f   : > { %s8085_s6 = sld [smem:[#allocation53_spill]]  ;;  %s6757_s14 = smov [#allocation12]  }
  0x80   : > { %s673_s1 = sshll.u32 %s6757_s14, 4  ;;  %s6758_s29 = smov [#allocation15]   ;;  %s674_s1 = int_to_ptr.vmem [resolvable:$true] %s673_s1 }
  0x81   : > { %s699_s18 = sshll.u32 %s6758_s29, 4  ;;  %s6341_s0 = scalar_lea.vmem %s674_s1, 512  ;;  %s700_s18 = int_to_ptr.vmem [resolvable:$true] %s699_s18 }
  0x82   : > { %p6342_p10 = scmp.ne.s32.totalorder %s674_s1, %s6341_s0  ;;  %p6349_p2 = scmp.lt.s32.totalorder %s674_s1, %s674_s1 }
  0x83   : > { %p6350_p9 = scmp.lt.s32.totalorder %s6341_s0, %s6341_s0 }
  0x84   : > { %p6344_p12 = pnand %p6342_p10, %p8081_p6 }
  0x85   : > { %5654 = dma.hbm_to_vmem [thread:$0]  (!%p8082_p0), %s8085_s6, 512, %s648_s24, [#allocation10], %s6755_s5, %s6755_s5, %s6756_s23  }
  0x86   : > { %p6345_p13 = pneg %p6344_p12  ;;  %p6351_p1 = por %p6350_p9, %p6349_p2 }
  0x88   : > { %p6352_p4 = pnand %p6351_p1, %p6345_p13 }
  0x8a   : > { %6355 = shalt.err (!%p6352_p4)
}
  0x8b   : > { %s8086_s7 = sld [smem:[#allocation55_spill]]  ;;  %s6367_s29 = scalar_lea.vmem %s700_s18, 32 }
  0x8c   : > { %p6368_p7 = scmp.ne.s32.totalorder %s700_s18, %s6367_s29  ;;  %p6375_p10 = scmp.lt.s32.totalorder %s700_s18, %s700_s18 }
  0x8d   : > { %p6376_p12 = scmp.lt.s32.totalorder %s6367_s29, %s6367_s29 }
  0x8e   : > { %p6370_p5 = pnand %p6368_p7, %p8081_p6 }
  0x8f   : > { %p6377_p13 = por %p6376_p12, %p6375_p10 }
  0x90   : > { %p6371_p3 = pneg %p6370_p5 }
  0x91   : > { %5660 = dma.hbm_to_vmem [thread:$0]  (!%p8082_p0), %s8086_s7, 512, %s674_s1, [#allocation13], %s6755_s5, %s6755_s5, %s6756_s23  }
  0x92   : > { %p6378_p2 = pnand %p6377_p13, %p6371_p3 }
  0x94   : > { %6381 = shalt.err (!%p6378_p2)
}
  0x95   : > { %s8087_s10 = sld [smem:[#allocation56_spill]]  ;;  %s6759_s1 = smov [#allocation18]  }
  0x96   : > { %s725_s14 = sshll.u32 %s6759_s1, 4  ;;  %s6760_s24 = smov [#allocation21]   ;;  %s726_s14 = int_to_ptr.vmem [resolvable:$true] %s725_s14 }
  0x97   : > { %s754_s26 = sshll.u32 %s6760_s24, 4  ;;  %s6393_s7 = scalar_lea.vmem %s726_s14, 512  ;;  %s755_s26 = int_to_ptr.vmem [resolvable:$true] %s754_s26 }
  0x98   : > { %p6394_p9 = scmp.ne.s32.totalorder %s726_s14, %s6393_s7  ;;  %p6401_p7 = scmp.lt.s32.totalorder %s726_s14, %s726_s14 }
  0x99   : > { %p6402_p5 = scmp.lt.s32.totalorder %s6393_s7, %s6393_s7 }
  0x9a   : > { %p6396_p1 = pnand %p6394_p9, %p8081_p6 }
  0x9b   : > { %5666 = dma.hbm_to_vmem [thread:$0]  (!%p8082_p0), %s8087_s10, 32, %s700_s18, [#allocation16], %s8080_s4, %s8080_s4, %s8083_s2  }
  0x9c   : > { %p6397_p4 = pneg %p6396_p1  ;;  %p6403_p3 = por %p6402_p5, %p6401_p7 }
  0x9e   : > { %p6404_p10 = pnand %p6403_p3, %p6397_p4 }
  0xa0   : > { %6407 = shalt.err (!%p6404_p10)
}
  0xa1   : > { %s8088_s12 = sld [smem:[#allocation57_spill]]  ;;  %s4989_s0 = sshll.u32 %s6999_s30, 2 }
  0xa2   : > { %s6419_s6 = scalar_lea.vmem %s755_s26, 32  ;;  %p6427_p9 = scmp.lt.s32.totalorder %s755_s26, %s755_s26 }
  0xa3   : > { %p6420_p12 = scmp.ne.s32.totalorder %s755_s26, %s6419_s6  ;;  %p6428_p1 = scmp.lt.s32.totalorder %s6419_s6, %s6419_s6 }
  0xa5   : > { %p6422_p13 = pnand %p6420_p12, %p8081_p6  ;;  %p6429_p4 = por %p6428_p1, %p6427_p9 }
  0xa7   : > { %5672 = dma.hbm_to_vmem [thread:$0]  (!%p8082_p0), %s8088_s12, 512, %s726_s14, [#allocation19], %s6755_s5, %s6755_s5, %s6756_s23  }
  0xa8   : > { %p6423_p2 = pneg %p6422_p13 }
  0xaa   : > { %p6430_p7 = pnand %p6429_p4, %p6423_p2 }
  0xac   : > { %6433 = shalt.err (!%p6430_p7)
}
  0xad   : > { %5678 = dma.hbm_to_vmem [thread:$0]  (!%p8082_p0), %s8000_s15, 32, %s755_s26, [#allocation22], %s8080_s4, %s8080_s4, %s8083_s2  }
  0xae   : > { %s5277_s5 = sshll.u32 %s6742_s28, 6  ;;  %s832_s18 = scalar_lea.vmem [#allocation27], %s4989_s0 }
  0xaf   : > { %s838_s7 = scalar_lea.hbm %s8004_s19, %s5277_s5  ;;  %s840_s29 = sshll.u32 %s832_s18, 4  ;;  %s841_s29 = int_to_ptr.vmem [resolvable:$true] %s840_s29 }
  0xb0   : > { %s6434_s6 = scalar_lea.hbm %s838_s7, 64  ;;  %s6439_s1 = scalar_lea.hbm %s8004_s19, 256 }
  0xb1   : > { %p6435_p5 = scmp.ne.s32.totalorder %s838_s7, %s6434_s6  ;;  %p6440_p12 = scmp.lt.s32.totalorder %s838_s7, %s8004_s19 }
  0xb2   : > { %p6441_p13 = scmp.lt.s32.totalorder %s6439_s1, %s6434_s6 }
  0xb3   : > { %p6437_p3 = pnand %p6435_p5, %p7020_p11 }
  0xb4   : > { %p6442_p2 = por %p6441_p13, %p6440_p12 }
  0xb5   : > { %p6438_p10 = pneg %p6437_p3 }
  0xb7   : > { %p6443_p9 = pnand %p6442_p2, %p6438_p10 }
  0xb9   : > { %6446 = shalt.err (!%p6443_p9)
}
  0xba   : > { %s6447_s26 = scalar_lea.vmem %s841_s29, 64  ;;  %s6761_s0 = smov [#allocation27]  }
  0xbb   : > { %p6448_p1 = scmp.ne.s32.totalorder %s841_s29, %s6447_s26  ;;  %s6452_s5 = sshll.u32 %s6761_s0, 4  ;;  %s6453_s5 = int_to_ptr.vmem [resolvable:$false] %s6452_s5 }
  0xbc   : > { %s6454_s23 = scalar_lea.vmem %s6453_s5, 128  ;;  %p6455_p5 = scmp.lt.s32.totalorder %s841_s29, %s6453_s5 }
  0xbd   : > { %p6450_p4 = pnand %p6448_p1, %p7020_p11  ;;  %p6456_p3 = scmp.lt.s32.totalorder %s6454_s23, %s6447_s26 }
  0xbf   : > { %p6451_p7 = pneg %p6450_p4  ;;  %p6457_p0 = por %p6456_p3, %p6455_p5 }
  0xc1   : > { %p6458_p6 = pnand %p6457_p0, %p6451_p7 }
  0xc3   : > { %6461 = shalt.err (!%p6458_p6)
}
  0xc4   : > { %5694 = dma.hbm_to_vmem [thread:$0]  (!%p7010_p8), %s838_s7, 64, %s841_s29, %s7014_s27  }
  0xc5   : > { %s6762_s10 = smov [#allocation11]   ;;  %s6763_s20 = smov [#allocation14]  }
  0xc6   : > { %s660_s12 = sshll.u32 %s6762_s10, 4  ;;  %s686_s14 = sshll.u32 %s6763_s20, 4  ;;  %s661_s12 = int_to_ptr.vmem [resolvable:$true] %s660_s12  ;;  %s687_s14 = int_to_ptr.vmem [resolvable:$true] %s686_s14 }
  0xc7   : > { %s6473_s18 = scalar_lea.vmem %s661_s12, 32  ;;  %p8089_p12 = scmp.ne.s32.totalorder %s8069_s25, 0 }
  0xc8   : > { %p6474_p10 = scmp.ne.s32.totalorder %s661_s12, %s6473_s18  ;;  %p6481_p9 = scmp.lt.s32.totalorder %s661_s12, %s661_s12 }
  0xc9   : > { %p6482_p1 = scmp.lt.s32.totalorder %s6473_s18, %s6473_s18 }
  0xca   : > { %p6476_p13 = pnand %p6474_p10, %p8089_p12 }
  0xcb   : > { %p6483_p4 = por %p6482_p1, %p6481_p9 }
  0xcc   : > { %p6477_p2 = pneg %p6476_p13 }
  0xce   : > { %p6484_p0 = pnand %p6483_p4, %p6477_p2 }
  0xd0   : > { %6487 = shalt.err (!%p6484_p0)
}
  0xd1   : > { %p8090_p6 = scmp.ne.s32.totalorder %s8068_s3, 0  ;;  %s8091_s6 = sld [smem:[#allocation54_spill]] }
  0xd2   : > { %s6499_s1 = scalar_lea.vmem %s687_s14, 32  ;;  %p6507_p10 = scmp.lt.s32.totalorder %s687_s14, %s687_s14 }
  0xd3   : > { %p6500_p7 = scmp.ne.s32.totalorder %s687_s14, %s6499_s1  ;;  %p6508_p13 = scmp.lt.s32.totalorder %s6499_s1, %s6499_s1 }
  0xd5   : > { %p6502_p5 = pnand %p6500_p7, %p8089_p12  ;;  %p6509_p2 = por %p6508_p13, %p6507_p10 }
  0xd7   : > { %5657 = dma.hbm_to_vmem [thread:$0]  (!%p8090_p6), %s8091_s6, 32, %s661_s12, [#allocation10], %s8080_s4, %s8080_s4, %s8083_s2  }
  0xd8   : > { %p6503_p3 = pneg %p6502_p5 }
  0xda   : > { %p6510_p9 = pnand %p6509_p2, %p6503_p3 }
  0xdc   : > { %6513 = shalt.err (!%p6510_p9)
}
  0xdd   : > { %5663 = dma.hbm_to_vmem [thread:$0]  (!%p8090_p6), %s7994_s9, 32, %s687_s14, [#allocation13], %s8080_s4, %s8080_s4, %s8083_s2  }
  0xde   : > { %s6764_s0 = smov [#allocation17]   ;;  %s6765_s23 = smov [#allocation20]  }
  0xdf   : > { %s712_s5 = sshll.u32 %s6764_s0, 4  ;;  %s738_s10 = sshll.u32 %s6765_s23, 4  ;;  %s713_s5 = int_to_ptr.vmem [resolvable:$true] %s712_s5  ;;  %s739_s10 = int_to_ptr.vmem [resolvable:$true] %s738_s10 }
  0xe0   : > { %s6525_s12 = scalar_lea.vmem %s713_s5, 32  ;;  %p6533_p7 = scmp.lt.s32.totalorder %s713_s5, %s713_s5 }
  0xe1   : > { %p6526_p1 = scmp.ne.s32.totalorder %s713_s5, %s6525_s12  ;;  %p6534_p5 = scmp.lt.s32.totalorder %s6525_s12, %s6525_s12 }
  0xe3   : > { %p6528_p4 = pnand %p6526_p1, %p8089_p12  ;;  %p6535_p3 = por %p6534_p5, %p6533_p7 }
  0xe5   : > { %p6529_p0 = pneg %p6528_p4 }
  0xe7   : > { %p6536_p10 = pnand %p6535_p3, %p6529_p0 }
  0xe9   : > { %6539 = shalt.err (!%p6536_p10)
}
  0xea   : > { %5669 = dma.hbm_to_vmem [thread:$0]  (!%p8090_p6), %s7996_s11, 32, %s713_s5, [#allocation16], %s8080_s4, %s8080_s4, %s8083_s2  }
  0xeb   : > { %s6551_s18 = scalar_lea.vmem %s739_s10, 32  ;;  %p6559_p1 = scmp.lt.s32.totalorder %s739_s10, %s739_s10 }
  0xec   : > { %p6552_p13 = scmp.ne.s32.totalorder %s739_s10, %s6551_s18  ;;  %p6560_p4 = scmp.lt.s32.totalorder %s6551_s18, %s6551_s18 }
  0xee   : > { %p6554_p2 = pnand %p6552_p13, %p8089_p12  ;;  %p6561_p0 = por %p6560_p4, %p6559_p1 }
  0xf0   : > { %p6555_p9 = pneg %p6554_p2 }
  0xf2   : > { %p6562_p7 = pnand %p6561_p0, %p6555_p9 }
  0xf4   : > { %6565 = shalt.err (!%p6562_p7)
}
  0xf5   : > { %5675 = dma.hbm_to_vmem [thread:$0]  (!%p8090_p6), %s7998_s13, 32, %s739_s10, [#allocation19], %s8080_s4, %s8080_s4, %s8083_s2  }
  0xf6   : > { %s6766_s6 = smov [#allocation23]   ;;  %s6767_s24 = smov [#allocation24]  }
  0xf7   : > { %s768_s1 = sshll.u32 %s6766_s6, 4  ;;  %s779_s26 = sshll.u32 %s6767_s24, 4  ;;  %s769_s1 = int_to_ptr.vmem [resolvable:$true] %s768_s1  ;;  %s780_s26 = int_to_ptr.vmem [resolvable:$true] %s779_s26 }
  0xf8   : > { %s6577_s0 = scalar_lea.vmem %s769_s1, 16  ;;  %s6584_s5 = scalar_lea.vmem %s769_s1, 32 }
  0xf9   : > { %p6578_p5 = scmp.ne.s32.totalorder %s769_s1, %s6577_s0  ;;  %p6585_p13 = scmp.lt.s32.totalorder %s769_s1, %s769_s1 }
  0xfa   : > { %p6586_p2 = scmp.lt.s32.totalorder %s6584_s5, %s6577_s0 }
  0xfb   : > { %p6580_p3 = pnand %p6578_p5, %p8089_p12 }
  0xfc   : > { %p6587_p9 = por %p6586_p2, %p6585_p13 }
  0xfd   : > { %p6581_p10 = pneg %p6580_p3 }
  0xff   : > { %p6588_p1 = pnand %p6587_p9, %p6581_p10 }
 0x101   : > { %6591 = shalt.err (!%p6588_p1)
}
 0x102   : > { %5681 = dma.hbm_to_vmem [thread:$0]  (!%p8090_p6), %s8001_s16, 16, %s769_s1, [#allocation22]  }
 0x103   : > { %s6603_s10 = scalar_lea.vmem %s780_s26, 16  ;;  %s6610_s12 = scalar_lea.vmem %s780_s26, 32 }
 0x104   : > { %p6604_p4 = scmp.ne.s32.totalorder %s780_s26, %s6603_s10  ;;  %p6611_p5 = scmp.lt.s32.totalorder %s780_s26, %s780_s26 }
 0x105   : > { %p6612_p3 = scmp.lt.s32.totalorder %s6610_s12, %s6603_s10 }
 0x106   : > { %p6606_p0 = pnand %p6604_p4, %p8089_p12 }
 0x107   : > { %p6613_p8 = por %p6612_p3, %p6611_p5 }
 0x108   : > { %p6607_p7 = pneg %p6606_p0 }
 0x10a   : > { %p6614_p13 = pnand %p6613_p8, %p6607_p7 }
 0x10c   : > { %6617 = shalt.err (!%p6614_p13)
}
 0x10d   : > { %5684 = dma.hbm_to_vmem [thread:$0]  (!%p8090_p6), %s8002_s17, 16, %s780_s26, [#allocation25]  }
 0x10e   : > { %s6768_s18 = smov [#allocation29]   ;;  %s4992_s29 = sshll.u32 %s6999_s30, 10 }
 0x10f   : > { %s790_s7 = sshll.u32 %s6768_s18, 4  ;;  %s791_s7 = int_to_ptr.vmem [resolvable:$true] %s790_s7 }
 0x110   : > { %s6629_s6 = scalar_lea.vmem %s791_s7, 64  ;;  %p6637_p1 = scmp.lt.s32.totalorder %s791_s7, %s791_s7 }
 0x111   : > { %p6630_p10 = scmp.ne.s32.totalorder %s791_s7, %s6629_s6  ;;  %p6638_p8 = scmp.lt.s32.totalorder %s6629_s6, %s6629_s6 }
 0x113   : > { %p6632_p2 = pnand %p6630_p10, %p8089_p12  ;;  %p6639_p4 = por %p6638_p8, %p6637_p1 }
 0x115   : > { %p6633_p9 = pneg %p6632_p2 }
 0x117   : > { %p6640_p0 = pnand %p6639_p4, %p6633_p9 }
 0x119   : > { %6643 = shalt.err (!%p6640_p0)
}
 0x11a   : > { %5687 = dma.hbm_to_vmem [thread:$0]  (!%p8090_p6), %s8006_s21, 64, %s791_s7, [#allocation7]  }
 0x11b   : > { %s5279_s30 = sshll.u32 %s6742_s28, 14  ;;  %s851_s26 = scalar_lea.vmem [#allocation28], %s4992_s29 }
 0x11c   : > { %s859_s0 = sshll.u32 %s851_s26, 4  ;;  %s8092_s23 = sld [smem:[#allocation60_spill]]  ;;  %s860_s0 = int_to_ptr.vmem [resolvable:$true] %s859_s0 }
 0x122   : > { %s7189_s2 = scalar_lea.hbm %s8092_s23, %s5279_s30  ;;  %s6649_s28 = scalar_lea.hbm %s8092_s23, 65536 }
 0x123   : > { %s6644_s10 = scalar_lea.hbm %s7189_s2, 16384  ;;  %p6650_p6 = scmp.lt.s32.totalorder %s7189_s2, %s8092_s23 }
 0x124   : > { %p6645_p12 = scmp.ne.s32.totalorder %s7189_s2, %s6644_s10  ;;  %p6651_p3 = scmp.lt.s32.totalorder %s6649_s28, %s6644_s10 }
 0x126   : > { %p6647_p7 = pnand %p6645_p12, %p7020_p11  ;;  %p6652_p13 = por %p6651_p3, %p6650_p6 }
 0x128   : > { %p6648_p5 = pneg %p6647_p7 }
 0x12a   : > { %p6653_p10 = pnand %p6652_p13, %p6648_p5 }
 0x12c   : > { %6656 = shalt.err (!%p6653_p10)
}
 0x12d   : > { %s6657_s18 = scalar_lea.vmem %s860_s0, 16384  ;;  %s6769_s7 = smov [#allocation28]  }
 0x12e   : > { %p6658_p2 = scmp.ne.s32.totalorder %s860_s0, %s6657_s18  ;;  %s6662_s29 = sshll.u32 %s6769_s7, 4  ;;  %s6663_s29 = int_to_ptr.vmem [resolvable:$false] %s6662_s29 }
 0x12f   : > { %s6664_s6 = scalar_lea.vmem %s6663_s29, 32768  ;;  %p6665_p8 = scmp.lt.s32.totalorder %s860_s0, %s6663_s29 }
 0x130   : > { %p6660_p9 = pnand %p6658_p2, %p7020_p11  ;;  %p6666_p4 = scmp.lt.s32.totalorder %s6664_s6, %s6657_s18 }
 0x132   : > { %p6661_p1 = pneg %p6660_p9  ;;  %p6667_p0 = por %p6666_p4, %p6665_p8 }
 0x134   : > { %p6668_p12 = pnand %p6667_p0, %p6661_p1 }
 0x136   : > { %6671 = shalt.err (!%p6668_p12)
}
 0x137   : > { %p8093_p7 = scmp.ne.s32.totalorder %s8078_s22, 0  ;;  %s8094_s1 = smov 256  }
 0x138   : > { %s8095_s8 = sld [smem:[#allocation43_spill]] }
 0x139   : > { %5697 = dma.hbm_to_vmem [thread:$0]  (!%p8093_p7), %s7189_s2, 16384, %s860_s0, %s7014_s27, %s8094_s1, %s8094_s1, %s8080_s4  }
 0x13e   : > { %p8096_p11 = scmp.ne.s32.totalorder %s8095_s8, 0 }
 0x13f   : > { %s8097_s24 = sld [smem:[#allocation42_spill]] (!%p8096_p11) }
 0x140   : > { %871 = sbr.rel (%p8096_p11) target bundleno = 8661 (0x21d5), region = 116 }
 0x145   : > { %p8098_p5 = scmp.eq.s32.totalorder %s8097_s24, 0 }
 0x147   : > { %6689 = dma.done.wait (%p8098_p5), [#allocation5], 3072   ;;  %p8099_p6 = pmov %p8098_p5 }
 0x148   : > { %p8100_p3 = pmov %p8098_p5 }
 0x149   : > { %6691 = vsyncadd (%p8099_p6), [#allocation5], 4294964224 }
 0x14a   : > { %6693 = dma.done.wait (%p8100_p3), [#allocation7], 64   ;;  %p8101_p13 = pmov %p8100_p3 }
 0x14b   : > { %p8102_p10 = pmov %p8100_p3 }
 0x14c   : > { %6695 = vsyncadd (%p8101_p13), [#allocation7], 4294967232 }
 0x14d   : > { %6697 = dma.done.wait (%p8102_p10), [#allocation10], 544   ;;  %p8103_p2 = pmov %p8100_p3 }
 0x14f   : > { %6699 = vsyncadd (%p8103_p2), [#allocation10], 4294966752  ;;  %p8104_p9 = pmov %p8103_p2 }
 0x150   : > { %p8105_p1 = pmov %p8103_p2 }
 0x151   : > { %6701 = dma.done.wait (%p8104_p9), [#allocation13], 544  }
 0x152   : > { %6703 = vsyncadd (%p8105_p1), [#allocation13], 4294966752  ;;  %p8106_p8 = pmov %p8105_p1 }
 0x153   : > { %p8107_p4 = pmov %p8105_p1 }
 0x154   : > { %6705 = dma.done.wait (%p8106_p8), [#allocation16], 64  }
 0x155   : > { %6707 = vsyncadd (%p8107_p4), [#allocation16], 4294967232  ;;  %p8108_p0 = pmov %p8105_p1 }
 0x157   : > { %6709 = dma.done.wait (%p8108_p0), [#allocation19], 544   ;;  %p8109_p12 = pmov %p8108_p0 }
 0x158   : > { %p8110_p7 = pmov %p8108_p0 }
 0x159   : > { %6711 = vsyncadd (%p8109_p12), [#allocation19], 4294966752 }
 0x15a   : > { %6713 = dma.done.wait (%p8110_p7), [#allocation22], 48   ;;  %p8111_p11 = pmov %p8108_p0 }
 0x15b   : > { %p8112_p5 = pmov %p8108_p0 }
 0x15c   : > { %6715 = vsyncadd (%p8111_p11), [#allocation22], 4294967248 }
 0x15d   : > { %6717 = dma.done.wait (%p8112_p5), [#allocation25], 16   ;;  %p8113_p6 = pmov %p8108_p0 }
 0x15e   : > { %s8114_s22 = sld [smem:[#allocation40_spill]]  ;;  %s929_s4 = sand.u32 1, %s8097_s24  }
 0x15f   : > { %6719 = vsyncadd (%p8113_p6), [#allocation25], 4294967280  ;;  %s8115_s27 = sld [smem:[#allocation46_spill]]  ;;  %s930_s0 = scalar_lea.sflag [#allocation5], %s929_s4 }
 0x164   : > { %s931_s30 = sand.u32 1, %s8114_s22  }
 0x165   : > { %s5011_s26 = sshll.u32 %s931_s30, 6  ;;  %p8116_p3 = scmp.ne.s32.totalorder %s8115_s27, 0 }
 0x166   : > { %s7247_s5 = scalar_lea.vmem [#allocation26], %s5011_s26 }
 0x167   : > { %6721 = dma.done.wait (%p8116_p3), %s930_s0, 17472  }
 0x168   : > { %6723 = vsyncadd (%p8116_p3), %s930_s0, 4294949824  ;;  %s5012_s25 = sshll.u32 %s931_s30, 2  ;;  %s5013_s2 = sshll.u32 %s931_s30, 10 }
 0x169   : > { %s7253_s10 = scalar_lea.vmem [#allocation27], %s5012_s25  ;;  %s7255_s3 = scalar_lea.vmem [#allocation28], %s5013_s2 }
 0x16a   : > { %p8117_p13 = pmov %p8108_p0 }
 0x16b   : > { %p8118_p10 = pmov %p8108_p0 }
 0x16c   : > { %6725 = dma.done.wait (%p8117_p13), [#allocation7], 64  }
 0x16d   : > { %6727 = vsyncadd (%p8118_p10), [#allocation7], 4294967232  ;;  %p8119_p2 = scmp.ne.s32.totalorder %s8097_s24, 0 }
 0x16e   : > { %s8120_s20 = sld [smem:[#allocation47_spill]] (!%p8119_p2)  ;;  %s6772_s30 = smov (!%p8119_p2), 96  }
 0x16f   : > { %1032 = sbr.rel (%p8119_p2) target bundleno = 7943 (0x1f07), region = 192  ;;  %s8121_s22 = sld [smem:[#allocation49_spill]] (!%p8119_p2) }
 0x170   : > { %s6773_s26 = smov (!%p8119_p2), 88   ;;  %s6774_s0 = smov (!%p8119_p2), 120  }
 0x171   : > { %s8122_s12 = sld [smem:[#allocation50_spill]] (!%p8119_p2)  ;;  %s6775_s18 = smov (!%p8119_p2), 64  }
 0x172   : > { %s6776_s7 = smov (!%p8119_p2), 80   ;;  %s6777_s29 = smov (!%p8119_p2), 112  }
 0x173   : > { %s8044_s6 = smov (!%p8119_p2), 56   ;;  %s8045_s1 = smov (!%p8119_p2), 48  }
 0x174   : > { %v1052_v0 = vld [vmem:[#allocation4 + $0x78] sm:$0xff]  ;;  %v6770_v1 = vmov 0.0   ;;  %v1051_v2 = vld [vmem:[#allocation4 + $0x70] sm:$0xff]  ;;  %v1050_v3 = vld [vmem:[#allocation4 + $0x68] sm:$0xff]  ;;  %vm1063_vm0 = vcmask 523264   ;;  %vm1149_vm1 = vcmask 261120  }
 0x175   : > { %1070 = vmatprep.subr.mxu0 %v6770_v1  ;;  %3210 = vst [vmem:[#allocation3] sm:$0xff] %v6770_v1  ;;  %5392 = vmatprep.subr.bf16.mxu1 %v6770_v1  ;;  %v1049_v4 = vld [vmem:[#allocation4 + $0x60] sm:$0xff]  ;;  %v1048_v5 = vld [vmem:[#allocation4 + $0x58] sm:$0xff]  ;;  %v1047_v7 = vld [vmem:[#allocation4 + $0x50] sm:$0xff]  ;;  %vm1153_vm2 = vcmask 254976   ;;  %vm6771_vm3 = vmmov 0  }
 0x176   : > { %1071 = vmatpush1.msra.mxu0 %v1052_v0  ;;  %v1034_v6 = vld [vmem:[%s8120_s20 + $0x8] sm:$0xff]  ;;  %v1046_v8 = vld [vmem:[#allocation4 + $0x48] sm:$0xff]  ;;  %v1043_v11 = vld [vmem:[#allocation4 + $0x30] sm:$0xff]  ;;  %5396 = vmatprep.mubr.msk.bf16.mxu1 %vm6771_vm3, %v6770_v1  ;;  %vm1266_vm4 = vcmask 64512   ;;  %vm1318_vm5 = vcmask 80896   ;;  %vm1322_vm6 = vcmask 74752  }
 0x177   : > { %1072 = vmatprep.subr.mxu0 %v6770_v1  ;;  %5016 = vmatprep.mubr.msk.f32.mxu0 %vm1063_vm0, %v1034_v6  ;;  %v1045_v9 = vld [vmem:[#allocation4 + $0x40] sm:$0xff]  ;;  %v1044_v10 = vld [vmem:[#allocation4 + $0x38] sm:$0xff]  ;;  %v1042_v12 = vld [vmem:[#allocation4 + $0x28] sm:$0xff]  ;;  %vm1348_vm7 = vcmask 1044480   ;;  %s6780_s8 = smov 104   ;;  %s6781_s24 = smov 72  }
 0x178   : > { %1073 = vmatpush1.msra.mxu0 %v1051_v2  ;;  %v1041_v13 = vld [vmem:[#allocation4 + $0x20] sm:$0xff]  ;;  %v1040_v14 = vld [vmem:[#allocation4 + $0x18] sm:$0xff]  ;;  %v1039_v15 = vld [vmem:[#allocation4 + $0x10] sm:$0xff]  ;;  %s8042_s27 = smov 8   ;;  %s8043_s4 = smov 40   ;;  %vm1800_vm8 = vcmask 130048  }
 0x179   : > { %1074 = vmatprep.subr.mxu0 %v6770_v1  ;;  %v1038_v16 = vld [vmem:[#allocation4 + $0x8] sm:$0xff]  ;;  %v1037_v17 = vld [vmem:[#allocation4] sm:$0xff]  ;;  %v1060_v18 = vld [vmem:[#allocation4 + $0xb8] sm:$0xff]  ;;  %s8041_s25 = smov 16   ;;  %s8040_s2 = smov 24   ;;  %vm1803_vm9 = vcmask 195584  }
 0x17a   : > { %1075 = vmatpush1.msra.mxu0 %v1050_v3  ;;  %v1059_v19 = vld [vmem:[#allocation4 + $0xb0] sm:$0xff]  ;;  %v1058_v20 = vld [vmem:[#allocation4 + $0xa8] sm:$0xff]  ;;  %v1057_v21 = vld [vmem:[#allocation4 + $0xa0] sm:$0xff]  ;;  %vm3178_vm14 = vcmask 1040384  }
 0x17b   : > { %1076 = vmatprep.subr.mxu0 %v6770_v1  ;;  %v1056_v22 = vld [vmem:[#allocation4 + $0x98] sm:$0xff]  ;;  %v1055_v23 = vld [vmem:[#allocation4 + $0x90] sm:$0xff]  ;;  %v1054_v24 = vld [vmem:[#allocation4 + $0x88] sm:$0xff] }
 0x17c   : > { %1077 = vmatpush1.msra.mxu0 %v1049_v4  ;;  %v1053_v25 = vld [vmem:[#allocation4 + $0x80] sm:$0xff]  ;;  %v1033_v26 = vld [vmem:[%s8120_s20] sm:$0xff]  ;;  %v1036_v27 = vld [vmem:[%s8120_s20 + $0x18] sm:$0x3] }
 0x17d   : > { %1078 = vmatprep.subr.mxu0 %v6770_v1  ;;  %v1035_v28 = vld [vmem:[%s8120_s20 + $0x10] sm:$0x3]  ;;  %v1061_v29 = vld [vmem:[%s8121_s22] sm:$0xff]  ;;  %v1062_v33 = vld [vmem:[%s8121_s22 + $0x8] sm:$0x3] }
 0x17e   : > { %1079 = vmatpush1.msra.mxu0 %v1048_v5  ;;  %v5833_v49 = vld [vmem:[#allocation9 + $0x8] sm:$0xff]   ;;  %v5834_v50 = vld [vmem:[#allocation9] sm:$0xff]   ;;  %v5018_v59 = vld [vmem:[#allocation6] ss:$0 sm:$0xff] }
 0x17f   : > { %1080 = vmatprep.subr.mxu0 %v6770_v1  ;;  %5393 = vmatpush3.bf16.msra.mxu1 %v5833_v49  ;;  %v5019_v63 = vld [vmem:[#allocation8] ss:$0 sm:$0xff]  ;;  %v5020_v6 = vld [vmem:[#allocation11] ss:$0 sm:$0xff] }
 0x180   : > { %1081 = vmatpush1.msra.mxu0 %v1047_v7  ;;  %5394 = vmatprep.subr.bf16.mxu1 %v6770_v1 }
 0x181   : > { %1082 = vmatprep.subr.mxu0 %v6770_v1 }
 0x182   : > { %1083 = vmatpush1.msra.mxu0 %v1046_v8 }
 0x183   : > { %1084 = vmatprep.subr.mxu0 %v6770_v1  ;;  %5395 = vmatpush3.bf16.msra.mxu1 %v5834_v50 }
 0x184   : > { %1085 = vmatpush1.msra.mxu0 %v1045_v9  ;;  %5400 = vmatprep.subr.bf16.mxu1 %v6770_v1 }
 0x185   : > { %1086 = vmatprep.subr.mxu0 %v6770_v1 }
 0x186   : > { %1087 = vmatpush1.msra.mxu0 %v1044_v10 }
 0x187   : > { %1088 = vmatprep.subr.mxu0 %v6770_v1 }
 0x188   : > { %1089 = vmatpush1.msra.mxu0 %v1043_v11 }
 0x189   : > { %1090 = vmatprep.subr.mxu0 %v6770_v1 }
 0x18a   : > { %1091 = vmatpush1.msra.mxu0 %v1042_v12 }
 0x18b   : > { %1092 = vmatprep.subr.mxu0 %v6770_v1 }
 0x18c   : > { %1093 = vmatpush1.msra.mxu0 %v1041_v13 }
 0x18d   : > { %1094 = vmatprep.subr.mxu0 %v6770_v1 }
 0x18e   : > { %1095 = vmatpush1.msra.mxu0 %v1040_v14 }
 0x18f   : > { %1096 = vmatprep.subr.mxu0 %v6770_v1 }
 0x190   : > { %1097 = vmatpush1.msra.mxu0 %v1039_v15 }
 0x191   : > { %1098 = vmatprep.subr.mxu0 %v6770_v1 }
 0x192   : > { %1099 = vmatpush1.msra.mxu0 %v1038_v16  ;;  %v7348_v16 = vld [vmem:[%s8122_s12] sm:$0xff] }
 0x193   : > { %1100 = vmatprep.subr.mxu0 %v6770_v1 }
 0x194   : > { %1101 = vmatpush1.msra.mxu0 %v1037_v17 }
 0x195   : > { %1118 = vmatprep.subr.mxu0 %v6770_v1 }
 0x196   : > { %1119 = vmatpush2.msra.mxu0 %v1060_v18 }
 0x197   : > { %1120 = vmatprep.subr.mxu0 %v6770_v1 }
 0x198   : > { %1121 = vmatpush2.msra.mxu0 %v1059_v19 }
 0x199   : > { %1122 = vmatprep.subr.mxu0 %v6770_v1 }
 0x19a   : > { %1123 = vmatpush2.msra.mxu0 %v1058_v20 }
 0x19b   : > { %1124 = vmatprep.subr.mxu0 %v6770_v1 }
 0x19c   : > { %1125 = vmatpush2.msra.mxu0 %v1057_v21  ;;  %v7354_v21 = vld [vmem:[%s8122_s12 + $0x8] sm:$0x3] }
 0x19d   : > { %1126 = vmatprep.subr.mxu0 %v6770_v1 }
 0x19e   : > { %1127 = vmatpush2.msra.mxu0 %v1056_v22 }
 0x19f   : > { %1128 = vmatprep.subr.mxu0 %v6770_v1 }
 0x1a0   : > { %1129 = vmatpush2.msra.mxu0 %v1055_v23 }
 0x1a1   : > { %1130 = vmatprep.subr.mxu0 %v6770_v1 }
 0x1a2   : > { %1131 = vmatpush2.msra.mxu0 %v1054_v24 }
 0x1a3   : > { %1132 = vmatprep.subr.mxu0 %v6770_v1 }
 0x1a4   : > { %1133 = vmatpush2.msra.mxu0 %v1053_v25 }
 0x1a5   : > { %1135 = vmatmul.mubr.f32.vlgmr.msra.gmra.mxu0 %v1033_v26  ;;  %5456 = vmatprep.subr.bf16.mxu0 %v6770_v1 }
 0x1a6   : > { %5017 = vmatprep.mubr.msk.f32.mxu0 %vm1063_vm0, %v1036_v27 }
 0x1a9   : > { %1140 = vmatmul.mubr.f32.gmra.mxu0 %v1035_v28 }
 0x1aa   : > { %5460 = vmatprep.mubr.msk.bf16.mxu0 %vm6771_vm3, %v6770_v1 }
 0x265   : > { %v1136_v30 = vpop.f32.mrf.mxu0 }
 0x266   : > { %v7307_v31 = vadd.f32 %v1136_v30, %v1061_v29 }
 0x267   : > { %v1138_v32 = vpop.f32.mrf.mxu0 }
 0x268   : > { %v1150_v34 = vsel %vm1149_vm1, %v7307_v31, 0.0 }
 0x269   : > { %v1141_v35 = vpop.f32.mrf.mxu0  ;;  %1151 = vadd.xlane.f32.xlu0 %v1150_v34 }
 0x26a   : > { %v7314_v36 = vadd.f32 %v1141_v35, %v1062_v33 }
 0x26b   : > { %v1143_v37 = vpop.f32.mrf.mxu0 }
 0x26c   : > { %v1154_v38 = vsel %vm1153_vm2, %v7314_v36, 0.0 }
 0x26d   : > { %1155 = vadd.xlane.f32.xlu0 %v1154_v38 }
 0x2f2   : > { %v1152_v39 = vpop.xlane.xlu0 %1151 }
 0x2f3   : > { %v1158_v40 = vmul.f32 0.03125, %v1152_v39 }
 0x2f5   : > { %v1160_v41 = vsub.f32 %v7307_v31, %v1158_v40 }
 0x2f6   : > { %v1156_v42 = vpop.xlane.xlu0 %1155 }
 0x2f7   : > { %v1159_v43 = vmul.f32 0.03125, %v1156_v42  ;;  %v1162_v44 = vmul.f32 %v1160_v41, %v1160_v41 }
 0x2f9   : > { %v1161_v45 = vsub.f32 %v7314_v36, %v1159_v43  ;;  %v1164_v46 = vsel %vm1149_vm1, %v1162_v44, 0.0 }
 0x2fa   : > { %1165 = vadd.xlane.f32.xlu1 %v1164_v46 }
 0x2fb   : > { %v1163_v47 = vmul.f32 %v1161_v45, %v1161_v45 }
 0x2fd   : > { %v1167_v48 = vsel %vm1153_vm2, %v1163_v47, 0.0 }
 0x2fe   : > { %1168 = vadd.xlane.f32.xlu1 %v1167_v48 }
 0x383   : > { %v1166_v51 = vpop.xlane.xlu1 %1165 }
 0x384   : > { %v1170_v52 = vmul.f32 0.03125, %v1166_v51 }
 0x386   : > { %v1172_v53 = vadd.f32 1e-06, %v1170_v52 }
 0x387   : > { %v1169_v54 = vpop.xlane.xlu1 %1168 }
 0x388   : > { %5861 = vrsqrt.f32 %v1172_v53  ;;  %v1171_v55 = vmul.f32 0.03125, %v1169_v54 }
 0x38a   : > { %v1173_v56 = vadd.f32 1e-06, %v1171_v55 }
 0x38c   : > { %5863 = vrsqrt.f32 %v1173_v56 }
 0x395   : > { %v5862_v57 = vpop.eup %5861 }
 0x396   : > { %v1176_v58 = vmul.f32 %v5862_v57, %v1160_v41 }
 0x398   : > { %v1184_v62 = vmul.f32 %v5018_v59, %v1176_v58 }
 0x399   : > { %v5864_v60 = vpop.eup %5863 }
 0x39a   : > { %v1177_v61 = vmul.f32 %v5864_v60, %v1161_v45  ;;  %v1192_v2 = vadd.f32 %v5019_v63, %v1184_v62 }
 0x39c   : > { %v1185_v0 = vmul.f32 %v5018_v59, %v1177_v61 }
 0x39e   : > { %v1193_v3 = vadd.f32 %v5019_v63, %v1185_v0 }
 0x3a0   : > { %v1194_v4 = vpack.c.bf16 %v1193_v3, %v1192_v2 }
 0x3a2   : > { %5397 = vmatmul.mubr.msk.bf16.vlgmr.msra.gmra.mxu1 %vm1149_vm1, %v1194_v4 }
 0x3a3   : > { %5402 = vmatprep.mubr.msk.bf16.mxu1 %vm6771_vm3, %v6770_v1 }
 0x462   : > { %v1255_v5 = vpop.f32.mrf.mxu1 }
 0x463   : > { %v1256_v9 = vadd.f32 %v5020_v6, %v1255_v5 }
 0x464   : > { %v5398_v7 = vpop.f32.mrf.mxu1 }
 0x466   : > { %v1258_v8 = vpop.f32.mrf.mxu1 }
 0x467   : > { %v1259_v10 = vadd.f32 %v5020_v6, %v1258_v8 }
 0x468   : > { %v5399_v11 = vpop.f32.mrf.mxu1 }
 0x469   : > { %v7331_v12 = vpack.c.bf16 %v1259_v10, %v1256_v9 }
 0x46b   : > { %1264 = vrot.lane.b32.xlu0 %v7331_v12, %s6772_s30 }
 0x46f   : > { %1395 = vrot.lane.b32.xlu0 %v7331_v12, %s6773_s26 }
 0x473   : > { %1393 = vrot.lane.b32.xlu0 %v7331_v12, %s6774_s0 }
 0x4dd   : > { %v1265_v13 = vpop.permute.xlu0 %1264 }
 0x4de   : > { %v1271_v14 = vsel %vm1266_vm4, %v1265_v13, 0 }
 0x4df   : > { %5401 = vmatpush3.bf16.xpose.msra.mxu1 %v1271_v14 }
 0x4e0   : > { %5406 = vmatprep.subr.bf16.mxu1 %v6770_v1 }
 0x4e1   : > { %v1396_v47 = vpop.permute.xlu0 %1395 }
 0x4e2   : > { %v1401_v49 = vsel %vm1266_vm4, %v1396_v47, 0 }
 0x4e5   : > { %v1394_v50 = vpop.permute.xlu0 %1393 }
 0x4e6   : > { %5403 = vmatmul.mubr.msk.bf16.vlgmr.msra.gmra.mxu1 %vm1266_vm4, %v7331_v12 }
 0x4e7   : > { %5408 = vmatprep.mubr.msk.bf16.mxu1 %vm6771_vm3, %v6770_v1 }
 0x5a6   : > { %v1307_v15 = vpop.f32.mrf.mxu1 }
 0x5a7   : > { %v1314_v17 = vmul.f32 0.35355338, %v1307_v15 }
 0x5a8   : > { %v5404_v18 = vpop.f32.mrf.mxu1 }
 0x5a9   : > { %v1316_v19 = vadd.f32 %v1314_v17, %v7348_v16 }
 0x5aa   : > { %v1310_v20 = vpop.f32.mrf.mxu1 }
 0x5ab   : > { %v1315_v22 = vmul.f32 0.35355338, %v1310_v20  ;;  %v1319_v23 = vsel %vm1318_vm5, %v1316_v19, -inf }
 0x5ac   : > { %1320 = vmax.xlane.f32.xlu1 %v1319_v23  ;;  %v5405_v24 = vpop.f32.mrf.mxu1 }
 0x5ad   : > { %v1317_v25 = vadd.f32 %v1315_v22, %v7354_v21 }
 0x5af   : > { %v1323_v26 = vsel %vm1322_vm6, %v1317_v25, -inf }
 0x5b0   : > { %1324 = vmax.xlane.f32.xlu1 %v1323_v26 }
 0x635   : > { %v1321_v27 = vpop.xlane.xlu1 %1320 }
 0x636   : > { %v1326_v28 = vsub.f32 %v1316_v19, %v1321_v27 }
 0x638   : > { %v1328_v29 = vmul.f32 1.442695, %v1326_v28 }
 0x639   : > { %v1325_v30 = vpop.xlane.xlu1 %1324 }
 0x63a   : > { %5865 = vpow2.f32 %v1328_v29  ;;  %v1327_v32 = vsub.f32 %v1317_v25, %v1325_v30 }
 0x63c   : > { %v1330_v33 = vmul.f32 1.442695, %v1327_v32 }
 0x63e   : > { %5867 = vpow2.f32 %v1330_v33 }
 0x647   : > { %v5866_v34 = vpop.eup %5865 }
 0x648   : > { %v1332_v35 = vsel %vm1318_vm5, %v5866_v34, 0.0 }
 0x649   : > { %1333 = vadd.xlane.f32.xlu1 %v1332_v35 }
 0x64b   : > { %v5868_v37 = vpop.eup %5867 }
 0x64c   : > { %v1335_v38 = vsel %vm1322_vm6, %v5868_v37, 0.0 }
 0x64d   : > { %1336 = vadd.xlane.f32.xlu1 %v1335_v38 }
 0x65e   : > { %1343 = vrot.lane.b32.xlu1 %v7331_v12, %s6775_s18 }
 0x6d2   : > { %v1334_v39 = vpop.xlane.xlu1 %1333 }
 0x6d3   : > { %5869 = vrcp.f32 %v1334_v39 }
 0x6d6   : > { %v1337_v40 = vpop.xlane.xlu1 %1336 }
 0x6d7   : > { %5871 = vrcp.f32 %v1337_v40 }
 0x6da   : > { %v1344_v41 = vpop.permute.xlu1 %1343 }
 0x6db   : > { %v1350_v42 = vsel %vm1348_vm7, %v1344_v41, 0 }
 0x6dc   : > { %5407 = vmatpush3.bf16.msra.mxu1 %v1350_v42 }
 0x6dd   : > { %5412 = vmatprep.subr.bf16.mxu1 %v6770_v1 }
 0x6e0   : > { %v5870_v43 = vpop.eup %5869 }
 0x6e1   : > { %v1339_v45 = vmul.f32 %v5870_v43, %v5866_v34 }
 0x6e4   : > { %v5872_v44 = vpop.eup %5871 }
 0x6e5   : > { %v1341_v46 = vmul.f32 %v5872_v44, %v5868_v37 }
 0x6e7   : > { %v1342_v48 = vpack.c.bf16 %v1341_v46, %v1339_v45 }
 0x6e9   : > { %5409 = vmatmul.mubr.msk.bf16.vlgmr.msra.gmra.mxu1 %vm1318_vm5, %v1342_v48 }
 0x6ea   : > { %5413 = vmatpush3.bf16.xpose.msra.mxu1 %v1401_v49  ;;  %5414 = vmatprep.mubr.msk.bf16.mxu1 %vm6771_vm3, %v6770_v1 }
 0x6eb   : > { %5418 = vmatprep.subr.bf16.mxu1 %v6770_v1 }
 0x6f1   : > { %5415 = vmatmul.mubr.msk.bf16.vlgmr.msra.gmra.mxu1 %vm1266_vm4, %v1394_v50 }
 0x6f2   : > { %5420 = vmatprep.mubr.msk.bf16.mxu1 %vm6771_vm3, %v6770_v1 }
 0x7a9   : > { %v7373_v51 = vpop.f32.mrf.mxu1 }
 0x7ab   : > { %v5410_v52 = vpop.f32.mrf.mxu1 }
 0x7ad   : > { %v7375_v53 = vpop.f32.mrf.mxu1 }
 0x7af   : > { %v5411_v54 = vpop.f32.mrf.mxu1 }
 0x7b1   : > { %v1437_v55 = vpop.f32.mrf.mxu1 }
 0x7b2   : > { %v1444_v56 = vmul.f32 0.35355338, %v1437_v55 }
 0x7b3   : > { %v5416_v57 = vpop.f32.mrf.mxu1 }
 0x7b4   : > { %v1446_v58 = vadd.f32 %v1444_v56, %v7348_v16 }
 0x7b5   : > { %v1440_v59 = vpop.f32.mrf.mxu1 }
 0x7b6   : > { %v1445_v60 = vmul.f32 0.35355338, %v1440_v59  ;;  %v1448_v61 = vsel %vm1318_vm5, %v1446_v58, -inf }
 0x7b7   : > { %1449 = vmax.xlane.f32.xlu0 %v1448_v61  ;;  %v5417_v62 = vpop.f32.mrf.mxu1 }
 0x7b8   : > { %v1447_v63 = vadd.f32 %v1445_v60, %v7354_v21 }
 0x7ba   : > { %v1451_v0 = vsel %vm1322_vm6, %v1447_v63, -inf }
 0x7bb   : > { %1452 = vmax.xlane.f32.xlu1 %v1451_v0 }
 0x7cc   : > { %1522 = vrot.lane.b32.xlu1 %v7331_v12, %s6776_s7 }
 0x7d0   : > { %1520 = vrot.lane.b32.xlu1 %v7331_v12, %s6777_s29 }
 0x840   : > { %v1450_v2 = vpop.xlane.xlu0 %1449 }
 0x841   : > { %v1454_v3 = vsub.f32 %v1446_v58, %v1450_v2 }
 0x843   : > { %v1456_v4 = vmul.f32 1.442695, %v1454_v3 }
 0x844   : > { %v1453_v5 = vpop.xlane.xlu1 %1452 }
 0x845   : > { %5873 = vpow2.f32 %v1456_v4  ;;  %v1455_v6 = vsub.f32 %v1447_v63, %v1453_v5 }
 0x847   : > { %v1458_v7 = vmul.f32 1.442695, %v1455_v6 }
 0x848   : > { %v1523_v23 = vpop.permute.xlu1 %1522 }
 0x849   : > { %5875 = vpow2.f32 %v1458_v7  ;;  %v1528_v25 = vsel %vm1266_vm4, %v1523_v23, 0 }
 0x84c   : > { %v1521_v26 = vpop.permute.xlu1 %1520 }
 0x852   : > { %v5874_v8 = vpop.eup %5873 }
 0x853   : > { %v1460_v9 = vsel %vm1318_vm5, %v5874_v8, 0.0 }
 0x854   : > { %1461 = vadd.xlane.f32.xlu0 %v1460_v9 }
 0x856   : > { %v5876_v10 = vpop.eup %5875 }
 0x857   : > { %v1463_v11 = vsel %vm1322_vm6, %v5876_v10, 0.0 }
 0x858   : > { %1464 = vadd.xlane.f32.xlu0 %v1463_v11 }
 0x86e   : > { %1471 = vrot.lane.b32.xlu0 %v7331_v12, %s8044_s6 }
 0x8dd   : > { %v1462_v13 = vpop.xlane.xlu0 %1461 }
 0x8de   : > { %5877 = vrcp.f32 %v1462_v13 }
 0x8e1   : > { %v1465_v14 = vpop.xlane.xlu0 %1464 }
 0x8e2   : > { %5879 = vrcp.f32 %v1465_v14 }
 0x8e5   : > { %v1472_v15 = vpop.permute.xlu0 %1471 }
 0x8e6   : > { %v1477_v17 = vsel %vm1348_vm7, %v1472_v15, 0 }
 0x8e7   : > { %5419 = vmatpush3.bf16.msra.mxu1 %v1477_v17 }
 0x8e8   : > { %5424 = vmatprep.subr.bf16.mxu1 %v6770_v1 }
 0x8eb   : > { %v5878_v18 = vpop.eup %5877 }
 0x8ec   : > { %v1467_v20 = vmul.f32 %v5878_v18, %v5874_v8 }
 0x8ef   : > { %v5880_v19 = vpop.eup %5879 }
 0x8f0   : > { %v1469_v22 = vmul.f32 %v5880_v19, %v5876_v10 }
 0x8f2   : > { %v1470_v24 = vpack.c.bf16 %v1469_v22, %v1467_v20 }
 0x8f4   : > { %5421 = vmatmul.mubr.msk.bf16.vlgmr.msra.gmra.mxu1 %vm1318_vm5, %v1470_v24 }
 0x8f5   : > { %5425 = vmatpush3.bf16.xpose.msra.mxu1 %v1528_v25  ;;  %5426 = vmatprep.mubr.msk.bf16.mxu1 %vm6771_vm3, %v6770_v1 }
 0x8f6   : > { %5430 = vmatprep.subr.bf16.mxu1 %v6770_v1 }
 0x8fc   : > { %5427 = vmatmul.mubr.msk.bf16.vlgmr.msra.gmra.mxu1 %vm1266_vm4, %v1521_v26 }
 0x8fd   : > { %5432 = vmatprep.mubr.msk.bf16.mxu1 %vm6771_vm3, %v6770_v1 }
 0x9b4   : > { %v7399_v27 = vpop.f32.mrf.mxu1 }
 0x9b6   : > { %v5422_v28 = vpop.f32.mrf.mxu1 }
 0x9b8   : > { %v7401_v29 = vpop.f32.mrf.mxu1 }
 0x9b9   : > { %v5803_v30 = vpack.i.bf16 %v7401_v29, %v7399_v27 }
 0x9ba   : > { %v5423_v32 = vpop.f32.mrf.mxu1 }
 0x9bc   : > { %v1564_v33 = vpop.f32.mrf.mxu1 }
 0x9bd   : > { %v1571_v34 = vmul.f32 0.35355338, %v1564_v33 }
 0x9be   : > { %v5428_v35 = vpop.f32.mrf.mxu1 }
 0x9bf   : > { %v1573_v37 = vadd.f32 %v1571_v34, %v7348_v16 }
 0x9c0   : > { %v1567_v38 = vpop.f32.mrf.mxu1 }
 0x9c1   : > { %v1572_v39 = vmul.f32 0.35355338, %v1567_v38  ;;  %v1575_v40 = vsel %vm1318_vm5, %v1573_v37, -inf }
 0x9c2   : > { %1576 = vmax.xlane.f32.xlu1 %v1575_v40  ;;  %v5429_v41 = vpop.f32.mrf.mxu1 }
 0x9c3   : > { %v1574_v42 = vadd.f32 %v1572_v39, %v7354_v21 }
 0x9c5   : > { %v1578_v43 = vsel %vm1322_vm6, %v1574_v42, -inf }
 0x9c6   : > { %1579 = vmax.xlane.f32.xlu0 %v1578_v43 }
 0x9d3   : > { %1598 = vrot.lane.b32.xlu1 %v7331_v12, %s8045_s1 }
 0x9d7   : > { %1647 = vrot.lane.b32.xlu1 %v7331_v12, %s6780_s8 }
 0xa4b   : > { %v1577_v44 = vpop.xlane.xlu1 %1576 }
 0xa4c   : > { %v1581_v45 = vsub.f32 %v1573_v37, %v1577_v44  ;;  %v5836_v44 = vld [vmem:[#allocation12] sm:$0xff]  }
 0xa4e   : > { %v1583_v46 = vmul.f32 1.442695, %v1581_v45 }
 0xa4f   : > { %v1599_v47 = vpop.permute.xlu1 %1598  ;;  %v1580_v48 = vpop.xlane.xlu0 %1579 }
 0xa50   : > { %5881 = vpow2.f32 %v1583_v46  ;;  %v1604_v49 = vsel %vm1348_vm7, %v1599_v47, 0  ;;  %v1582_v50 = vsub.f32 %v1574_v42, %v1580_v48 }
 0xa51   : > { %5431 = vmatpush3.bf16.msra.mxu1 %v1604_v49 }
 0xa52   : > { %v1585_v52 = vmul.f32 1.442695, %v1582_v50  ;;  %5436 = vmatprep.subr.bf16.mxu1 %v6770_v1 }
 0xa53   : > { %v1648_v4 = vpop.permute.xlu1 %1647 }
 0xa54   : > { %5883 = vpow2.f32 %v1585_v52 }
 0xa5d   : > { %v5882_v54 = vpop.eup %5881 }
 0xa5e   : > { %v1587_v55 = vsel %vm1318_vm5, %v5882_v54, 0.0 }
 0xa5f   : > { %1588 = vadd.xlane.f32.xlu0 %v1587_v55 }
 0xa61   : > { %v5884_v56 = vpop.eup %5883 }
 0xa62   : > { %v1590_v57 = vsel %vm1322_vm6, %v5884_v56, 0.0 }
 0xa63   : > { %1591 = vadd.xlane.f32.xlu0 %v1590_v57 }
 0xa79   : > { %1649 = vrot.lane.b32.xlu0 %v7331_v12, %s6781_s24 }
 0xae8   : > { %v1589_v58 = vpop.xlane.xlu0 %1588 }
 0xae9   : > { %5885 = vrcp.f32 %v1589_v58 }
 0xaec   : > { %v1592_v59 = vpop.xlane.xlu0 %1591 }
 0xaed   : > { %5887 = vrcp.f32 %v1592_v59 }
 0xaf0   : > { %v1650_v0 = vpop.permute.xlu0 %1649 }
 0xaf1   : > { %v1655_v3 = vsel %vm1266_vm4, %v1650_v0, 0 }
 0xaf6   : > { %v5886_v60 = vpop.eup %5885 }
 0xaf7   : > { %v1594_v62 = vmul.f32 %v5886_v60, %v5882_v54 }
 0xafa   : > { %v5888_v61 = vpop.eup %5887 }
 0xafb   : > { %v1596_v63 = vmul.f32 %v5888_v61, %v5884_v56 }
 0xafd   : > { %v1597_v2 = vpack.c.bf16 %v1596_v63, %v1594_v62 }
 0xaff   : > { %5433 = vmatmul.mubr.msk.bf16.vlgmr.msra.gmra.mxu1 %vm1318_vm5, %v1597_v2 }
 0xb00   : > { %5437 = vmatpush3.bf16.xpose.msra.mxu1 %v1655_v3  ;;  %5438 = vmatprep.mubr.msk.bf16.mxu1 %vm6771_vm3, %v6770_v1 }
 0xb01   : > { %5442 = vmatprep.subr.bf16.mxu1 %v6770_v1 }
 0xb07   : > { %5439 = vmatmul.mubr.msk.bf16.vlgmr.msra.gmra.mxu1 %vm1266_vm4, %v1648_v4 }
 0xb08   : > { %5444 = vmatprep.mubr.msk.bf16.mxu1 %vm6771_vm3, %v6770_v1 }
 0xbbf   : > { %v1640_v5 = vpop.f32.mrf.mxu1 }
 0xbc1   : > { %v5434_v6 = vpop.f32.mrf.mxu1 }
 0xbc3   : > { %v1643_v7 = vpop.f32.mrf.mxu1 }
 0xbc4   : > { %v5808_v8 = vpack.i.bf16 %v1643_v7, %v1640_v5  ;;  %v5035_v5 = vld [vmem:[#allocation14] ss:$0 sm:$0xff] }
 0xbc5   : > { %v5435_v9 = vpop.f32.mrf.mxu1 }
 0xbc7   : > { %v1691_v10 = vpop.f32.mrf.mxu1 }
 0xbc8   : > { %v1698_v11 = vmul.f32 0.35355338, %v1691_v10 }
 0xbc9   : > { %v5440_v13 = vpop.f32.mrf.mxu1 }
 0xbca   : > { %v1700_v14 = vadd.f32 %v1698_v11, %v7348_v16 }
 0xbcb   : > { %v1694_v15 = vpop.f32.mrf.mxu1 }
 0xbcc   : > { %v1699_v17 = vmul.f32 0.35355338, %v1694_v15  ;;  %v1702_v18 = vsel %vm1318_vm5, %v1700_v14, -inf }
 0xbcd   : > { %1703 = vmax.xlane.f32.xlu1 %v1702_v18  ;;  %v5441_v19 = vpop.f32.mrf.mxu1 }
 0xbce   : > { %v1701_v20 = vadd.f32 %v1699_v17, %v7354_v21 }
 0xbd0   : > { %v1705_v22 = vsel %vm1322_vm6, %v1701_v20, -inf }
 0xbd1   : > { %1706 = vmax.xlane.f32.xlu0 %v1705_v22 }
 0xc56   : > { %v1704_v23 = vpop.xlane.xlu1 %1703 }
 0xc57   : > { %v1708_v24 = vsub.f32 %v1700_v14, %v1704_v23 }
 0xc59   : > { %v1710_v25 = vmul.f32 1.442695, %v1708_v24 }
 0xc5a   : > { %v1707_v26 = vpop.xlane.xlu0 %1706 }
 0xc5b   : > { %5889 = vpow2.f32 %v1710_v25  ;;  %v1709_v28 = vsub.f32 %v1701_v20, %v1707_v26  ;;  %v5837_v25 = vld [vmem:[#allocation18 + $0x8] sm:$0xff]   ;;  %v5838_v26 = vld [vmem:[#allocation18] sm:$0xff]  }
 0xc5c   : > { %5457 = vmatpush3.bf16.msra.mxu0 %v5837_v25 }
 0xc5d   : > { %v1712_v32 = vmul.f32 1.442695, %v1709_v28  ;;  %5458 = vmatprep.subr.bf16.mxu0 %v6770_v1 }
 0xc5f   : > { %5891 = vpow2.f32 %v1712_v32 }
 0xc60   : > { %5459 = vmatpush3.bf16.msra.mxu0 %v5838_v26 }
 0xc61   : > { %5484 = vmatprep.subr.bf16.mxu0 %v6770_v1 }
 0xc68   : > { %v5890_v33 = vpop.eup %5889 }
 0xc69   : > { %v1714_v34 = vsel %vm1318_vm5, %v5890_v33, 0.0 }
 0xc6a   : > { %1715 = vadd.xlane.f32.xlu0 %v1714_v34 }
 0xc6c   : > { %v5892_v35 = vpop.eup %5891 }
 0xc6d   : > { %v1717_v37 = vsel %vm1322_vm6, %v5892_v35, 0.0 }
 0xc6e   : > { %1718 = vadd.xlane.f32.xlu1 %v1717_v37 }
 0xc7f   : > { %5804 = vrot.lane.b32.xlu1 %v5803_v30, %s8042_s27  ;;  %s8128_s27 = smov 16  }
 0xc80   : > { %1725 = vrot.lane.b32.xlu0 %v7331_v12, %s8043_s4  ;;  %v5835_v12 = vld [vmem:[#allocation12 + $0x8] sm:$0xff]  }
 0xc83   : > { %5809 = vrot.lane.b32.xlu1 %v5808_v8, %s8041_s25  ;;  %s8129_s25 = smov 24  }
 0xcf3   : > { %v1716_v38 = vpop.xlane.xlu0 %1715 }
 0xcf4   : > { %5893 = vrcp.f32 %v1716_v38 }
 0xcf7   : > { %v1719_v39 = vpop.xlane.xlu1 %1718  ;;  %v1726_v40 = vpop.permute.xlu0 %1725 }
 0xcf8   : > { %5895 = vrcp.f32 %v1719_v39  ;;  %v1731_v41 = vsel %vm1348_vm7, %v1726_v40, 0  ;;  %v5036_v40 = vld [vmem:[#allocation15] ss:$0 sm:$0xff] }
 0xcf9   : > { %5443 = vmatpush3.bf16.msra.mxu1 %v1731_v41 }
 0xcfa   : > { %5448 = vmatprep.subr.bf16.mxu1 %v6770_v1 }
 0xcfb   : > { %v5805_v50 = vpop.permute.xlu1 %5804 }
 0xcfc   : > { %v5807_v54 = vunpack.i.h.bf16 %v5805_v50  ;;  %v5806_v55 = vunpack.i.l.bf16 %v5805_v50 }
 0xcfe   : > { %v1799_v59 = vsel %vm1266_vm4, %v7375_v53, %v5807_v54  ;;  %v1798_v60 = vsel %vm1266_vm4, %v7373_v51, %v5806_v55  ;;  %v5038_v55 = vld [vmem:[#allocation20] ss:$0 sm:$0xff] }
 0xcff   : > { %v5810_v52 = vpop.permute.xlu1 %5809 }
 0xd00   : > { %v5812_v56 = vunpack.i.h.bf16 %v5810_v52  ;;  %v5811_v57 = vunpack.i.l.bf16 %v5810_v52 }
 0xd01   : > { %v5894_v42 = vpop.eup %5893 }
 0xd02   : > { %v1721_v29 = vmul.f32 %v5894_v42, %v5890_v33  ;;  %v1801_v63 = vsel %vm1800_vm8, %v1798_v60, %v5811_v57  ;;  %v1802_v0 = vsel %vm1800_vm8, %v1799_v59, %v5812_v56 }
 0xd05   : > { %v5896_v27 = vpop.eup %5895 }
 0xd06   : > { %v1723_v30 = vmul.f32 %v5896_v27, %v5892_v35 }
 0xd08   : > { %v1724_v43 = vpack.c.bf16 %v1723_v30, %v1721_v29  ;;  %v5037_v29 = vld [vmem:[#allocation17] ss:$0 sm:$0xff] }
 0xd0a   : > { %5445 = vmatmul.mubr.msk.bf16.vlgmr.msra.gmra.mxu1 %vm1318_vm5, %v1724_v43 }
 0xd0b   : > { %5452 = vmatprep.mubr.msk.bf16.mxu1 %vm6771_vm3, %v6770_v1  ;;  %5449 = vmatpush3.bf16.msra.mxu1 %v5835_v12 }
 0xd0c   : > { %5450 = vmatprep.subr.bf16.mxu1 %v6770_v1 }
 0xd0f   : > { %5451 = vmatpush3.bf16.msra.mxu1 %v5836_v44 }
 0xd10   : > { %5464 = vmatprep.subr.bf16.mxu1 %v6770_v1 }
 0xdca   : > { %v1767_v45 = vpop.f32.mrf.mxu1 }
 0xdcc   : > { %v5446_v46 = vpop.f32.mrf.mxu1 }
 0xdce   : > { %v1770_v47 = vpop.f32.mrf.mxu1 }
 0xdcf   : > { %v5813_v48 = vpack.i.bf16 %v1770_v47, %v1767_v45 }
 0xdd0   : > { %v5447_v49 = vpop.f32.mrf.mxu1 }
 0xdd1   : > { %5814 = vrot.lane.b32.xlu1 %v5813_v48, %s8040_s2  ;;  %s8123_s2 = sld [smem:[#allocation58_spill]] }
 0xdd7   : > { %v5839_v45 = vld [vmem:[%s8123_s2 + $0x38] sm:$0xff]   ;;  %v5840_v46 = vld [vmem:[%s8123_s2 + $0x30] sm:$0xff]   ;;  %v5841_v47 = vld [vmem:[%s8123_s2 + $0x28] sm:$0xff]  }
 0xdd8   : > { %v5842_v48 = vld [vmem:[%s8123_s2 + $0x20] sm:$0xff]   ;;  %v5843_v49 = vld [vmem:[%s8123_s2 + $0x18] sm:$0xff]   ;;  %v5844_v50 = vld [vmem:[%s8123_s2 + $0x10] sm:$0xff]  }
 0xdd9   : > { %v5845_v52 = vld [vmem:[%s8123_s2 + $0x8] sm:$0xff]   ;;  %v5846_v54 = vld [vmem:[%s8123_s2] sm:$0xff]  }
 0xe43   : > { %v5815_v58 = vpop.permute.xlu1 %5814 }
 0xe44   : > { %v5817_v61 = vunpack.i.h.bf16 %v5815_v58  ;;  %v5816_v62 = vunpack.i.l.bf16 %v5815_v58 }
 0xe46   : > { %v1805_v2 = vsel %vm1803_vm9, %v1802_v0, %v5817_v61  ;;  %v1804_v3 = vsel %vm1803_vm9, %v1801_v63, %v5816_v62 }
 0xe47   : > { %v1806_v4 = vpack.c.bf16 %v1805_v2, %v1804_v3 }
 0xe49   : > { %5453 = vmatmul.mubr.msk.bf16.vlgmr.msra.gmra.mxu1 %vm1149_vm1, %v1806_v4 }
 0xe4a   : > { %5480 = vmatprep.mubr.msk.bf16.mxu1 %vm6771_vm3, %v6770_v1  ;;  %v7476_v1 = vld [vmem:[#allocation3] sm:$0xff]  ;;  %5465 = vmatpush3.bf16.msra.mxu1 %v5839_v45 }
 0xe4b   : > { %5466 = vmatprep.subr.bf16.mxu1 %v7476_v1 }
 0xe4e   : > { %5467 = vmatpush3.bf16.msra.mxu1 %v5840_v46 }
 0xe4f   : > { %5468 = vmatprep.subr.bf16.mxu1 %v7476_v1 }
 0xe52   : > { %5469 = vmatpush3.bf16.msra.mxu1 %v5841_v47 }
 0xe53   : > { %5470 = vmatprep.subr.bf16.mxu1 %v7476_v1 }
 0xe56   : > { %5471 = vmatpush3.bf16.msra.mxu1 %v5842_v48 }
 0xe57   : > { %5472 = vmatprep.subr.bf16.mxu1 %v7476_v1 }
 0xe5a   : > { %5473 = vmatpush3.bf16.msra.mxu1 %v5843_v49 }
 0xe5b   : > { %5474 = vmatprep.subr.bf16.mxu1 %v7476_v1 }
 0xe5e   : > { %5475 = vmatpush3.bf16.msra.mxu1 %v5844_v50 }
 0xe5f   : > { %5476 = vmatprep.subr.bf16.mxu1 %v7476_v1 }
 0xe62   : > { %5477 = vmatpush3.bf16.msra.mxu1 %v5845_v52 }
 0xe63   : > { %5478 = vmatprep.subr.bf16.mxu1 %v7476_v1 }
 0xe66   : > { %5479 = vmatpush3.bf16.msra.mxu1 %v5846_v54 }
 0xe67   : > { %5510 = vmatprep.subr.bf16.mxu1 %v7476_v1 }
 0xf09   : > { %v1860_v53 = vpop.f32.mrf.mxu1 }
 0xf0a   : > { %v1867_v51 = vadd.f32 %v1860_v53, %v7307_v31 }
 0xf0b   : > { %v5454_v6 = vpop.f32.mrf.mxu1 }
 0xf0c   : > { %v7460_v7 = vadd.f32 %v5035_v5, %v1867_v51 }
 0xf0d   : > { %v1863_v8 = vpop.f32.mrf.mxu1 }
 0xf0e   : > { %v1868_v9 = vadd.f32 %v1863_v8, %v7314_v36  ;;  %v1880_v10 = vsel %vm1149_vm1, %v7460_v7, 0.0 }
 0xf0f   : > { %1881 = vadd.xlane.f32.xlu0 %v1880_v10  ;;  %v5455_v11 = vpop.f32.mrf.mxu1 }
 0xf10   : > { %v7465_v13 = vadd.f32 %v5035_v5, %v1868_v9 }
 0xf12   : > { %v1883_v14 = vsel %vm1153_vm2, %v7465_v13, 0.0 }
 0xf13   : > { %1884 = vadd.xlane.f32.xlu1 %v1883_v14 }
 0xf98   : > { %v1882_v15 = vpop.xlane.xlu0 %1881 }
 0xf99   : > { %v1886_v17 = vmul.f32 0.03125, %v1882_v15 }
 0xf9b   : > { %v1888_v31 = vsub.f32 %v7460_v7, %v1886_v17 }
 0xf9c   : > { %v1885_v18 = vpop.xlane.xlu1 %1884 }
 0xf9d   : > { %v1887_v19 = vmul.f32 0.03125, %v1885_v18  ;;  %v1890_v20 = vmul.f32 %v1888_v31, %v1888_v31 }
 0xf9f   : > { %v1889_v36 = vsub.f32 %v7465_v13, %v1887_v19  ;;  %v1892_v22 = vsel %vm1149_vm1, %v1890_v20, 0.0 }
 0xfa0   : > { %1893 = vadd.xlane.f32.xlu0 %v1892_v22 }
 0xfa1   : > { %v1891_v23 = vmul.f32 %v1889_v36, %v1889_v36 }
 0xfa3   : > { %v1895_v24 = vsel %vm1153_vm2, %v1891_v23, 0.0 }
 0xfa4   : > { %1896 = vadd.xlane.f32.xlu0 %v1895_v24 }
0x1029   : > { %v1894_v28 = vpop.xlane.xlu0 %1893 }
0x102a   : > { %v1898_v32 = vmul.f32 0.03125, %v1894_v28 }
0x102c   : > { %v1900_v33 = vadd.f32 1e-06, %v1898_v32 }
0x102d   : > { %v1897_v34 = vpop.xlane.xlu0 %1896 }
0x102e   : > { %5897 = vrsqrt.f32 %v1900_v33  ;;  %v1899_v35 = vmul.f32 0.03125, %v1897_v34 }
0x1030   : > { %v1901_v37 = vadd.f32 1e-06, %v1899_v35 }
0x1032   : > { %5899 = vrsqrt.f32 %v1901_v37 }
0x103b   : > { %v5898_v38 = vpop.eup %5897 }
0x103c   : > { %v1904_v39 = vmul.f32 %v5898_v38, %v1888_v31 }
0x103e   : > { %v1912_v42 = vmul.f32 %v5036_v40, %v1904_v39 }
0x103f   : > { %v5900_v41 = vpop.eup %5899 }
0x1040   : > { %v1905_v27 = vmul.f32 %v5900_v41, %v1889_v36  ;;  %v1920_v43 = vadd.f32 %v5037_v29, %v1912_v42 }
0x1042   : > { %v1913_v30 = vmul.f32 %v5036_v40, %v1905_v27  ;;  %v6786_v27 = vmov -1.0  }
0x1044   : > { %v1921_v12 = vadd.f32 %v5037_v29, %v1913_v30 }
0x1046   : > { %v1922_v44 = vpack.c.bf16 %v1921_v12, %v1920_v43 }
0x1048   : > { %5461 = vmatmul.mubr.msk.bf16.vlgmr.msra.gmra.mxu0 %vm1149_vm1, %v1922_v44 }
0x1049   : > { %5488 = vmatprep.mubr.msk.bf16.mxu0 %vm6771_vm3, %v7476_v1 }
0x1108   : > { %v1983_v56 = vpop.f32.mrf.mxu0 }
0x1109   : > { %v1984_v57 = vadd.f32 %v5038_v55, %v1983_v56  ;;  %v5050_v56 = vld [vmem:[#allocation21] ss:$0 sm:$0xff] }
0x110a   : > { %v5462_v58 = vpop.f32.mrf.mxu0 }
0x110b   : > { %v1992_v59 = vmul.f32 0.70710677, %v1984_v57  ;;  %v1990_v47 = vmul.f32 0.5, %v1984_v57 }
0x110c   : > { %v1986_v60 = vpop.f32.mrf.mxu0 }
0x110d   : > { %v1998_v61 = vand.u32 2147483647, %v1992_v59  ;;  %v1987_v62 = vadd.f32 %v5038_v55, %v1986_v60  ;;  %vm1994_vm10 = vcmp.ge.f32.partialorder %v1992_v59, 0.0 }
0x110e   : > { %v5463_v63 = vpop.f32.mrf.mxu0  ;;  %v1996_v29 = vsel %vm1994_vm10, 1.0, %v6786_v27 }
0x110f   : > { %v2000_v0 = vmul.f32 0.3275911, %v1998_v61  ;;  %v1993_v2 = vmul.f32 0.70710677, %v1987_v62  ;;  %v2026_v51 = vsub.f32 0.0, %v1998_v61  ;;  %v1991_v48 = vmul.f32 0.5, %v1987_v62 }
0x1111   : > { %v2002_v3 = vadd.f32 1.0, %v2000_v0  ;;  %v1999_v4 = vand.u32 2147483647, %v1993_v2  ;;  %v2028_v6 = vmul.f32 %v2026_v51, %v1998_v61  ;;  %vm1995_vm11 = vcmp.ge.f32.partialorder %v1993_v2, 0.0 }
0x1112   : > { %v1997_v44 = vsel %vm1995_vm11, 1.0, %v6786_v27 }
0x1113   : > { %5901 = vrcp.f32 %v2002_v3  ;;  %v2001_v53 = vmul.f32 0.3275911, %v1999_v4  ;;  %v2027_v8 = vsub.f32 0.0, %v1999_v4  ;;  %v2030_v11 = vmul.f32 1.442695, %v2028_v6 }
0x1115   : > { %v2003_v5 = vadd.f32 1.0, %v2001_v53  ;;  %v2029_v14 = vmul.f32 %v2027_v8, %v1999_v4 }
0x1117   : > { %5903 = vrcp.f32 %v2003_v5  ;;  %v2032_v19 = vmul.f32 1.442695, %v2029_v14 }
0x1118   : > { %5905 = vpow2.f32 %v2030_v11  ;;  %v5848_v11 = vld [vmem:[#allocation9 + $0x10] sm:$0xff]  }
0x1119   : > { %5907 = vpow2.f32 %v2032_v19 }
0x1120   : > { %v5902_v9 = vpop.eup %5901 }
0x1121   : > { %v2008_v10 = vmul.f32 1.0614054, %v5902_v9 }
0x1123   : > { %v2010_v15 = vadd.f32 -1.4531521, %v2008_v10  ;;  %v5847_v10 = vld [vmem:[#allocation9 + $0x18] sm:$0xff]  }
0x1124   : > { %v5904_v17 = vpop.eup %5903  ;;  %5485 = vmatpush3.bf16.msra.mxu0 %v5847_v10 }
0x1125   : > { %v2012_v31 = vmul.f32 %v5902_v9, %v2010_v15  ;;  %v2009_v18 = vmul.f32 1.0614054, %v5904_v17  ;;  %v5906_v37 = vpop.eup %5905  ;;  %5486 = vmatprep.subr.bf16.mxu0 %v7476_v1 }
0x1126   : > { %v5908_v42 = vpop.eup %5907 }
0x1127   : > { %v2014_v20 = vadd.f32 1.4214138, %v2012_v31  ;;  %v2011_v36 = vadd.f32 -1.4531521, %v2009_v18 }
0x1128   : > { %5487 = vmatpush3.bf16.msra.mxu0 %v5848_v11 }
0x1129   : > { %v2016_v22 = vmul.f32 %v5902_v9, %v2014_v20  ;;  %v2013_v23 = vmul.f32 %v5904_v17, %v2011_v36  ;;  %5492 = vmatprep.subr.bf16.mxu0 %v7476_v1 }
0x112b   : > { %v2018_v24 = vadd.f32 -0.28449672, %v2016_v22  ;;  %v2015_v25 = vadd.f32 1.4214138, %v2013_v23  ;;  %v5051_v22 = vld [vmem:[#allocation6 + $0x1] ss:$0 sm:$0xff] }
0x112d   : > { %v2020_v26 = vmul.f32 %v5902_v9, %v2018_v24  ;;  %v2017_v28 = vmul.f32 %v5904_v17, %v2015_v25 }
0x112f   : > { %v2022_v32 = vadd.f32 0.2548296, %v2020_v26  ;;  %v2019_v33 = vadd.f32 -0.28449672, %v2017_v28  ;;  %v5052_v26 = vld [vmem:[#allocation8 + $0x1] ss:$0 sm:$0xff] }
0x1131   : > { %v2024_v34 = vmul.f32 %v5902_v9, %v2022_v32  ;;  %v2021_v35 = vmul.f32 %v5904_v17, %v2019_v33 }
0x1133   : > { %v2034_v38 = vmul.f32 %v5906_v37, %v2024_v34  ;;  %v2023_v39 = vadd.f32 0.2548296, %v2021_v35  ;;  %v5053_v37 = vld [vmem:[#allocation11 + $0x1] ss:$0 sm:$0xff] }
0x1135   : > { %v2036_v40 = vsub.f32 1.0, %v2034_v38  ;;  %v2025_v41 = vmul.f32 %v5904_v17, %v2023_v39 }
0x1137   : > { %v2038_v30 = vmul.f32 %v2036_v40, %v1996_v29  ;;  %v2035_v43 = vmul.f32 %v5908_v42, %v2025_v41 }
0x1139   : > { %v2037_v12 = vsub.f32 1.0, %v2035_v43  ;;  %v2040_v45 = vadd.f32 1.0, %v2038_v30 }
0x113b   : > { %v2039_v46 = vmul.f32 %v2037_v12, %v1997_v44  ;;  %v2042_v50 = vmul.f32 %v2040_v45, %v1990_v47 }
0x113d   : > { %v2041_v49 = vadd.f32 1.0, %v2039_v46 }
0x113f   : > { %v2043_v52 = vmul.f32 %v2041_v49, %v1991_v48 }
0x1141   : > { %v2044_v54 = vpack.c.bf16 %v2043_v52, %v2042_v50 }
0x1143   : > { %5481 = vmatmul.mubr.bf16.vlgmr.msra.gmra.mxu1 %v2044_v54 }
0x1144   : > { %5512 = vmatprep.mubr.msk.bf16.mxu1 %vm6771_vm3, %v7476_v1 }
0x1203   : > { %v2143_v55 = vpop.f32.mrf.mxu1 }
0x1204   : > { %v2150_v58 = vadd.f32 %v2143_v55, %v7460_v7 }
0x1205   : > { %v5482_v59 = vpop.f32.mrf.mxu1 }
0x1206   : > { %v7517_v60 = vadd.f32 %v5050_v56, %v2150_v58 }
0x1207   : > { %v2146_v61 = vpop.f32.mrf.mxu1 }
0x1208   : > { %v2151_v63 = vadd.f32 %v2146_v61, %v7465_v13  ;;  %v2165_v57 = vsel %vm1149_vm1, %v7517_v60, 0.0 }
0x1209   : > { %2166 = vadd.xlane.f32.xlu0 %v2165_v57  ;;  %v5483_v62 = vpop.f32.mrf.mxu1 }
0x120a   : > { %v7522_v0 = vadd.f32 %v5050_v56, %v2151_v63 }
0x120c   : > { %v2168_v2 = vsel %vm1153_vm2, %v7522_v0, 0.0 }
0x120d   : > { %2169 = vadd.xlane.f32.xlu1 %v2168_v2 }
0x1292   : > { %v2167_v3 = vpop.xlane.xlu0 %2166 }
0x1293   : > { %v2171_v4 = vmul.f32 0.03125, %v2167_v3 }
0x1295   : > { %v2173_v7 = vsub.f32 %v7517_v60, %v2171_v4 }
0x1296   : > { %v2170_v53 = vpop.xlane.xlu1 %2169 }
0x1297   : > { %v2172_v5 = vmul.f32 0.03125, %v2170_v53  ;;  %v2175_v51 = vmul.f32 %v2173_v7, %v2173_v7 }
0x1299   : > { %v2174_v13 = vsub.f32 %v7522_v0, %v2172_v5  ;;  %v2177_v6 = vsel %vm1149_vm1, %v2175_v51, 0.0 }
0x129a   : > { %2178 = vadd.xlane.f32.xlu0 %v2177_v6 }
0x129b   : > { %v2176_v8 = vmul.f32 %v2174_v13, %v2174_v13 }
0x129d   : > { %v2180_v9 = vsel %vm1153_vm2, %v2176_v8, 0.0 }
0x129e   : > { %2181 = vadd.xlane.f32.xlu1 %v2180_v9 }
0x1323   : > { %v2179_v14 = vpop.xlane.xlu0 %2178 }
0x1324   : > { %v2183_v15 = vmul.f32 0.03125, %v2179_v14 }
0x1326   : > { %v2185_v17 = vadd.f32 1e-06, %v2183_v15 }
0x1327   : > { %v2182_v31 = vpop.xlane.xlu1 %2181 }
0x1328   : > { %5909 = vrsqrt.f32 %v2185_v17  ;;  %v2184_v18 = vmul.f32 0.03125, %v2182_v31 }
0x132a   : > { %v2186_v19 = vadd.f32 1e-06, %v2184_v18 }
0x132c   : > { %5911 = vrsqrt.f32 %v2186_v19 }
0x1335   : > { %v5910_v20 = vpop.eup %5909 }
0x1336   : > { %v2189_v36 = vmul.f32 %v5910_v20, %v2173_v7 }
0x1338   : > { %v2197_v25 = vmul.f32 %v5051_v22, %v2189_v36 }
0x1339   : > { %v5912_v23 = vpop.eup %5911 }
0x133a   : > { %v2190_v24 = vmul.f32 %v5912_v23, %v2174_v13  ;;  %v2205_v32 = vadd.f32 %v5052_v26, %v2197_v25 }
0x133c   : > { %v2198_v28 = vmul.f32 %v5051_v22, %v2190_v24 }
0x133e   : > { %v2206_v33 = vadd.f32 %v5052_v26, %v2198_v28  ;;  %v5960_v26 = vld [vmem:[%s8122_s12] sm:$0xff] }
0x1340   : > { %v2207_v34 = vpack.c.bf16 %v2206_v33, %v2205_v32 }
0x1342   : > { %5489 = vmatmul.mubr.msk.bf16.vlgmr.msra.gmra.mxu0 %vm1149_vm1, %v2207_v34 }
0x1343   : > { %5494 = vmatprep.mubr.msk.bf16.mxu0 %vm6771_vm3, %v7476_v1 }
0x1402   : > { %v2270_v35 = vpop.f32.mrf.mxu0 }
0x1403   : > { %v2271_v40 = vadd.f32 %v5053_v37, %v2270_v35 }
0x1404   : > { %v5490_v38 = vpop.f32.mrf.mxu0 }
0x1406   : > { %v2273_v39 = vpop.f32.mrf.mxu0 }
0x1407   : > { %v2274_v41 = vadd.f32 %v5053_v37, %v2273_v39  ;;  %v5961_v37 = vld [vmem:[%s8122_s12 + $0x8] sm:$0x3] }
0x1408   : > { %v5491_v42 = vpop.f32.mrf.mxu0 }
0x1409   : > { %v7535_v29 = vpack.c.bf16 %v2274_v41, %v2271_v40 }
0x140b   : > { %2279 = vrot.lane.b32.xlu0 %v7535_v29, %s6772_s30 }
0x140f   : > { %2406 = vrot.lane.b32.xlu0 %v7535_v29, %s6773_s26 }
0x1413   : > { %2404 = vrot.lane.b32.xlu0 %v7535_v29, %s6774_s0 }
0x1417   : > { %2533 = vrot.lane.b32.xlu0 %v7535_v29, %s6776_s7  ;;  %s8124_s7 = smov 48  }
0x141b   : > { %2660 = vrot.lane.b32.xlu0 %v7535_v29, %s6781_s24  ;;  %s8127_s24 = smov 8  }
0x147d   : > { %v2280_v30 = vpop.permute.xlu0 %2279 }
0x147e   : > { %v2285_v43 = vsel %vm1266_vm4, %v2280_v30, 0 }
0x147f   : > { %5493 = vmatpush3.bf16.xpose.msra.mxu0 %v2285_v43 }
0x1480   : > { %5498 = vmatprep.subr.bf16.mxu0 %v7476_v1 }
0x1481   : > { %v2407_v5 = vpop.permute.xlu0 %2406 }
0x1482   : > { %v2412_v10 = vsel %vm1266_vm4, %v2407_v5, 0 }
0x1485   : > { %v2405_v9 = vpop.permute.xlu0 %2404 }
0x1486   : > { %5495 = vmatmul.mubr.msk.bf16.vlgmr.msra.gmra.mxu0 %vm1266_vm4, %v7535_v29 }
0x1487   : > { %5500 = vmatprep.mubr.msk.bf16.mxu0 %vm6771_vm3, %v7476_v1 }
0x1489   : > { %v2534_v11 = vpop.permute.xlu0 %2533 }
0x148a   : > { %v2539_v14 = vsel %vm1266_vm4, %v2534_v11, 0 }
0x148d   : > { %v2661_v15 = vpop.permute.xlu0 %2660 }
0x148e   : > { %v2666_v31 = vsel %vm1266_vm4, %v2661_v15, 0 }
0x1546   : > { %v2321_v12 = vpop.f32.mrf.mxu0 }
0x1547   : > { %v2328_v44 = vmul.f32 0.35355338, %v2321_v12 }
0x1548   : > { %v5496_v45 = vpop.f32.mrf.mxu0 }
0x1549   : > { %v2330_v46 = vadd.f32 %v2328_v44, %v7348_v16 }
0x154a   : > { %v2324_v47 = vpop.f32.mrf.mxu0 }
0x154b   : > { %v2329_v48 = vmul.f32 0.35355338, %v2324_v47  ;;  %v2332_v49 = vsel %vm1318_vm5, %v2330_v46, -inf }
0x154c   : > { %2333 = vmax.xlane.f32.xlu1 %v2332_v49  ;;  %v5497_v50 = vpop.f32.mrf.mxu0 }
0x154d   : > { %v2331_v52 = vadd.f32 %v2329_v48, %v7354_v21 }
0x154f   : > { %v2335_v54 = vsel %vm1322_vm6, %v2331_v52, -inf }
0x1550   : > { %2336 = vmax.xlane.f32.xlu1 %v2335_v54 }
0x15d5   : > { %v2334_v55 = vpop.xlane.xlu1 %2333 }
0x15d6   : > { %v2338_v56 = vsub.f32 %v2330_v46, %v2334_v55 }
0x15d8   : > { %v2340_v58 = vmul.f32 1.442695, %v2338_v56 }
0x15d9   : > { %v2337_v59 = vpop.xlane.xlu1 %2336 }
0x15da   : > { %5913 = vpow2.f32 %v2340_v58  ;;  %v2339_v61 = vsub.f32 %v2331_v52, %v2337_v59 }
0x15dc   : > { %v2342_v63 = vmul.f32 1.442695, %v2339_v61 }
0x15de   : > { %5915 = vpow2.f32 %v2342_v63 }
0x15e7   : > { %v5914_v16 = vpop.eup %5913 }
0x15e8   : > { %v2344_v57 = vsel %vm1318_vm5, %v5914_v16, 0.0 }
0x15e9   : > { %2345 = vadd.xlane.f32.xlu1 %v2344_v57 }
0x15eb   : > { %v5916_v62 = vpop.eup %5915 }
0x15ec   : > { %v2347_v2 = vsel %vm1322_vm6, %v5916_v62, 0.0 }
0x15ed   : > { %2348 = vadd.xlane.f32.xlu1 %v2347_v2 }
0x15fe   : > { %2355 = vrot.lane.b32.xlu1 %v7535_v29, %s6775_s18 }
0x1602   : > { %2531 = vrot.lane.b32.xlu1 %v7535_v29, %s6777_s29  ;;  %s8125_s29 = smov 56  }
0x1606   : > { %2658 = vrot.lane.b32.xlu1 %v7535_v29, %s6780_s8  ;;  %s8126_s8 = smov 40  }
0x1672   : > { %v2346_v21 = vpop.xlane.xlu1 %2345 }
0x1673   : > { %5917 = vrcp.f32 %v2346_v21 }
0x1676   : > { %v2349_v3 = vpop.xlane.xlu1 %2348 }
0x1677   : > { %5919 = vrcp.f32 %v2349_v3 }
0x167a   : > { %v2356_v4 = vpop.permute.xlu1 %2355 }
0x167b   : > { %v2361_v7 = vsel %vm1348_vm7, %v2356_v4, 0 }
0x167c   : > { %5499 = vmatpush3.bf16.msra.mxu0 %v2361_v7 }
0x167d   : > { %5504 = vmatprep.subr.bf16.mxu0 %v7476_v1 }
0x167e   : > { %v2532_v17 = vpop.permute.xlu1 %2531 }
0x1680   : > { %v5918_v53 = vpop.eup %5917 }
0x1681   : > { %v2351_v13 = vmul.f32 %v5918_v53, %v5914_v16 }
0x1682   : > { %v2659_v18 = vpop.permute.xlu1 %2658 }
0x1684   : > { %v5920_v51 = vpop.eup %5919 }
0x1685   : > { %v2353_v6 = vmul.f32 %v5920_v51, %v5916_v62 }
0x1687   : > { %v2354_v8 = vpack.c.bf16 %v2353_v6, %v2351_v13 }
0x1689   : > { %5501 = vmatmul.mubr.msk.bf16.vlgmr.msra.gmra.mxu0 %vm1318_vm5, %v2354_v8 }
0x168a   : > { %5505 = vmatpush3.bf16.xpose.msra.mxu0 %v2412_v10  ;;  %5506 = vmatprep.mubr.msk.bf16.mxu0 %vm6771_vm3, %v7476_v1 }
0x168b   : > { %5516 = vmatprep.subr.bf16.mxu0 %v7476_v1 }
0x1691   : > { %5507 = vmatmul.mubr.msk.bf16.vlgmr.msra.gmra.mxu0 %vm1266_vm4, %v2405_v9 }
0x1692   : > { %5517 = vmatpush3.bf16.xpose.msra.mxu0 %v2539_v14  ;;  %5518 = vmatprep.mubr.msk.bf16.mxu0 %vm6771_vm3, %v7476_v1 }
0x1693   : > { %5528 = vmatprep.subr.bf16.mxu0 %v7476_v1 }
0x1699   : > { %5519 = vmatmul.mubr.msk.bf16.vlgmr.msra.gmra.mxu0 %vm1266_vm4, %v2532_v17 }
0x169a   : > { %5529 = vmatpush3.bf16.xpose.msra.mxu0 %v2666_v31  ;;  %5530 = vmatprep.mubr.msk.bf16.mxu0 %vm6771_vm3, %v7476_v1 }
0x169b   : > { %5540 = vmatprep.subr.bf16.mxu0 %v7476_v1 }
0x16a1   : > { %5531 = vmatmul.mubr.msk.bf16.vlgmr.msra.gmra.mxu0 %vm1266_vm4, %v2659_v18 }
0x16a2   : > { %5544 = vmatprep.mubr.msk.bf16.mxu0 %vm6771_vm3, %v7476_v1 }
0x1749   : > { %v7585_v19 = vpop.f32.mrf.mxu0 }
0x174b   : > { %v5502_v20 = vpop.f32.mrf.mxu0 }
0x174d   : > { %v7587_v36 = vpop.f32.mrf.mxu0 }
0x174f   : > { %v5503_v22 = vpop.f32.mrf.mxu0 }
0x1751   : > { %v2448_v23 = vpop.f32.mrf.mxu0 }
0x1752   : > { %v2455_v24 = vmul.f32 0.35355338, %v2448_v23 }
0x1753   : > { %v5508_v25 = vpop.f32.mrf.mxu0 }
0x1754   : > { %v2457_v28 = vadd.f32 %v5960_v26, %v2455_v24 }
0x1755   : > { %v2451_v32 = vpop.f32.mrf.mxu0 }
0x1756   : > { %v2456_v33 = vmul.f32 0.35355338, %v2451_v32  ;;  %v2459_v34 = vsel %vm1318_vm5, %v2457_v28, -inf }
0x1757   : > { %2460 = vmax.xlane.f32.xlu0 %v2459_v34  ;;  %v5509_v35 = vpop.f32.mrf.mxu0 }
0x1758   : > { %v2458_v38 = vadd.f32 %v5961_v37, %v2456_v33 }
0x1759   : > { %v2575_v39 = vpop.f32.mrf.mxu0 }
0x175a   : > { %v2582_v40 = vmul.f32 0.35355338, %v2575_v39  ;;  %v2462_v41 = vsel %vm1322_vm6, %v2458_v38, -inf }
0x175b   : > { %2463 = vmax.xlane.f32.xlu1 %v2462_v41  ;;  %v5520_v42 = vpop.f32.mrf.mxu0 }
0x175c   : > { %v2584_v30 = vadd.f32 %v5960_v26, %v2582_v40 }
0x175d   : > { %v2578_v43 = vpop.f32.mrf.mxu0 }
0x175e   : > { %v2583_v12 = vmul.f32 0.35355338, %v2578_v43  ;;  %v2586_v44 = vsel %vm1318_vm5, %v2584_v30, -inf }
0x175f   : > { %2587 = vmax.xlane.f32.xlu0 %v2586_v44  ;;  %v5521_v45 = vpop.f32.mrf.mxu0 }
0x1760   : > { %v2585_v46 = vadd.f32 %v5961_v37, %v2583_v12 }
0x1761   : > { %v2702_v47 = vpop.f32.mrf.mxu0 }
0x1762   : > { %v2709_v48 = vmul.f32 0.35355338, %v2702_v47  ;;  %v2589_v49 = vsel %vm1322_vm6, %v2585_v46, -inf }
0x1763   : > { %2590 = vmax.xlane.f32.xlu0 %v2589_v49  ;;  %v5532_v50 = vpop.f32.mrf.mxu0 }
0x1764   : > { %v2711_v52 = vadd.f32 %v5960_v26, %v2709_v48 }
0x1765   : > { %v2705_v54 = vpop.f32.mrf.mxu0 }
0x1766   : > { %v2710_v55 = vmul.f32 0.35355338, %v2705_v54  ;;  %v2713_v56 = vsel %vm1318_vm5, %v2711_v52, -inf }
0x1767   : > { %2714 = vmax.xlane.f32.xlu0 %v2713_v56  ;;  %v5533_v58 = vpop.f32.mrf.mxu0 }
0x1768   : > { %v2712_v59 = vadd.f32 %v5961_v37, %v2710_v55 }
0x176a   : > { %v2716_v61 = vsel %vm1322_vm6, %v2712_v59, -inf }
0x176b   : > { %2717 = vmax.xlane.f32.xlu1 %v2716_v61 }
0x17e0   : > { %v2461_v63 = vpop.xlane.xlu0 %2460 }
0x17e1   : > { %v2465_v16 = vsub.f32 %v2457_v28, %v2461_v63 }
0x17e3   : > { %v2467_v57 = vmul.f32 1.442695, %v2465_v16 }
0x17e4   : > { %v2464_v62 = vpop.xlane.xlu1 %2463 }
0x17e5   : > { %5921 = vpow2.f32 %v2467_v57  ;;  %v2466_v2 = vsub.f32 %v2458_v38, %v2464_v62  ;;  %v5849_v57 = vld [vmem:[#allocation12 + $0x18] sm:$0xff]  }
0x17e6   : > { %5541 = vmatpush3.bf16.msra.mxu0 %v5849_v57 }
0x17e7   : > { %v2469_v21 = vmul.f32 1.442695, %v2466_v2  ;;  %5542 = vmatprep.subr.bf16.mxu0 %v7476_v1 }
0x17e8   : > { %v2588_v3 = vpop.xlane.xlu0 %2587 }
0x17e9   : > { %5923 = vpow2.f32 %v2469_v21  ;;  %v2592_v4 = vsub.f32 %v2584_v30, %v2588_v3 }
0x17eb   : > { %v2594_v7 = vmul.f32 1.442695, %v2592_v4 }
0x17ec   : > { %v2591_v53 = vpop.xlane.xlu0 %2590 }
0x17ed   : > { %5925 = vpow2.f32 %v2594_v7  ;;  %v2593_v5 = vsub.f32 %v2585_v46, %v2591_v53 }
0x17ef   : > { %v2596_v51 = vmul.f32 1.442695, %v2593_v5  ;;  %v5850_v5 = vld [vmem:[#allocation12 + $0x10] sm:$0xff]  }
0x17f0   : > { %v2715_v13 = vpop.xlane.xlu0 %2714  ;;  %5543 = vmatpush3.bf16.msra.mxu0 %v5850_v5  ;;  %v5853_v5 = vld [vmem:[%s8123_s2 + $0x78] sm:$0xff]  }
0x17f1   : > { %5927 = vpow2.f32 %v2596_v51  ;;  %v2719_v6 = vsub.f32 %v2711_v52, %v2715_v13  ;;  %5556 = vmatprep.subr.bf16.mxu0 %v7476_v1 }
0x17f2   : > { %v5922_v8 = vpop.eup %5921 }
0x17f3   : > { %v2721_v9 = vmul.f32 1.442695, %v2719_v6  ;;  %v2471_v10 = vsel %vm1318_vm5, %v5922_v8, 0.0 }
0x17f4   : > { %2472 = vadd.xlane.f32.xlu0 %v2471_v10  ;;  %v2718_v23 = vpop.xlane.xlu1 %2717 }
0x17f5   : > { %5929 = vpow2.f32 %v2721_v9  ;;  %v2720_v24 = vsub.f32 %v2712_v59, %v2718_v23 }
0x17f6   : > { %v5924_v11 = vpop.eup %5923 }
0x17f7   : > { %v2474_v14 = vsel %vm1322_vm6, %v5924_v11, 0.0  ;;  %v2723_v25 = vmul.f32 1.442695, %v2720_v24 }
0x17f8   : > { %2475 = vadd.xlane.f32.xlu1 %v2474_v14 }
0x17f9   : > { %5931 = vpow2.f32 %v2723_v25 }
0x17fa   : > { %v5926_v15 = vpop.eup %5925 }
0x17fb   : > { %v2598_v17 = vsel %vm1318_vm5, %v5926_v15, 0.0 }
0x17fc   : > { %2599 = vadd.xlane.f32.xlu0 %v2598_v17 }
0x17fe   : > { %v5928_v31 = vpop.eup %5927 }
0x17ff   : > { %v2601_v18 = vsel %vm1322_vm6, %v5928_v31, 0.0 }
0x1800   : > { %2602 = vadd.xlane.f32.xlu1 %v2601_v18 }
0x1802   : > { %v5930_v20 = vpop.eup %5929 }
0x1803   : > { %v2725_v22 = vsel %vm1318_vm5, %v5930_v20, 0.0 }
0x1804   : > { %2726 = vadd.xlane.f32.xlu0 %v2725_v22 }
0x1806   : > { %v5932_v26 = vpop.eup %5931 }
0x1807   : > { %v2728_v28 = vsel %vm1322_vm6, %v5932_v26, 0.0 }
0x1811   : > { %2609 = vrot.lane.b32.xlu1 %v7535_v29, %s8124_s7 }
0x181a   : > { %2482 = vrot.lane.b32.xlu0 %v7535_v29, %s8125_s29 }
0x1835   : > { %2729 = vadd.xlane.f32.xlu1 %v2728_v28 }
0x1846   : > { %2736 = vrot.lane.b32.xlu1 %v7535_v29, %s8126_s8 }
0x187d   : > { %v2473_v32 = vpop.xlane.xlu0 %2472 }
0x187e   : > { %5933 = vrcp.f32 %v2473_v32 }
0x1881   : > { %v2476_v33 = vpop.xlane.xlu1 %2475 }
0x1882   : > { %5935 = vrcp.f32 %v2476_v33 }
0x1885   : > { %v2600_v34 = vpop.xlane.xlu0 %2599 }
0x1886   : > { %5937 = vrcp.f32 %v2600_v34  ;;  %v5068_v34 = vld [vmem:[#allocation14 + $0x1] ss:$0 sm:$0xff] }
0x1889   : > { %v2603_v35 = vpop.xlane.xlu1 %2602 }
0x188a   : > { %5939 = vrcp.f32 %v2603_v35 }
0x188b   : > { %v5934_v38 = vpop.eup %5933 }
0x188c   : > { %v2478_v30 = vmul.f32 %v5934_v38, %v5922_v8 }
0x188d   : > { %v2727_v37 = vpop.xlane.xlu0 %2726  ;;  %v2610_v43 = vpop.permute.xlu1 %2609 }
0x188e   : > { %v2615_v44 = vsel %vm1348_vm7, %v2610_v43, 0  ;;  %5941 = vrcp.f32 %v2727_v37 }
0x188f   : > { %v5936_v39 = vpop.eup %5935 }
0x1890   : > { %v2480_v40 = vmul.f32 %v5936_v39, %v5924_v11 }
0x1891   : > { %v2483_v41 = vpop.permute.xlu0 %2482 }
0x1892   : > { %v2488_v42 = vsel %vm1348_vm7, %v2483_v41, 0  ;;  %v2481_v12 = vpack.c.bf16 %v2480_v40, %v2478_v30 }
0x1893   : > { %5511 = vmatpush3.bf16.msra.mxu1 %v2488_v42  ;;  %v5938_v29 = vpop.eup %5937 }
0x1894   : > { %5522 = vmatprep.subr.bf16.mxu1 %v7476_v1  ;;  %v2605_v47 = vmul.f32 %v5938_v29, %v5926_v15 }
0x1896   : > { %5513 = vmatmul.mubr.msk.bf16.vlgmr.msra.gmra.mxu1 %vm1318_vm5, %v2481_v12 }
0x1897   : > { %v5940_v45 = vpop.eup %5939  ;;  %5523 = vmatpush3.bf16.msra.mxu1 %v2615_v44  ;;  %5524 = vmatprep.mubr.msk.bf16.mxu1 %vm6771_vm3, %v7476_v1 }
0x1898   : > { %v2607_v46 = vmul.f32 %v5940_v45, %v5928_v31  ;;  %5534 = vmatprep.subr.bf16.mxu1 %v7476_v1 }
0x189a   : > { %v2608_v48 = vpack.c.bf16 %v2607_v46, %v2605_v47 }
0x189b   : > { %v5942_v54 = vpop.eup %5941 }
0x189c   : > { %v2732_v56 = vmul.f32 %v5942_v54, %v5930_v20 }
0x189e   : > { %5525 = vmatmul.mubr.msk.bf16.vlgmr.msra.gmra.mxu1 %vm1318_vm5, %v2608_v48 }
0x189f   : > { %5536 = vmatprep.mubr.msk.bf16.mxu1 %vm6771_vm3, %v7476_v1 }
0x18be   : > { %v2730_v49 = vpop.xlane.xlu1 %2729 }
0x18bf   : > { %5943 = vrcp.f32 %v2730_v49  ;;  %v5851_v49 = vld [vmem:[#allocation18 + $0x18] sm:$0xff]  }
0x18c2   : > { %v2737_v50 = vpop.permute.xlu1 %2736 }
0x18c3   : > { %v2742_v52 = vsel %vm1348_vm7, %v2737_v50, 0  ;;  %v5852_v50 = vld [vmem:[#allocation18 + $0x10] sm:$0xff]  }
0x18c4   : > { %5535 = vmatpush3.bf16.msra.mxu1 %v2742_v52 }
0x18c5   : > { %5548 = vmatprep.subr.bf16.mxu1 %v7476_v1 }
0x18cc   : > { %v5944_v55 = vpop.eup %5943 }
0x18cd   : > { %v2734_v58 = vmul.f32 %v5944_v55, %v5932_v26 }
0x18cf   : > { %v2735_v59 = vpack.c.bf16 %v2734_v58, %v2732_v56 }
0x18d1   : > { %5537 = vmatmul.mubr.msk.bf16.vlgmr.msra.gmra.mxu1 %vm1318_vm5, %v2735_v59 }
0x18d2   : > { %5552 = vmatprep.mubr.msk.bf16.mxu1 %vm6771_vm3, %v7476_v1  ;;  %5549 = vmatpush3.bf16.msra.mxu1 %v5851_v49 }
0x18d3   : > { %5550 = vmatprep.subr.bf16.mxu1 %v7476_v1 }
0x18d6   : > { %5551 = vmatpush3.bf16.msra.mxu1 %v5852_v50 }
0x1956   : > { %v2524_v61 = vpop.f32.mrf.mxu1 }
0x1958   : > { %v5514_v63 = vpop.f32.mrf.mxu1 }
0x195a   : > { %v2527_v16 = vpop.f32.mrf.mxu1 }
0x195b   : > { %v5818_v62 = vpack.i.bf16 %v2527_v16, %v2524_v61  ;;  %v5069_v16 = vld [vmem:[#allocation15 + $0x1] ss:$0 sm:$0xff] }
0x195c   : > { %v5515_v2 = vpop.f32.mrf.mxu1 }
0x195d   : > { %5819 = vrot.lane.b32.xlu1 %v5818_v62, %s8127_s24 }
0x195e   : > { %v2651_v21 = vpop.f32.mrf.mxu1 }
0x1960   : > { %v5526_v3 = vpop.f32.mrf.mxu1 }
0x1962   : > { %v2654_v4 = vpop.f32.mrf.mxu1 }
0x1963   : > { %v5823_v7 = vpack.i.bf16 %v2654_v4, %v2651_v21  ;;  %v5070_v21 = vld [vmem:[#allocation17 + $0x1] ss:$0 sm:$0xff] }
0x1964   : > { %v5527_v53 = vpop.f32.mrf.mxu1 }
0x1965   : > { %5824 = vrot.lane.b32.xlu0 %v5823_v7, %s8128_s27 }
0x1991   : > { %v2778_v51 = vpop.f32.mrf.mxu1 }
0x1993   : > { %v5538_v13 = vpop.f32.mrf.mxu1 }
0x1994   : > { %v5855_v13 = vld [vmem:[%s8123_s2 + $0x68] sm:$0xff]  }
0x1995   : > { %v2781_v6 = vpop.f32.mrf.mxu1 }
0x1996   : > { %v5828_v8 = vpack.i.bf16 %v2781_v6, %v2778_v51  ;;  %v5854_v51 = vld [vmem:[%s8123_s2 + $0x70] sm:$0xff]   ;;  %v5856_v6 = vld [vmem:[%s8123_s2 + $0x60] sm:$0xff]  }
0x1997   : > { %v5539_v9 = vpop.f32.mrf.mxu1 }
0x1998   : > { %5829 = vrot.lane.b32.xlu1 %v5828_v8, %s8129_s25  ;;  %v5857_v8 = vld [vmem:[%s8123_s2 + $0x58] sm:$0xff]   ;;  %v5858_v9 = vld [vmem:[%s8123_s2 + $0x50] sm:$0xff]  }
0x19cf   : > { %v5820_v10 = vpop.permute.xlu1 %5819 }
0x19d0   : > { %v5822_v14 = vunpack.i.h.bf16 %v5820_v10  ;;  %v5821_v15 = vunpack.i.l.bf16 %v5820_v10  ;;  %v5859_v10 = vld [vmem:[%s8123_s2 + $0x48] sm:$0xff]  }
0x19d2   : > { %v2810_v20 = vsel %vm1266_vm4, %v7587_v36, %v5822_v14  ;;  %v2809_v22 = vsel %vm1266_vm4, %v7585_v19, %v5821_v15  ;;  %v5071_v14 = vld [vmem:[#allocation20 + $0x1] ss:$0 sm:$0xff] }
0x19d7   : > { %v5825_v11 = vpop.permute.xlu0 %5824 }
0x19d8   : > { %v5827_v17 = vunpack.i.h.bf16 %v5825_v11  ;;  %v5826_v31 = vunpack.i.l.bf16 %v5825_v11  ;;  %v5860_v11 = vld [vmem:[%s8123_s2 + $0x40] sm:$0xff]  }
0x19da   : > { %v2812_v25 = vsel %vm1800_vm8, %v2810_v20, %v5827_v17  ;;  %v2811_v26 = vsel %vm1800_vm8, %v2809_v22, %v5826_v31 }
0x1a0a   : > { %v5830_v18 = vpop.permute.xlu1 %5829 }
0x1a0b   : > { %v5832_v23 = vunpack.i.h.bf16 %v5830_v18  ;;  %v5831_v24 = vunpack.i.l.bf16 %v5830_v18 }
0x1a0d   : > { %v2814_v28 = vsel %vm1803_vm9, %v2812_v25, %v5832_v23  ;;  %v2813_v32 = vsel %vm1803_vm9, %v2811_v26, %v5831_v24 }
0x1a0e   : > { %v2815_v33 = vpack.c.bf16 %v2814_v28, %v2813_v32 }
0x1a10   : > { %5545 = vmatmul.mubr.msk.bf16.vlgmr.msra.gmra.mxu0 %vm1149_vm1, %v2815_v33 }
0x1a11   : > { %5572 = vmatprep.mubr.msk.bf16.mxu0 %vm6771_vm3, %v7476_v1  ;;  %5557 = vmatpush3.bf16.msra.mxu0 %v5853_v5 }
0x1a12   : > { %5558 = vmatprep.subr.bf16.mxu0 %v7476_v1 }
0x1a15   : > { %5559 = vmatpush3.bf16.msra.mxu0 %v5854_v51 }
0x1a16   : > { %5560 = vmatprep.subr.bf16.mxu0 %v7476_v1 }
0x1a19   : > { %5561 = vmatpush3.bf16.msra.mxu0 %v5855_v13 }
0x1a1a   : > { %5562 = vmatprep.subr.bf16.mxu0 %v7476_v1 }
0x1a1d   : > { %5563 = vmatpush3.bf16.msra.mxu0 %v5856_v6 }
0x1a1e   : > { %5564 = vmatprep.subr.bf16.mxu0 %v7476_v1 }
0x1a21   : > { %5565 = vmatpush3.bf16.msra.mxu0 %v5857_v8 }
0x1a22   : > { %5566 = vmatprep.subr.bf16.mxu0 %v7476_v1 }
0x1a25   : > { %5567 = vmatpush3.bf16.msra.mxu0 %v5858_v9  ;;  %v5099_v9 = vld [vmem:[#allocation21 + $0x1] ss:$0 sm:$0xff] }
0x1a26   : > { %5568 = vmatprep.subr.bf16.mxu0 %v7476_v1 }
0x1a29   : > { %5569 = vmatpush3.bf16.msra.mxu0 %v5859_v10 }
0x1a2a   : > { %5570 = vmatprep.subr.bf16.mxu0 %v7476_v1 }
0x1a2d   : > { %5571 = vmatpush3.bf16.msra.mxu0 %v5860_v11 }
0x1ad0   : > { %v2870_v36 = vpop.f32.mrf.mxu0 }
0x1ad1   : > { %v2877_v19 = vadd.f32 %v2870_v36, %v7517_v60 }
0x1ad2   : > { %v5546_v35 = vpop.f32.mrf.mxu0 }
0x1ad3   : > { %v7645_v37 = vadd.f32 %v5068_v34, %v2877_v19 }
0x1ad4   : > { %v2873_v38 = vpop.f32.mrf.mxu0 }
0x1ad5   : > { %v2878_v39 = vadd.f32 %v2873_v38, %v7522_v0  ;;  %v2893_v40 = vsel %vm1149_vm1, %v7645_v37, 0.0 }
0x1ad6   : > { %2894 = vadd.xlane.f32.xlu0 %v2893_v40  ;;  %v5547_v41 = vpop.f32.mrf.mxu0 }
0x1ad7   : > { %v2888_v42 = vadd.f32 %v5068_v34, %v2878_v39 }
0x1ad9   : > { %v2896_v30 = vsel %vm1153_vm2, %v2888_v42, 0.0 }
0x1ada   : > { %2897 = vadd.xlane.f32.xlu1 %v2896_v30 }
0x1b5f   : > { %v2895_v43 = vpop.xlane.xlu0 %2894 }
0x1b60   : > { %v2899_v12 = vmul.f32 0.03125, %v2895_v43 }
0x1b62   : > { %v2901_v29 = vsub.f32 %v7645_v37, %v2899_v12 }
0x1b63   : > { %v2898_v60 = vpop.xlane.xlu1 %2897 }
0x1b64   : > { %v2900_v44 = vmul.f32 0.03125, %v2898_v60  ;;  %v2903_v45 = vmul.f32 %v2901_v29, %v2901_v29 }
0x1b66   : > { %v2902_v46 = vsub.f32 %v2888_v42, %v2900_v44  ;;  %v2905_v47 = vsel %vm1149_vm1, %v2903_v45, 0.0 }
0x1b67   : > { %2906 = vadd.xlane.f32.xlu0 %v2905_v47 }
0x1b68   : > { %v2904_v0 = vmul.f32 %v2902_v46, %v2902_v46 }
0x1b6a   : > { %v2908_v48 = vsel %vm1153_vm2, %v2904_v0, 0.0 }
0x1b6b   : > { %2909 = vadd.xlane.f32.xlu0 %v2908_v48 }
0x1bf0   : > { %v2907_v52 = vpop.xlane.xlu0 %2906 }
0x1bf1   : > { %v2911_v54 = vmul.f32 0.03125, %v2907_v52 }
0x1bf3   : > { %v2913_v55 = vadd.f32 1e-06, %v2911_v54 }
0x1bf4   : > { %v2910_v56 = vpop.xlane.xlu0 %2909 }
0x1bf5   : > { %5945 = vrsqrt.f32 %v2913_v55  ;;  %v2912_v58 = vmul.f32 0.03125, %v2910_v56 }
0x1bf7   : > { %v2914_v59 = vadd.f32 1e-06, %v2912_v58 }
0x1bf9   : > { %5947 = vrsqrt.f32 %v2914_v59 }
0x1c02   : > { %v5946_v61 = vpop.eup %5945 }
0x1c03   : > { %v2917_v63 = vmul.f32 %v5946_v61, %v2901_v29 }
0x1c05   : > { %v2925_v2 = vmul.f32 %v5069_v16, %v2917_v63 }
0x1c06   : > { %v5948_v57 = vpop.eup %5947 }
0x1c07   : > { %v2918_v62 = vmul.f32 %v5948_v57, %v2902_v46  ;;  %v2933_v4 = vadd.f32 %v5070_v21, %v2925_v2 }
0x1c09   : > { %v2926_v3 = vmul.f32 %v5069_v16, %v2918_v62 }
0x1c0b   : > { %v2934_v7 = vadd.f32 %v5070_v21, %v2926_v3 }
0x1c0d   : > { %v2935_v53 = vpack.c.bf16 %v2934_v7, %v2933_v4 }
0x1c0f   : > { %5553 = vmatmul.mubr.msk.bf16.vlgmr.msra.gmra.mxu1 %vm1149_vm1, %v2935_v53 }
0x1ccf   : > { %v2998_v15 = vpop.f32.mrf.mxu1 }
0x1cd0   : > { %v2999_v17 = vadd.f32 %v5071_v14, %v2998_v15 }
0x1cd1   : > { %v5554_v31 = vpop.f32.mrf.mxu1 }
0x1cd2   : > { %v3007_v18 = vmul.f32 0.70710677, %v2999_v17  ;;  %v3005_v7 = vmul.f32 0.5, %v2999_v17 }
0x1cd3   : > { %v3001_v20 = vpop.f32.mrf.mxu1 }
0x1cd4   : > { %v3013_v22 = vand.u32 2147483647, %v3007_v18  ;;  %v3002_v23 = vadd.f32 %v5071_v14, %v3001_v20  ;;  %vm3009_vm12 = vcmp.ge.f32.partialorder %v3007_v18, 0.0 }
0x1cd5   : > { %v5555_v24 = vpop.f32.mrf.mxu1  ;;  %v3011_v16 = vsel %vm3009_vm12, 1.0, %v6786_v27 }
0x1cd6   : > { %v3015_v25 = vmul.f32 0.3275911, %v3013_v22  ;;  %v3008_v26 = vmul.f32 0.70710677, %v3002_v23  ;;  %v3041_v36 = vsub.f32 0.0, %v3013_v22  ;;  %v3006_v53 = vmul.f32 0.5, %v3002_v23 }
0x1cd8   : > { %v3017_v28 = vadd.f32 1.0, %v3015_v25  ;;  %v3014_v32 = vand.u32 2147483647, %v3008_v26  ;;  %v3043_v34 = vmul.f32 %v3041_v36, %v3013_v22  ;;  %vm3010_vm13 = vcmp.ge.f32.partialorder %v3008_v26, 0.0  ;;  %v5101_v36 = vld [vmem:[#allocation24] ss:$0 sm:$0xff] }
0x1cd9   : > { %v3012_v21 = vsel %vm3010_vm13, 1.0, %v6786_v27 }
0x1cda   : > { %5949 = vrcp.f32 %v3017_v28  ;;  %v3016_v1 = vmul.f32 0.3275911, %v3014_v32  ;;  %v3042_v19 = vsub.f32 0.0, %v3014_v32  ;;  %v3045_v39 = vmul.f32 1.442695, %v3043_v34 }
0x1cdc   : > { %v3018_v33 = vadd.f32 1.0, %v3016_v1  ;;  %v3044_v40 = vmul.f32 %v3042_v19, %v3014_v32  ;;  %v5100_v1 = vld [vmem:[#allocation23] ss:$0 sm:$0xff] }
0x1cde   : > { %5951 = vrcp.f32 %v3018_v33  ;;  %v3047_v12 = vmul.f32 1.442695, %v3044_v40 }
0x1cdf   : > { %5953 = vpow2.f32 %v3045_v39 }
0x1ce0   : > { %5955 = vpow2.f32 %v3047_v12 }
0x1ce7   : > { %v5950_v35 = vpop.eup %5949 }
0x1ce8   : > { %v3023_v38 = vmul.f32 1.0614054, %v5950_v35 }
0x1cea   : > { %v3025_v41 = vadd.f32 -1.4531521, %v3023_v38 }
0x1ceb   : > { %v5952_v42 = vpop.eup %5951 }
0x1cec   : > { %v3027_v30 = vmul.f32 %v5950_v35, %v3025_v41  ;;  %v3024_v43 = vmul.f32 1.0614054, %v5952_v42  ;;  %v5954_v55 = vpop.eup %5953 }
0x1ced   : > { %v5956_v63 = vpop.eup %5955 }
0x1cee   : > { %v3029_v29 = vadd.f32 1.4214138, %v3027_v30  ;;  %v3026_v60 = vadd.f32 -1.4531521, %v3024_v43 }
0x1cf0   : > { %v3031_v44 = vmul.f32 %v5950_v35, %v3029_v29  ;;  %v3028_v45 = vmul.f32 %v5952_v42, %v3026_v60 }
0x1cf2   : > { %v3033_v46 = vadd.f32 -0.28449672, %v3031_v44  ;;  %v3030_v47 = vadd.f32 1.4214138, %v3028_v45 }
0x1cf4   : > { %v3035_v0 = vmul.f32 %v5950_v35, %v3033_v46  ;;  %v3032_v48 = vmul.f32 %v5952_v42, %v3030_v47 }
0x1cf6   : > { %v3037_v49 = vadd.f32 0.2548296, %v3035_v0  ;;  %v3034_v50 = vadd.f32 -0.28449672, %v3032_v48 }
0x1cf8   : > { %v3039_v52 = vmul.f32 %v5950_v35, %v3037_v49  ;;  %v3036_v54 = vmul.f32 %v5952_v42, %v3034_v50 }
0x1cfa   : > { %v3049_v56 = vmul.f32 %v5954_v55, %v3039_v52  ;;  %v3038_v58 = vadd.f32 0.2548296, %v3036_v54 }
0x1cfc   : > { %v3051_v59 = vsub.f32 1.0, %v3049_v56  ;;  %v3040_v61 = vmul.f32 %v5952_v42, %v3038_v58 }
0x1cfe   : > { %v3053_v57 = vmul.f32 %v3051_v59, %v3011_v16  ;;  %v3050_v62 = vmul.f32 %v5956_v63, %v3040_v61 }
0x1d00   : > { %v3052_v2 = vsub.f32 1.0, %v3050_v62  ;;  %v3055_v3 = vadd.f32 1.0, %v3053_v57 }
0x1d02   : > { %v3054_v4 = vmul.f32 %v3052_v2, %v3012_v21  ;;  %v3057_v51 = vmul.f32 %v3055_v3, %v3005_v7 }
0x1d04   : > { %v3056_v5 = vadd.f32 1.0, %v3054_v4 }
0x1d06   : > { %v3058_v13 = vmul.f32 %v3056_v5, %v3006_v53 }
0x1d08   : > { %v3059_v6 = vpack.c.bf16 %v3058_v13, %v3057_v51 }
0x1d0a   : > { %5573 = vmatmul.mubr.bf16.vlgmr.msra.gmra.mxu0 %v3059_v6 }
0x1dca   : > { %v3159_v8 = vpop.f32.mrf.mxu0 }
0x1dcb   : > { %v3165_v10 = vadd.f32 %v3159_v8, %v7645_v37 }
0x1dcc   : > { %v5574_v11 = vpop.f32.mrf.mxu0 }
0x1dcd   : > { %v3174_v14 = vadd.f32 %v5099_v9, %v3165_v10 }
0x1dce   : > { %v3162_v15 = vpop.f32.mrf.mxu0 }
0x1dcf   : > { %v3176_v31 = vrot.slane %v3174_v14, 4 }
0x1dd0   : > { %v5575_v18 = vpop.f32.mrf.mxu0 }
0x1dd1   : > { %v3179_v27 = vsel %vm3178_vm14, %v3174_v14, %v3176_v31 }
0x1dd2   : > { %v3182_v20 = vsel %vm1153_vm2, %v3179_v27, 0.0 }
0x1dd3   : > { %3183 = vadd.xlane.f32.xlu0 %v3182_v20 }
0x1e5c   : > { %v3184_v17 = vpop.xlane.xlu0 %3183 }
0x1e5d   : > { %v3185_v22 = vmul.f32 0.03125, %v3184_v17 }
0x1e5f   : > { %v3186_v23 = vsub.f32 %v3179_v27, %v3185_v22 }
0x1e61   : > { %v3187_v24 = vmul.f32 %v3186_v23, %v3186_v23 }
0x1e63   : > { %v3188_v25 = vsel %vm1153_vm2, %v3187_v24, 0.0 }
0x1e64   : > { %3189 = vadd.xlane.f32.xlu1 %v3188_v25 }
0x1eed   : > { %v3190_v26 = vpop.xlane.xlu1 %3189 }
0x1eee   : > { %v3191_v28 = vmul.f32 0.03125, %v3190_v26 }
0x1ef0   : > { %v3192_v37 = vadd.f32 1e-06, %v3191_v28 }
0x1ef2   : > { %5957 = vrsqrt.f32 %v3192_v37 }
0x1eff   : > { %v5958_v32 = vpop.eup %5957 }
0x1f00   : > { %v3194_v33 = vmul.f32 %v5958_v32, %v3186_v23 }
0x1f02   : > { %v3201_v34 = vmul.f32 %v5100_v1, %v3194_v33 }
0x1f04   : > { %v3208_v19 = vadd.f32 %v5101_v36, %v3201_v34 }
0x1f06   : > { %3209 = vst.msk [vmem:[#allocation2] sm:$0x3] %vm1153_vm2, %v3208_v19 }
0x1f07 PF: > { %v5962_v35 = vld [vmem:[%s7247_s5 + $0x24] ss:$16 sps:$4 sm:$0xff]   ;;  %v5964_v38 = vld [vmem:[%s7247_s5 + $0x2c] ss:$16 sps:$4 sm:$0xff]   ;;  %v6787_v39 = vmov 0   ;;  %vm3283_vm15 = vcmask 261120  }
0x1f08   : > { %3319 = vmatprep.mubr.bf16.mxu0 %v6787_v39  ;;  %3360 = vmatprep.mubr.bf16.mxu1 %v6787_v39  ;;  %v5966_v40 = vld [vmem:[%s7247_s5 + $0x20] ss:$16 sps:$4 sm:$0xff]   ;;  %v5967_v41 = vld [vmem:[%s7247_s5 + $0x28] ss:$16 sps:$4 sm:$0xff]   ;;  %v5968_v42 = vld [vmem:[%s7247_s5 + $0x4] ss:$16 sps:$4 sm:$0xff]  }
0x1f09   : > { %3299 = vmatprep.subr.bf16.mxu0 %v5962_v35  ;;  %3340 = vmatprep.subr.bf16.mxu1 %v5964_v38  ;;  %v5970_v30 = vld [vmem:[%s7247_s5 + $0xc] ss:$16 sps:$4 sm:$0xff]   ;;  %v5972_v43 = vld [vmem:[%s7247_s5] ss:$16 sps:$4 sm:$0xff]   ;;  %v5973_v12 = vld [vmem:[%s7247_s5 + $0x8] ss:$16 sps:$4 sm:$0xff]  }
0x1f0a   : > { %3300 = vmatpush1.bf16.msra.mxu0 %v5966_v40  ;;  %3341 = vmatpush1.bf16.msra.mxu1 %v5967_v41  ;;  %v5974_v60 = vld [vmem:[%s7255_s3 + $0xe0] ss:$16 sps:$4 sm:$0xff]   ;;  %v5976_v44 = vld [vmem:[%s7255_s3 + $0xe4] ss:$16 sps:$4 sm:$0xff]   ;;  %s8130_s5 = sld [smem:[#allocation42_spill]] }
0x1f0b   : > { %3301 = vmatprep.subr.bf16.mxu0 %v5968_v42  ;;  %3342 = vmatprep.subr.bf16.mxu1 %v5970_v30  ;;  %v5977_v46 = vld [vmem:[%s7255_s3 + $0x2e0] ss:$16 sps:$4 sm:$0xff]   ;;  %v5979_v47 = vld [vmem:[%s7255_s3 + $0x2e4] ss:$16 sps:$4 sm:$0xff]  }
0x1f0c   : > { %v5982_v0 = vld [vmem:[%s7255_s3 + $0xc4] ss:$16 sps:$4 sm:$0xff]   ;;  %v5980_v49 = vld [vmem:[%s7255_s3 + $0xc0] ss:$16 sps:$4 sm:$0xff]  }
0x1f0d   : > { %v3211_v29 = vld [vmem:[#allocation2] sm:$0x3]  ;;  %v5985_v48 = vld [vmem:[%s7255_s3 + $0x2c4] ss:$16 sps:$4 sm:$0xff]   ;;  %v5983_v50 = vld [vmem:[%s7255_s3 + $0x2c0] ss:$16 sps:$4 sm:$0xff]  }
0x1f0e   : > { %v3212_v45 = vpack.c.bf16 %v3211_v29, %v3211_v29  ;;  %3302 = vmatpush1.bf16.msra.mxu0 %v5972_v43  ;;  %3343 = vmatpush1.bf16.msra.mxu1 %v5973_v12  ;;  %v5988_v52 = vld [vmem:[%s7255_s3 + $0xa4] ss:$16 sps:$4 sm:$0xff]   ;;  %v5986_v55 = vld [vmem:[%s7255_s3 + $0xa0] ss:$16 sps:$4 sm:$0xff]  }
0x1f0f   : > { %4146 = vmatprep.subr.bf16.mxu0 %v5976_v44  ;;  %4187 = vmatprep.subr.bf16.mxu1 %v5979_v47  ;;  %v5991_v54 = vld [vmem:[%s7255_s3 + $0x2a4] ss:$16 sps:$4 sm:$0xff]   ;;  %v5989_v56 = vld [vmem:[%s7255_s3 + $0x2a0] ss:$16 sps:$4 sm:$0xff]   ;;  %v6072_v44 = vld [vmem:[%s7255_s3 + $0xec] ss:$16 sps:$4 sm:$0xff]  }
0x1f10   : > { %v5994_v58 = vld [vmem:[%s7255_s3 + $0x84] ss:$16 sps:$4 sm:$0xff]   ;;  %v5992_v61 = vld [vmem:[%s7255_s3 + $0x80] ss:$16 sps:$4 sm:$0xff]   ;;  %p5240_p9 = scmp.ne.s32.totalorder %s8130_s5, 3 }
0x1f11   : > { %5110 = vmatmul.mubr.msk.bf16.vlgmr.msra.gmra.mxu0 %vm3283_vm15, %v3212_v45  ;;  %5111 = vmatmul.mubr.msk.bf16.vlgmr.msra.gmra.mxu1 %vm3283_vm15, %v3212_v45  ;;  %v5997_v59 = vld [vmem:[%s7255_s3 + $0x284] ss:$16 sps:$4 sm:$0xff]   ;;  %v5995_v63 = vld [vmem:[%s7255_s3 + $0x280] ss:$16 sps:$4 sm:$0xff]   ;;  %v6075_v45 = vld [vmem:[%s7255_s3 + $0x2ec] ss:$16 sps:$4 sm:$0xff]  }
0x1f12   : > { %4147 = vmatpush1.bf16.msra.mxu0 %v5974_v60  ;;  %4188 = vmatpush1.bf16.msra.mxu1 %v5977_v46  ;;  %v6000_v16 = vld [vmem:[%s7255_s3 + $0x64] ss:$16 sps:$4 sm:$0xff]   ;;  %v5998_v62 = vld [vmem:[%s7255_s3 + $0x60] ss:$16 sps:$4 sm:$0xff]   ;;  %v3223_v46 = vlaneseq  ;;  %s8131_s4 = sld [smem:[#allocation61_spill]] (!%p5240_p9) }
0x1f13   : > { %4148 = vmatprep.subr.bf16.mxu0 %v5982_v0  ;;  %4189 = vmatprep.subr.bf16.mxu1 %v5985_v48  ;;  %v6003_v57 = vld [vmem:[%s7255_s3 + $0x264] ss:$16 sps:$4 sm:$0xff]   ;;  %v6001_v2 = vld [vmem:[%s7255_s3 + $0x260] ss:$16 sps:$4 sm:$0xff]   ;;  %s8132_s6 = sld [smem:[#allocation62_spill]] (!%p5240_p9) }
0x1f14   : > { %v6006_v21 = vld [vmem:[%s7255_s3 + $0x44] ss:$16 sps:$4 sm:$0xff]   ;;  %v6004_v4 = vld [vmem:[%s7255_s3 + $0x40] ss:$16 sps:$4 sm:$0xff]   ;;  %v7767_v47 = vshrl.u32 %v3223_v46, 7 }
0x1f15   : > { %v6009_v3 = vld [vmem:[%s7255_s3 + $0x244] ss:$16 sps:$4 sm:$0xff]   ;;  %v6007_v7 = vld [vmem:[%s7255_s3 + $0x240] ss:$16 sps:$4 sm:$0xff]   ;;  %v6121_v46 = vld [vmem:[%s7255_s3 + $0x3e8] ss:$16 sps:$4 sm:$0xff]  }
0x1f16   : > { %4149 = vmatpush1.bf16.msra.mxu0 %v5980_v49  ;;  %4190 = vmatpush1.bf16.msra.mxu1 %v5983_v50  ;;  %v6012_v53 = vld [vmem:[%s7255_s3 + $0x24] ss:$16 sps:$4 sm:$0xff]   ;;  %v6010_v51 = vld [vmem:[%s7255_s3 + $0x20] ss:$16 sps:$4 sm:$0xff]   ;;  %v3225_v0 = vsub.s32 0, %v7767_v47  ;;  %v3233_v48 = vsub.s32 2, %v7767_v47 }
0x1f17   : > { %4150 = vmatprep.subr.bf16.mxu0 %v5988_v52  ;;  %4191 = vmatprep.subr.bf16.mxu1 %v5991_v54  ;;  %v6015_v5 = vld [vmem:[%s7255_s3 + $0x224] ss:$16 sps:$4 sm:$0xff]   ;;  %v6013_v13 = vld [vmem:[%s7255_s3 + $0x220] ss:$16 sps:$4 sm:$0xff]   ;;  %v3221_v49 = vld [vmem:[%s7253_s10] sm:$0xf] }
0x1f18   : > { %v6018_v6 = vld [vmem:[%s7255_s3 + $0x4] ss:$16 sps:$4 sm:$0xff]   ;;  %v6016_v9 = vld [vmem:[%s7255_s3] ss:$16 sps:$4 sm:$0xff]   ;;  %v3229_v50 = vsub.s32 1, %v7767_v47  ;;  %v3237_v52 = vsub.s32 3, %v7767_v47  ;;  %v3226_v54 = vrot.slane %v3221_v49, %v3225_v0 }
0x1f19   : > { %v6021_v8 = vld [vmem:[%s7255_s3 + $0x204] ss:$16 sps:$4 sm:$0xff]   ;;  %v6019_v10 = vld [vmem:[%s7255_s3 + $0x200] ss:$16 sps:$4 sm:$0xff]  }
0x1f1a   : > { %4151 = vmatpush1.bf16.msra.mxu0 %v5986_v55  ;;  %4192 = vmatpush1.bf16.msra.mxu1 %v5989_v56  ;;  %v6024_v11 = vld [vmem:[%s7255_s3 + $0x1e4] ss:$16 sps:$4 sm:$0xff]   ;;  %v6022_v15 = vld [vmem:[%s7255_s3 + $0x1e0] ss:$16 sps:$4 sm:$0xff]   ;;  %v3234_v55 = vrot.slane %v3221_v49, %v3233_v48  ;;  %v3230_v56 = vrot.slane %v3221_v49, %v3229_v50 }
0x1f1b   : > { %4152 = vmatprep.subr.bf16.mxu0 %v5994_v58  ;;  %4193 = vmatprep.subr.bf16.mxu1 %v5997_v59  ;;  %v6027_v14 = vld [vmem:[%s7255_s3 + $0x3e4] ss:$16 sps:$4 sm:$0xff]   ;;  %v6025_v31 = vld [vmem:[%s7255_s3 + $0x3e0] ss:$16 sps:$4 sm:$0xff]   ;;  %v3238_v58 = vrot.slane %v3221_v49, %v3237_v52  ;;  %v6126_v49 = vld [vmem:[%s7255_s3 + $0x1cc] ss:$16 sps:$4 sm:$0xff]  }
0x1f1c   : > { %v6030_v18 = vld [vmem:[%s7255_s3 + $0x1c4] ss:$16 sps:$4 sm:$0xff]   ;;  %v6028_v20 = vld [vmem:[%s7255_s3 + $0x1c0] ss:$16 sps:$4 sm:$0xff]  }
0x1f1d   : > { %v6033_v27 = vld [vmem:[%s7255_s3 + $0x3c4] ss:$16 sps:$4 sm:$0xff]   ;;  %v6031_v17 = vld [vmem:[%s7255_s3 + $0x3c0] ss:$16 sps:$4 sm:$0xff]  }
0x1f1e   : > { %4153 = vmatpush1.bf16.msra.mxu0 %v5992_v61  ;;  %4194 = vmatpush1.bf16.msra.mxu1 %v5995_v63  ;;  %v6036_v22 = vld [vmem:[%s7255_s3 + $0x1a4] ss:$16 sps:$4 sm:$0xff]   ;;  %v6034_v24 = vld [vmem:[%s7255_s3 + $0x1a0] ss:$16 sps:$4 sm:$0xff]  }
0x1f1f   : > { %4154 = vmatprep.subr.bf16.mxu0 %v6000_v16  ;;  %4195 = vmatprep.subr.bf16.mxu1 %v6003_v57  ;;  %v6039_v23 = vld [vmem:[%s7255_s3 + $0x3a4] ss:$16 sps:$4 sm:$0xff]   ;;  %v6037_v25 = vld [vmem:[%s7255_s3 + $0x3a0] ss:$16 sps:$4 sm:$0xff]  }
0x1f20   : > { %v6042_v26 = vld [vmem:[%s7255_s3 + $0x184] ss:$16 sps:$4 sm:$0xff]   ;;  %v6040_v37 = vld [vmem:[%s7255_s3 + $0x180] ss:$16 sps:$4 sm:$0xff]  }
0x1f21   : > { %v6045_v28 = vld [vmem:[%s7255_s3 + $0x384] ss:$16 sps:$4 sm:$0xff]   ;;  %v6043_v32 = vld [vmem:[%s7255_s3 + $0x380] ss:$16 sps:$4 sm:$0xff]  }
0x1f22   : > { %4155 = vmatpush1.bf16.msra.mxu0 %v5998_v62  ;;  %4196 = vmatpush1.bf16.msra.mxu1 %v6001_v2  ;;  %v6048_v1 = vld [vmem:[%s7255_s3 + $0x164] ss:$16 sps:$4 sm:$0xff]   ;;  %v6046_v36 = vld [vmem:[%s7255_s3 + $0x160] ss:$16 sps:$4 sm:$0xff]  }
0x1f23   : > { %4156 = vmatprep.subr.bf16.mxu0 %v6006_v21  ;;  %4197 = vmatprep.subr.bf16.mxu1 %v6009_v3  ;;  %v6051_v33 = vld [vmem:[%s7255_s3 + $0x364] ss:$16 sps:$4 sm:$0xff]   ;;  %v6049_v34 = vld [vmem:[%s7255_s3 + $0x360] ss:$16 sps:$4 sm:$0xff]  }
0x1f24   : > { %v6054_v19 = vld [vmem:[%s7255_s3 + $0x144] ss:$16 sps:$4 sm:$0xff]   ;;  %v6052_v38 = vld [vmem:[%s7255_s3 + $0x140] ss:$16 sps:$4 sm:$0xff]  }
0x1f25   : > { %v6057_v35 = vld [vmem:[%s7255_s3 + $0x344] ss:$16 sps:$4 sm:$0xff]   ;;  %v6055_v39 = vld [vmem:[%s7255_s3 + $0x340] ss:$16 sps:$4 sm:$0xff]  }
0x1f26   : > { %4157 = vmatpush1.bf16.msra.mxu0 %v6004_v4  ;;  %4198 = vmatpush1.bf16.msra.mxu1 %v6007_v7  ;;  %v6060_v40 = vld [vmem:[%s7255_s3 + $0x124] ss:$16 sps:$4 sm:$0xff]   ;;  %v6058_v42 = vld [vmem:[%s7255_s3 + $0x120] ss:$16 sps:$4 sm:$0xff]  }
0x1f27   : > { %4158 = vmatprep.subr.bf16.mxu0 %v6012_v53  ;;  %4199 = vmatprep.subr.bf16.mxu1 %v6015_v5  ;;  %v6063_v41 = vld [vmem:[%s7255_s3 + $0x324] ss:$16 sps:$4 sm:$0xff]   ;;  %v6061_v30 = vld [vmem:[%s7255_s3 + $0x320] ss:$16 sps:$4 sm:$0xff]  }
0x1f28   : > { %v6066_v43 = vld [vmem:[%s7255_s3 + $0x104] ss:$16 sps:$4 sm:$0xff]   ;;  %v6064_v29 = vld [vmem:[%s7255_s3 + $0x100] ss:$16 sps:$4 sm:$0xff]  }
0x1f29   : > { %v6069_v12 = vld [vmem:[%s7255_s3 + $0x304] ss:$16 sps:$4 sm:$0xff]   ;;  %v6067_v60 = vld [vmem:[%s7255_s3 + $0x300] ss:$16 sps:$4 sm:$0xff]  }
0x1f2a   : > { %4159 = vmatpush1.bf16.msra.mxu0 %v6010_v51  ;;  %4200 = vmatpush1.bf16.msra.mxu1 %v6013_v13 }
0x1f2b   : > { %4160 = vmatprep.subr.bf16.mxu0 %v6018_v6  ;;  %4201 = vmatprep.subr.bf16.mxu1 %v6021_v8 }
0x1f2e   : > { %4161 = vmatpush1.bf16.msra.mxu0 %v6016_v9  ;;  %4202 = vmatpush1.bf16.msra.mxu1 %v6019_v10  ;;  %v6070_v10 = vld [vmem:[%s7255_s3 + $0xe8] ss:$16 sps:$4 sm:$0xff]  }
0x1f2f   : > { %4162 = vmatprep.subr.bf16.mxu0 %v6024_v11  ;;  %4203 = vmatprep.subr.bf16.mxu1 %v6027_v14  ;;  %v6073_v11 = vld [vmem:[%s7255_s3 + $0x2e8] ss:$16 sps:$4 sm:$0xff]  }
0x1f32   : > { %4163 = vmatpush2.bf16.msra.mxu0 %v6022_v15  ;;  %4204 = vmatpush2.bf16.msra.mxu1 %v6025_v31  ;;  %v6078_v31 = vld [vmem:[%s7255_s3 + $0xcc] ss:$16 sps:$4 sm:$0xff]  }
0x1f33   : > { %4164 = vmatprep.subr.bf16.mxu0 %v6030_v18  ;;  %4205 = vmatprep.subr.bf16.mxu1 %v6033_v27  ;;  %v6081_v18 = vld [vmem:[%s7255_s3 + $0x2cc] ss:$16 sps:$4 sm:$0xff]   ;;  %v6076_v27 = vld [vmem:[%s7255_s3 + $0xc8] ss:$16 sps:$4 sm:$0xff]  }
0x1f36   : > { %4165 = vmatpush2.bf16.msra.mxu0 %v6028_v20  ;;  %4206 = vmatpush2.bf16.msra.mxu1 %v6031_v17  ;;  %v6079_v20 = vld [vmem:[%s7255_s3 + $0x2c8] ss:$16 sps:$4 sm:$0xff]   ;;  %v6084_v17 = vld [vmem:[%s7255_s3 + $0xac] ss:$16 sps:$4 sm:$0xff]  }
0x1f37   : > { %4166 = vmatprep.subr.bf16.mxu0 %v6036_v22  ;;  %4207 = vmatprep.subr.bf16.mxu1 %v6039_v23  ;;  %v6087_v22 = vld [vmem:[%s7255_s3 + $0x2ac] ss:$16 sps:$4 sm:$0xff]   ;;  %v6082_v23 = vld [vmem:[%s7255_s3 + $0xa8] ss:$16 sps:$4 sm:$0xff]  }
0x1f3a   : > { %4167 = vmatpush2.bf16.msra.mxu0 %v6034_v24  ;;  %4208 = vmatpush2.bf16.msra.mxu1 %v6037_v25  ;;  %v6085_v24 = vld [vmem:[%s7255_s3 + $0x2a8] ss:$16 sps:$4 sm:$0xff]   ;;  %v6090_v25 = vld [vmem:[%s7255_s3 + $0x8c] ss:$16 sps:$4 sm:$0xff]  }
0x1f3b   : > { %4168 = vmatprep.subr.bf16.mxu0 %v6042_v26  ;;  %4209 = vmatprep.subr.bf16.mxu1 %v6045_v28  ;;  %v6093_v26 = vld [vmem:[%s7255_s3 + $0x28c] ss:$16 sps:$4 sm:$0xff]   ;;  %v6088_v28 = vld [vmem:[%s7255_s3 + $0x88] ss:$16 sps:$4 sm:$0xff]  }
0x1f3e   : > { %4169 = vmatpush2.bf16.msra.mxu0 %v6040_v37  ;;  %4210 = vmatpush2.bf16.msra.mxu1 %v6043_v32  ;;  %v6091_v37 = vld [vmem:[%s7255_s3 + $0x288] ss:$16 sps:$4 sm:$0xff]   ;;  %v6096_v32 = vld [vmem:[%s7255_s3 + $0x6c] ss:$16 sps:$4 sm:$0xff]  }
0x1f3f   : > { %4170 = vmatprep.subr.bf16.mxu0 %v6048_v1  ;;  %4211 = vmatprep.subr.bf16.mxu1 %v6051_v33  ;;  %v6099_v1 = vld [vmem:[%s7255_s3 + $0x26c] ss:$16 sps:$4 sm:$0xff]   ;;  %v6094_v33 = vld [vmem:[%s7255_s3 + $0x68] ss:$16 sps:$4 sm:$0xff]  }
0x1f42   : > { %4171 = vmatpush2.bf16.msra.mxu0 %v6046_v36  ;;  %4212 = vmatpush2.bf16.msra.mxu1 %v6049_v34  ;;  %v6097_v36 = vld [vmem:[%s7255_s3 + $0x268] ss:$16 sps:$4 sm:$0xff]   ;;  %v6102_v34 = vld [vmem:[%s7255_s3 + $0x4c] ss:$16 sps:$4 sm:$0xff]  }
0x1f43   : > { %4172 = vmatprep.subr.bf16.mxu0 %v6054_v19  ;;  %4213 = vmatprep.subr.bf16.mxu1 %v6057_v35  ;;  %v6105_v19 = vld [vmem:[%s7255_s3 + $0x24c] ss:$16 sps:$4 sm:$0xff]   ;;  %v6100_v35 = vld [vmem:[%s7255_s3 + $0x48] ss:$16 sps:$4 sm:$0xff]  }
0x1f46   : > { %4173 = vmatpush2.bf16.msra.mxu0 %v6052_v38  ;;  %4214 = vmatpush2.bf16.msra.mxu1 %v6055_v39  ;;  %v6103_v38 = vld [vmem:[%s7255_s3 + $0x248] ss:$16 sps:$4 sm:$0xff]   ;;  %v6108_v39 = vld [vmem:[%s7255_s3 + $0x2c] ss:$16 sps:$4 sm:$0xff]  }
0x1f47   : > { %4174 = vmatprep.subr.bf16.mxu0 %v6060_v40  ;;  %4215 = vmatprep.subr.bf16.mxu1 %v6063_v41  ;;  %v6111_v40 = vld [vmem:[%s7255_s3 + $0x22c] ss:$16 sps:$4 sm:$0xff]   ;;  %v6106_v41 = vld [vmem:[%s7255_s3 + $0x28] ss:$16 sps:$4 sm:$0xff]  }
0x1f4a   : > { %4175 = vmatpush2.bf16.msra.mxu0 %v6058_v42  ;;  %4216 = vmatpush2.bf16.msra.mxu1 %v6061_v30  ;;  %v6109_v42 = vld [vmem:[%s7255_s3 + $0x228] ss:$16 sps:$4 sm:$0xff]   ;;  %v6114_v30 = vld [vmem:[%s7255_s3 + $0xc] ss:$16 sps:$4 sm:$0xff]  }
0x1f4b   : > { %4176 = vmatprep.subr.bf16.mxu0 %v6066_v43  ;;  %4217 = vmatprep.subr.bf16.mxu1 %v6069_v12  ;;  %v6117_v43 = vld [vmem:[%s7255_s3 + $0x20c] ss:$16 sps:$4 sm:$0xff]   ;;  %v6112_v12 = vld [vmem:[%s7255_s3 + $0x8] ss:$16 sps:$4 sm:$0xff]  }
0x1f4e   : > { %4177 = vmatpush2.bf16.msra.mxu0 %v6064_v29  ;;  %4218 = vmatpush2.bf16.msra.mxu1 %v6067_v60  ;;  %v6115_v29 = vld [vmem:[%s7255_s3 + $0x208] ss:$16 sps:$4 sm:$0xff]   ;;  %v6120_v60 = vld [vmem:[%s7255_s3 + $0x1ec] ss:$16 sps:$4 sm:$0xff]  }
0x1f4f   : > { %4228 = vmatprep.subr.bf16.mxu0 %v6072_v44  ;;  %4269 = vmatprep.subr.bf16.mxu1 %v6075_v45  ;;  %v6123_v44 = vld [vmem:[%s7255_s3 + $0x3ec] ss:$16 sps:$4 sm:$0xff]   ;;  %v6118_v45 = vld [vmem:[%s7255_s3 + $0x1e8] ss:$16 sps:$4 sm:$0xff]  }
0x1fd1   : > { %v3321_v59 = vpop.f32.mrf.mxu0  ;;  %v3362_v61 = vpop.f32.mrf.mxu1 }
0x1fd2   : > { %v3322_v63 = vadd.f32 %v3321_v59, %v3226_v54  ;;  %v3363_v16 = vadd.f32 %v3362_v61, %v3234_v55  ;;  %v6129_v54 = vld [vmem:[%s7255_s3 + $0x3cc] ss:$16 sps:$4 sm:$0xff]   ;;  %v6124_v55 = vld [vmem:[%s7255_s3 + $0x1c8] ss:$16 sps:$4 sm:$0xff]  }
0x1fd3   : > { %v3323_v57 = vpop.f32.mrf.mxu0  ;;  %v3364_v62 = vpop.f32.mrf.mxu1  ;;  %v6135_v59 = vld [vmem:[%s7255_s3 + $0x3ac] ss:$16 sps:$4 sm:$0xff]   ;;  %v6130_v61 = vld [vmem:[%s7255_s3 + $0x1a8] ss:$16 sps:$4 sm:$0xff]  }
0x1fd4   : > { %v3324_v2 = vadd.f32 %v3323_v57, %v3230_v56  ;;  %v3365_v21 = vadd.f32 %v3364_v62, %v3238_v58  ;;  %v3369_v3 = vmax.f32 %v3322_v63, 0.0  ;;  %v3371_v4 = vmax.f32 %v3363_v16, 0.0  ;;  %v6127_v56 = vld [vmem:[%s7255_s3 + $0x3c8] ss:$16 sps:$4 sm:$0xff]   ;;  %v6132_v58 = vld [vmem:[%s7255_s3 + $0x1ac] ss:$16 sps:$4 sm:$0xff]  }
0x1fd5   : > { %v3325_v7 = vpop.f32.mrf.mxu0  ;;  %v3366_v53 = vpop.f32.mrf.mxu1  ;;  %v6133_v63 = vld [vmem:[%s7255_s3 + $0x3a8] ss:$16 sps:$4 sm:$0xff]   ;;  %v6138_v16 = vld [vmem:[%s7255_s3 + $0x18c] ss:$16 sps:$4 sm:$0xff]  }
0x1fd6   : > { %v3370_v5 = vmax.f32 %v3324_v2, 0.0  ;;  %v3372_v51 = vmax.f32 %v3365_v21, 0.0  ;;  %v7784_v14 = vpack.c.bf16 %v3369_v3, %v3369_v3  ;;  %v7786_v15 = vpack.c.bf16 %v3371_v4, %v3371_v4  ;;  %v6141_v57 = vld [vmem:[%s7255_s3 + $0x38c] ss:$16 sps:$4 sm:$0xff]   ;;  %v6136_v62 = vld [vmem:[%s7255_s3 + $0x188] ss:$16 sps:$4 sm:$0xff]  }
0x1fd7   : > { %v3326_v13 = vpop.f32.mrf.mxu0  ;;  %v3367_v6 = vpop.f32.mrf.mxu1  ;;  %v6139_v2 = vld [vmem:[%s7255_s3 + $0x388] ss:$16 sps:$4 sm:$0xff]   ;;  %v6144_v21 = vld [vmem:[%s7255_s3 + $0x16c] ss:$16 sps:$4 sm:$0xff]  }
0x1fd8   : > { %v3375_v8 = vpack.c.bf16 %v3370_v5, %v3370_v5  ;;  %v3377_v9 = vpack.c.bf16 %v3372_v51, %v3372_v51  ;;  %v6147_v3 = vld [vmem:[%s7255_s3 + $0x36c] ss:$16 sps:$4 sm:$0xff]   ;;  %v6142_v4 = vld [vmem:[%s7255_s3 + $0x168] ss:$16 sps:$4 sm:$0xff]  }
0x1fd9   : > { %v6145_v7 = vld [vmem:[%s7255_s3 + $0x368] ss:$16 sps:$4 sm:$0xff]   ;;  %v6150_v53 = vld [vmem:[%s7255_s3 + $0x14c] ss:$16 sps:$4 sm:$0xff]  }
0x1fda   : > { %4178 = vmatprep.mubr.bf16.mxu0 %v3375_v8  ;;  %4219 = vmatprep.mubr.bf16.mxu1 %v3377_v9  ;;  %v6153_v5 = vld [vmem:[%s7255_s3 + $0x34c] ss:$16 sps:$4 sm:$0xff]   ;;  %v6148_v51 = vld [vmem:[%s7255_s3 + $0x148] ss:$16 sps:$4 sm:$0xff]  }
0x1fdb   : > { %4179 = vmatmul.mubr.bf16.vlgmr.msra.gmra.mxu0 %v7784_v14  ;;  %4220 = vmatmul.mubr.bf16.vlgmr.msra.gmra.mxu1 %v7786_v15  ;;  %v6151_v13 = vld [vmem:[%s7255_s3 + $0x348] ss:$16 sps:$4 sm:$0xff]   ;;  %v6156_v6 = vld [vmem:[%s7255_s3 + $0x12c] ss:$16 sps:$4 sm:$0xff]  }
0x1fdc   : > { %4229 = vmatpush1.bf16.msra.mxu0 %v6070_v10  ;;  %4270 = vmatpush1.bf16.msra.mxu1 %v6073_v11  ;;  %v6157_v10 = vld [vmem:[%s7255_s3 + $0x328] ss:$16 sps:$4 sm:$0xff]   ;;  %v6162_v11 = vld [vmem:[%s7255_s3 + $0x10c] ss:$16 sps:$4 sm:$0xff]  }
0x1fdd   : > { %4260 = vmatprep.mubr.bf16.mxu0 %v3375_v8  ;;  %4301 = vmatprep.mubr.bf16.mxu1 %v3377_v9  ;;  %v6159_v8 = vld [vmem:[%s7255_s3 + $0x32c] ss:$16 sps:$4 sm:$0xff]   ;;  %v6154_v9 = vld [vmem:[%s7255_s3 + $0x128] ss:$16 sps:$4 sm:$0xff]  }
0x1fde   : > { %4230 = vmatprep.subr.bf16.mxu0 %v6078_v31  ;;  %4271 = vmatprep.subr.bf16.mxu1 %v6081_v18  ;;  %v6165_v31 = vld [vmem:[%s7255_s3 + $0x30c] ss:$16 sps:$4 sm:$0xff]   ;;  %v6160_v18 = vld [vmem:[%s7255_s3 + $0x108] ss:$16 sps:$4 sm:$0xff]  }
0x1fe0   : > { %4231 = vmatpush1.bf16.msra.mxu0 %v6076_v27  ;;  %4272 = vmatpush1.bf16.msra.mxu1 %v6079_v20  ;;  %v6163_v27 = vld [vmem:[%s7255_s3 + $0x308] ss:$16 sps:$4 sm:$0xff]   ;;  %s8133_s3 = sld [smem:[#allocation63_spill]] (!%p5240_p9) }
0x1fe1   : > { %4232 = vmatprep.subr.bf16.mxu0 %v6084_v17  ;;  %4273 = vmatprep.subr.bf16.mxu1 %v6087_v22 }
0x1fe4   : > { %4233 = vmatpush1.bf16.msra.mxu0 %v6082_v23  ;;  %4274 = vmatpush1.bf16.msra.mxu1 %v6085_v24 }
0x1fe5   : > { %4234 = vmatprep.subr.bf16.mxu0 %v6090_v25  ;;  %4275 = vmatprep.subr.bf16.mxu1 %v6093_v26 }
0x1fe8   : > { %4235 = vmatpush1.bf16.msra.mxu0 %v6088_v28  ;;  %4276 = vmatpush1.bf16.msra.mxu1 %v6091_v37 }
0x1fe9   : > { %4236 = vmatprep.subr.bf16.mxu0 %v6096_v32  ;;  %4277 = vmatprep.subr.bf16.mxu1 %v6099_v1 }
0x1fec   : > { %4237 = vmatpush1.bf16.msra.mxu0 %v6094_v33  ;;  %4278 = vmatpush1.bf16.msra.mxu1 %v6097_v36  ;;  %v6788_v33 = vmov 1983009808  }
0x1fed   : > { %4238 = vmatprep.subr.bf16.mxu0 %v6102_v34  ;;  %4279 = vmatprep.subr.bf16.mxu1 %v6105_v19  ;;  %v4317_v36 = vunpack.c.l.s4 %v6788_v33 }
0x1fef   : > { %v4318_v34 = vunpack.c.0.s8 %v4317_v36 }
0x1ff0   : > { %4239 = vmatpush1.bf16.msra.mxu0 %v6100_v35  ;;  %4280 = vmatpush1.bf16.msra.mxu1 %v6103_v38 }
0x1ff1   : > { %4240 = vmatprep.subr.bf16.mxu0 %v6108_v39  ;;  %4281 = vmatprep.subr.bf16.mxu1 %v6111_v40 }
0x1ff4   : > { %4241 = vmatpush1.bf16.msra.mxu0 %v6106_v41  ;;  %4282 = vmatpush1.bf16.msra.mxu1 %v6109_v42 }
0x1ff5   : > { %4242 = vmatprep.subr.bf16.mxu0 %v6114_v30  ;;  %4283 = vmatprep.subr.bf16.mxu1 %v6117_v43 }
0x1ff8   : > { %4243 = vmatpush1.bf16.msra.mxu0 %v6112_v12  ;;  %4284 = vmatpush1.bf16.msra.mxu1 %v6115_v29 }
0x1ff9   : > { %4244 = vmatprep.subr.bf16.mxu0 %v6120_v60  ;;  %4285 = vmatprep.subr.bf16.mxu1 %v6123_v44  ;;  %v3373_v44 = vld [vmem:[#allocation3] sm:$0xff] }
0x1ffc   : > { %4245 = vmatpush2.bf16.msra.mxu0 %v6118_v45  ;;  %4286 = vmatpush2.bf16.msra.mxu1 %v6121_v46 }
0x1ffd   : > { %4246 = vmatprep.subr.bf16.mxu0 %v6126_v49  ;;  %4287 = vmatprep.subr.bf16.mxu1 %v6129_v54 }
0x2000   : > { %4247 = vmatpush2.bf16.msra.mxu0 %v6124_v55  ;;  %4288 = vmatpush2.bf16.msra.mxu1 %v6127_v56 }
0x2001   : > { %4248 = vmatprep.subr.bf16.mxu0 %v6132_v58  ;;  %4289 = vmatprep.subr.bf16.mxu1 %v6135_v59 }
0x2004   : > { %4249 = vmatpush2.bf16.msra.mxu0 %v6130_v61  ;;  %4290 = vmatpush2.bf16.msra.mxu1 %v6133_v63 }
0x2005   : > { %4250 = vmatprep.subr.bf16.mxu0 %v6138_v16  ;;  %4291 = vmatprep.subr.bf16.mxu1 %v6141_v57 }
0x2008   : > { %4251 = vmatpush2.bf16.msra.mxu0 %v6136_v62  ;;  %4292 = vmatpush2.bf16.msra.mxu1 %v6139_v2 }
0x2009   : > { %4252 = vmatprep.subr.bf16.mxu0 %v6144_v21  ;;  %4293 = vmatprep.subr.bf16.mxu1 %v6147_v3 }
0x200c   : > { %4253 = vmatpush2.bf16.msra.mxu0 %v6142_v4  ;;  %4294 = vmatpush2.bf16.msra.mxu1 %v6145_v7 }
0x200d   : > { %4254 = vmatprep.subr.bf16.mxu0 %v6150_v53  ;;  %4295 = vmatprep.subr.bf16.mxu1 %v6153_v5 }
0x2010   : > { %4255 = vmatpush2.bf16.msra.mxu0 %v6148_v51  ;;  %4296 = vmatpush2.bf16.msra.mxu1 %v6151_v13 }
0x2011   : > { %4256 = vmatprep.subr.bf16.mxu0 %v6156_v6  ;;  %4297 = vmatprep.subr.bf16.mxu1 %v6159_v8 }
0x2014   : > { %4257 = vmatpush2.bf16.msra.mxu0 %v6154_v9  ;;  %4298 = vmatpush2.bf16.msra.mxu1 %v6157_v10 }
0x2015   : > { %4258 = vmatprep.subr.bf16.mxu0 %v6162_v11  ;;  %4299 = vmatprep.subr.bf16.mxu1 %v6165_v31 }
0x2018   : > { %4259 = vmatpush2.bf16.msra.mxu0 %v6160_v18  ;;  %4300 = vmatpush2.bf16.msra.mxu1 %v6163_v27 }
0x201b   : > { %4261 = vmatmul.mubr.bf16.vlgmr.msra.gmra.mxu0 %v7784_v14  ;;  %4302 = vmatmul.mubr.bf16.vlgmr.msra.gmra.mxu1 %v7786_v15  ;;  %v7853_v15 = vsub.s32 %v4318_v34, %v7767_v47 }
0x209b   : > { %v4180_v20 = vpop.f32.mrf.mxu0  ;;  %v4221_v17 = vpop.f32.mrf.mxu1 }
0x209c   : > { %v4222_v22 = vadd.f32 %v4221_v17, %v4180_v20 }
0x209d   : > { %v4182_v23 = vpop.f32.mrf.mxu0  ;;  %v4223_v24 = vpop.f32.mrf.mxu1 }
0x209e   : > { %v4224_v25 = vadd.f32 %v4223_v24, %v4182_v23 }
0x209f   : > { %v4184_v26 = vpop.f32.mrf.mxu0  ;;  %v4225_v28 = vpop.f32.mrf.mxu1 }
0x20a0   : > { %v4314_v37 = vcombine.low %v4222_v22, %v4224_v25 }
0x20a1   : > { %v4185_v32 = vpop.f32.mrf.mxu0  ;;  %v4226_v1 = vpop.f32.mrf.mxu1 }
0x20a2   : > { %v4322_v29 = vrot.slane %v4314_v37, %v7853_v15 }
0x20db   : > { %v4262_v19 = vpop.f32.mrf.mxu0  ;;  %v4303_v35 = vpop.f32.mrf.mxu1 }
0x20dc   : > { %v4304_v39 = vadd.f32 %v4303_v35, %v4262_v19 }
0x20dd   : > { %v4264_v38 = vpop.f32.mrf.mxu0  ;;  %v4305_v14 = vpop.f32.mrf.mxu1 }
0x20de   : > { %v4306_v40 = vadd.f32 %v4305_v14, %v4264_v38 }
0x20df   : > { %v4266_v41 = vpop.f32.mrf.mxu0  ;;  %v4307_v42 = vpop.f32.mrf.mxu1 }
0x20e0   : > { %v4315_v30 = vcombine.low %v4304_v39, %v4306_v40 }
0x20e1   : > { %v4267_v43 = vpop.f32.mrf.mxu0  ;;  %v4308_v12 = vpop.f32.mrf.mxu1 }
0x20e2   : > { %v4329_v60 = vrot.slane %v4315_v30, %v7853_v15 }
0x20e4   : > { %v4330_v45 = vcombine.low %v4322_v29, %v4329_v60  ;;  %4337 = sbr.rel (%p5240_p9) target bundleno = 8661 (0x21d5), region = 196 }
0x20e6   : > { %v4332_v46 = vadd.f32 %v4330_v45, %v3373_v44 }
0x20e8   : > { %4333 = vst [vmem:[#allocation3] sm:$0xff] %v4332_v46 }
0x20e9   : > { %v6166_v49 = vld [vmem:[%s8131_s4 + $0x78] sm:$0xff]   ;;  %v6170_v58 = vld [vmem:[%s8131_s4 + $0x70] sm:$0xff]   ;;  %v6174_v16 = vld [vmem:[%s8131_s4 + $0x68] sm:$0xff]  }
0x20ea   : > { %v6167_v54 = vld [vmem:[%s8131_s4 + $0xf8] sm:$0xff]   ;;  %5348 = vmatprep.subr.bf16.mxu0 %v6166_v49  ;;  %v6171_v59 = vld [vmem:[%s8131_s4 + $0xf0] sm:$0xff]   ;;  %v6175_v57 = vld [vmem:[%s8131_s4 + $0xe8] sm:$0xff]  }
0x20eb   : > { %v6168_v55 = vld [vmem:[%s8131_s4 + $0x38] sm:$0xff]   ;;  %5370 = vmatprep.subr.bf16.mxu1 %v6167_v54  ;;  %v6172_v61 = vld [vmem:[%s8131_s4 + $0x30] sm:$0xff]   ;;  %v6176_v62 = vld [vmem:[%s8131_s4 + $0x28] sm:$0xff]  }
0x20ec   : > { %v6169_v56 = vld [vmem:[%s8131_s4 + $0xb8] sm:$0xff]   ;;  %5349 = vmatpush3.bf16.msra.mxu0 %v6168_v55  ;;  %v6173_v63 = vld [vmem:[%s8131_s4 + $0xb0] sm:$0xff]   ;;  %v6177_v2 = vld [vmem:[%s8131_s4 + $0xa8] sm:$0xff]  }
0x20ed   : > { %5371 = vmatpush3.bf16.msra.mxu1 %v6169_v56  ;;  %5350 = vmatprep.subr.bf16.mxu0 %v6170_v58  ;;  %v6178_v21 = vld [vmem:[%s8131_s4 + $0x60] sm:$0xff]   ;;  %v6182_v53 = vld [vmem:[%s8131_s4 + $0x58] sm:$0xff]   ;;  %v6186_v6 = vld [vmem:[%s8131_s4 + $0x50] sm:$0xff]  }
0x20ee   : > { %5372 = vmatprep.subr.bf16.mxu1 %v6171_v59  ;;  %v6179_v3 = vld [vmem:[%s8131_s4 + $0xe0] sm:$0xff]   ;;  %v6183_v5 = vld [vmem:[%s8131_s4 + $0xd8] sm:$0xff]   ;;  %v6187_v8 = vld [vmem:[%s8131_s4 + $0xd0] sm:$0xff]  }
0x20ef   : > { %v6180_v4 = vld [vmem:[%s8131_s4 + $0x20] sm:$0xff]   ;;  %v6184_v51 = vld [vmem:[%s8131_s4 + $0x18] sm:$0xff]   ;;  %v6188_v9 = vld [vmem:[%s8131_s4 + $0x10] sm:$0xff]  }
0x20f0   : > { %5351 = vmatpush3.bf16.msra.mxu0 %v6172_v61  ;;  %v6181_v7 = vld [vmem:[%s8131_s4 + $0xa0] sm:$0xff]   ;;  %v6185_v13 = vld [vmem:[%s8131_s4 + $0x98] sm:$0xff]   ;;  %v6189_v10 = vld [vmem:[%s8131_s4 + $0x90] sm:$0xff]  }
0x20f1   : > { %5373 = vmatpush3.bf16.msra.mxu1 %v6173_v63  ;;  %5352 = vmatprep.subr.bf16.mxu0 %v6174_v16  ;;  %v6190_v11 = vld [vmem:[%s8131_s4 + $0x48] sm:$0xff]   ;;  %v6194_v20 = vld [vmem:[%s8131_s4 + $0x40] sm:$0xff]  }
0x20f2   : > { %5374 = vmatprep.subr.bf16.mxu1 %v6175_v57  ;;  %v6191_v31 = vld [vmem:[%s8131_s4 + $0xc8] sm:$0xff]   ;;  %v6195_v17 = vld [vmem:[%s8131_s4 + $0xc0] sm:$0xff]  }
0x20f3   : > { %v6192_v18 = vld [vmem:[%s8131_s4 + $0x8] sm:$0xff]   ;;  %v6196_v22 = vld [vmem:[%s8131_s4] sm:$0xff]  }
0x20f4   : > { %5353 = vmatpush3.bf16.msra.mxu0 %v6176_v62  ;;  %v6193_v27 = vld [vmem:[%s8131_s4 + $0x88] sm:$0xff]   ;;  %v6197_v23 = vld [vmem:[%s8131_s4 + $0x80] sm:$0xff]  }
0x20f5   : > { %5375 = vmatpush3.bf16.msra.mxu1 %v6177_v2  ;;  %5354 = vmatprep.subr.bf16.mxu0 %v6178_v21  ;;  %v4339_v24 = vld [vmem:[#allocation29] sm:$0xf]  ;;  %v5241_v43 = vld [vmem:[%s8132_s6] ss:$0 sm:$0xff] }
0x20f6   : > { %5376 = vmatprep.subr.bf16.mxu1 %v6179_v3  ;;  %v4344_v25 = vrot.slane %v4339_v24, %v3225_v0  ;;  %v4348_v26 = vrot.slane %v4339_v24, %v3229_v50  ;;  %v4352_v28 = vrot.slane %v4339_v24, %v3233_v48  ;;  %v4356_v37 = vrot.slane %v4339_v24, %v3237_v52  ;;  %v4338_v34 = vld [vmem:[#allocation3] sm:$0xff] }
0x20f8   : > { %5355 = vmatpush3.bf16.msra.mxu0 %v6180_v4  ;;  %v4357_v32 = vcombine.low %v4344_v25, %v4348_v26  ;;  %v4358_v1 = vcombine.low %v4352_v28, %v4356_v37 }
0x20f9   : > { %5377 = vmatpush3.bf16.msra.mxu1 %v6181_v7  ;;  %5356 = vmatprep.subr.bf16.mxu0 %v6182_v53 }
0x20fa   : > { %5378 = vmatprep.subr.bf16.mxu1 %v6183_v5  ;;  %v4365_v33 = vrot.slane %v4357_v32, %v7853_v15  ;;  %v4372_v36 = vrot.slane %v4358_v1, %v7853_v15 }
0x20fc   : > { %5357 = vmatpush3.bf16.msra.mxu0 %v6184_v51  ;;  %v4373_v19 = vcombine.low %v4365_v33, %v4372_v36 }
0x20fd   : > { %5379 = vmatpush3.bf16.msra.mxu1 %v6185_v13  ;;  %5358 = vmatprep.subr.bf16.mxu0 %v6186_v6 }
0x20fe   : > { %5380 = vmatprep.subr.bf16.mxu1 %v6187_v8  ;;  %v4375_v35 = vadd.f32 %v4373_v19, %v4338_v34 }
0x2100   : > { %5359 = vmatpush3.bf16.msra.mxu0 %v6188_v9  ;;  %v4376_v38 = vmax.f32 %v4375_v35, 0.0 }
0x2101   : > { %5381 = vmatpush3.bf16.msra.mxu1 %v6189_v10  ;;  %5360 = vmatprep.subr.bf16.mxu0 %v6190_v11 }
0x2102   : > { %5382 = vmatprep.subr.bf16.mxu1 %v6191_v31  ;;  %v4385_v0 = vrot.slane %v4376_v38, %v7853_v15  ;;  %v4378_v14 = vcombine.high %v4376_v38, %v4376_v38 }
0x2104   : > { %5361 = vmatpush3.bf16.msra.mxu0 %v6192_v18  ;;  %v4393_v50 = vcombine.high %v4385_v0, %v4385_v0  ;;  %v4392_v39 = vrot.slane %v4378_v14, %v7853_v15  ;;  %v4399_v48 = vpack.c.bf16 %v4385_v0, %v4385_v0 }
0x2105   : > { %5383 = vmatpush3.bf16.msra.mxu1 %v6193_v27  ;;  %5362 = vmatprep.subr.bf16.mxu0 %v6194_v20 }
0x2106   : > { %5384 = vmatprep.subr.bf16.mxu1 %v6195_v17  ;;  %v4400_v40 = vpack.c.bf16 %v4393_v50, %v4393_v50  ;;  %v4394_v47 = vcombine.high %v4392_v39, %v4392_v39  ;;  %v4401_v52 = vpack.c.bf16 %v4392_v39, %v4392_v39 }
0x2108   : > { %5363 = vmatpush3.bf16.msra.mxu0 %v6196_v22  ;;  %4698 = vmatprep.mubr.bf16.mxu0 %v4400_v40  ;;  %v4402_v41 = vpack.c.bf16 %v4394_v47, %v4394_v47 }
0x2109   : > { %5385 = vmatpush3.bf16.msra.mxu1 %v6197_v23 }
0x210a   : > { %4738 = vmatprep.mubr.bf16.mxu1 %v4402_v41 }
0x210b   : > { %4699 = vmatmul.mubr.bf16.vlgmr.msra.gmra.mxu0 %v4399_v48 }
0x210c   : > { %4739 = vmatmul.mubr.bf16.vlgmr.msra.gmra.mxu1 %v4401_v52 }
0x21cb   : > { %v5364_v42 = vpop.f32.mrf.mxu0 }
0x21cc   : > { %v5386_v30 = vpop.f32.mrf.mxu1 }
0x21cd   : > { %v5365_v12 = vpop.f32.mrf.mxu0 }
0x21ce   : > { %v5366_v29 = vadd.f32 %v5365_v12, %v5364_v42  ;;  %v5387_v60 = vpop.f32.mrf.mxu1 }
0x21cf   : > { %v5367_v44 = vpop.f32.mrf.mxu0  ;;  %v5388_v45 = vadd.f32 %v5387_v60, %v5386_v30 }
0x21d0   : > { %v4701_v15 = vadd.f32 %v5366_v29, %v5241_v43  ;;  %v5389_v46 = vpop.f32.mrf.mxu1 }
0x21d1   : > { %v5368_v49 = vpop.f32.mrf.mxu0 }
0x21d2   : > { %v4741_v54 = vadd.f32 %v5388_v45, %v4701_v15  ;;  %v5390_v55 = vpop.f32.mrf.mxu1 }
0x21d4   : > { %4746 = vst [vmem:[%s8133_s3] sm:$0x3] %v4741_v54 }
0x21d5 PF: > { %s8134_s28 = sld [smem:[#allocation44_spill]] }
0x21d6   : > { %s8135_s5 = sld [smem:[#allocation40_spill]] }
0x21d7   : > { %s8136_s26 = sld [smem:[#allocation41_spill]] }
0x21d8   : > { %s8137_s27 = sld [smem:[#allocation45_spill]] }
0x21db   : > { %p39_p1 = scmp.ge.s32.totalorder %s8134_s28, 6  }
0x21dd   :  { %41 = sbr.rel (!%p39_p1) target bundleno = 27 (0x1b), region = 253 }
0x21e2   :  { %4758 = vsyncpa [#allocation5], 1 }
0x21e3   :  { %4760 = vsyncpa [#allocation5 + $0x1], 1 }
0x21e4   :  { %4761 = vsyncpa [#allocation7], 1 }
0x21e5   :  { %4762 = vsyncpa [#allocation10], 1 }
0x21e6   :  { %4763 = vsyncpa [#allocation13], 1 }
0x21e7   :  { %4764 = vsyncpa [#allocation16], 1 }
0x21e8   :  { %4765 = vsyncpa [#allocation19], 1 }
0x21e9   :  { %4766 = vsyncpa [#allocation22], 1 }
0x21ea   :  { %4767 = vsyncpa [#allocation25], 1 }

</bundles_post_ra>
